<compile_context>
chip_gen: v6e
topology: v6e:2x2x1
jax: 0.10.0
libtpu: 0.0.40
codegen_flags: <defaults>
</compile_context>

<pallas_src>
import functools
import math

import jax
import jax.numpy as jnp
from jax.experimental import pallas as pl
from jax.experimental.pallas import tpu as pltpu


def _sigmoid(z):
    # Explicit exp + divide -- lowers cleanly in Mosaic (EUP exp + reciprocal)
    # and is used identically in the pure-JAX reference.
    return 1.0 / (1.0 + jnp.exp(-z))


def _bilstm_layer_kernel(len_ref,
                         xf_ref, xb_ref,
                         wfi_ref, wfh_ref, bf_ref,
                         wbi_ref, wbh_ref, bb_ref,
                         of_ref, ob_ref,
                         hf_ref, cf_ref, hb_ref, cb_ref,
                         *, hidden, t_chunk):
    """One time-chunk of a fused bidirectional LSTM layer.

    len_ref : (B, 1) int32   per-batch valid lengths (VMEM-resident)
    x*_ref  : (TC, B, D)     input chunk (fwd: chunk g, bwd: chunk G-1-g)
    w*i_ref : (D, 4H) bf16   input->gates weight (resident)
    w*h_ref : (H, 4H) bf16   hidden->gates weight (resident)
    b*_ref  : (1, 4H) f32    combined bias (b_ih + b_hh, resident)
    o*_ref  : (TC, B, H)     output chunk at the same chunk index
    h*/c*   : (B, H) f32     recurrent state scratch (persists across grid)
    """
    g = pl.program_id(0)
    num_g = pl.num_programs(0)

    @pl.when(g == 0)
    def _():
        hf_ref[...] = jnp.zeros_like(hf_ref)
        cf_ref[...] = jnp.zeros_like(cf_ref)
        hb_ref[...] = jnp.zeros_like(hb_ref)
        cb_ref[...] = jnp.zeros_like(cb_ref)

    lens = len_ref[...]                      # (B, 1) int32

    # Hoist VMEM->vreg weight / bias loads out of the unrolled time loop.
    wfi = wfi_ref[...]
    wfh = wfh_ref[...]
    bf = bf_ref[...]
    wbi = wbi_ref[...]
    wbh = wbh_ref[...]
    bb = bb_ref[...]

    hf = hf_ref[...]
    cf = cf_ref[...]
    hb = hb_ref[...]
    cb = cb_ref[...]

    t0_fwd = g * t_chunk
    t0_bwd = (num_g - 1 - g) * t_chunk

    def step(x_t, h, c, w_ih, w_hh, b, t_time):
        # bf16 MXU feeds, f32 accumulation.
        gates = (jnp.dot(x_t.astype(jnp.bfloat16), w_ih,
                         preferred_element_type=jnp.float32)
                 + jnp.dot(h.astype(jnp.bfloat16), w_hh,
                           preferred_element_type=jnp.float32)
                 + b)
        i_g = _sigmoid(gates[:, 0 * hidden:1 * hidden])
        f_g = _sigmoid(gates[:, 1 * hidden:2 * hidden])
        g_g = jnp.tanh(gates[:, 2 * hidden:3 * hidden])
        o_g = _sigmoid(gates[:, 3 * hidden:4 * hidden])
        c_new = f_g * c + i_g * g_g
        h_new = o_g * jnp.tanh(c_new)
        # Mask: only update state / emit output for valid timesteps.
        mask = t_time < lens                 # (B, 1) bool
        h = jnp.where(mask, h_new, h)
        c = jnp.where(mask, c_new, c)
        out = jnp.where(mask, h_new, 0.0)
        return h, c, out

    # Interleave one forward step and one backward step per iteration: the two
    # directions are independent chains, so the scheduler can overlap them.
    for j in range(t_chunk):
        jb = t_chunk - 1 - j
        hf, cf, out_f = step(xf_ref[j], hf, cf, wfi, wfh, bf, t0_fwd + j)
        of_ref[j] = out_f.astype(of_ref.dtype)
        hb, cb, out_b = step(xb_ref[jb], hb, cb, wbi, wbh, bb, t0_bwd + jb)
        ob_ref[jb] = out_b.astype(ob_ref.dtype)

    hf_ref[...] = hf
    cf_ref[...] = cf
    hb_ref[...] = hb
    cb_ref[...] = cb


def _pick_time_chunk(seq_len, max_chunk=8):
    """Largest divisor of seq_len that is <= max_chunk."""
    for tc in range(min(seq_len, max_chunk), 0, -1):
        if seq_len % tc == 0:
            return tc
    return 1


def _bilstm_layer(x_sbd, lengths_b1, layer_params, *, time_chunk=8):
    """Run one bidirectional LSTM layer.

    x_sbd: (S, B, D) f32, lengths_b1: (B, 1) int32.
    Returns (out_fwd, out_bwd), each (S, B, H) f32.
    """
    S, B, D = x_sbd.shape
    wfi, wfh, bf, wbi, wbh, bb = layer_params
    H = wfh.shape[0]

    tc = _pick_time_chunk(S, time_chunk)
    G = S // tc

    # bf16 weights: halves resident VMEM + HBM weight traffic, matches MXU.
    wfi_b = wfi.astype(jnp.bfloat16)
    wfh_b = wfh.astype(jnp.bfloat16)
    wbi_b = wbi.astype(jnp.bfloat16)
    wbh_b = wbh.astype(jnp.bfloat16)

    kernel = functools.partial(_bilstm_layer_kernel, hidden=H, t_chunk=tc)

    x_fwd_spec = pl.BlockSpec((tc, B, D), lambda g: (g, 0, 0))
    x_bwd_spec = pl.BlockSpec((tc, B, D), lambda g: (G - 1 - g, 0, 0))
    w_ih_spec = pl.BlockSpec((D, 4 * H), lambda g: (0, 0))
    w_hh_spec = pl.BlockSpec((H, 4 * H), lambda g: (0, 0))
    b_spec = pl.BlockSpec((1, 4 * H), lambda g: (0, 0))
    len_spec = pl.BlockSpec((B, 1), lambda g: (0, 0))
    out_f_spec = pl.BlockSpec((tc, B, H), lambda g: (g, 0, 0))
    out_b_spec = pl.BlockSpec((tc, B, H), lambda g: (G - 1 - g, 0, 0))

    flops = 2 * 2 * S * B * 4 * H * (D + H)            # both dirs, both matmuls
    transcendentals = 2 * 6 * S * B * H                # exp/tanh per gate elem
    bytes_accessed = (2 * S * B * D * 4 +              # x read twice
                      2 * S * B * H * 4 +              # two outputs
                      2 * (D * 4 * H + H * 4 * H) * 2 +  # bf16 weights
                      2 * 4 * H * 4 + B * 4)
    cost = pl.CostEstimate(flops=flops, transcendentals=transcendentals,
                           bytes_accessed=bytes_accessed)

    out_f, out_b = pl.pallas_call(
        kernel,
        out_shape=(jax.ShapeDtypeStruct((S, B, H), x_sbd.dtype),
                   jax.ShapeDtypeStruct((S, B, H), x_sbd.dtype)),
        grid_spec=pltpu.PrefetchScalarGridSpec(
            num_scalar_prefetch=0,
            grid=(G,),
            in_specs=[len_spec, x_fwd_spec, x_bwd_spec,
                      w_ih_spec, w_hh_spec, b_spec,
                      w_ih_spec, w_hh_spec, b_spec],
            out_specs=(out_f_spec, out_b_spec),
            scratch_shapes=[pltpu.VMEM((B, H), jnp.float32)] * 4,
        ),
        compiler_params=pltpu.CompilerParams(
            dimension_semantics=("arbitrary",)),       # time recurrence
        cost_estimate=cost,
    )(lengths_b1, x_sbd, x_sbd, wfi_b, wfh_b, bf, wbi_b, wbh_b, bb)
    return out_f, out_b


def rnn_encoder_forward(x, lengths, params_layers, drop_prob=0.0,
                        training=False):
    """x: (B, S, D_in) f32, lengths: (B,) int. Returns (B, S, 2*H)."""
    B, S, _ = x.shape
    lengths_b1 = lengths.reshape(B, 1).astype(jnp.int32)
    # PyTorch's sort / pack / unpack / unsort only exists so cuDNN can batch
    # packed sequences efficiently; the per-timestep length masking inside the
    # kernel is semantically identical (padded outputs are exactly zero).
    inp = x
    for lp in params_layers:
        x_sbd = jnp.transpose(inp, (1, 0, 2))           # (S, B, D)
        out_f, out_b = _bilstm_layer(x_sbd, lengths_b1, lp)
        out = jnp.concatenate([out_f, out_b], axis=-1)  # (S, B, 2H)
        inp = jnp.transpose(out, (1, 0, 2))             # (B, S, 2H)
        # TODO(synk): inter-layer / final dropout in training mode is not
        # implemented (drop_prob=0.0 / eval semantics -> identity).
    return inp


# ----------------------------- pure-JAX reference ---------------------------

def reference_rnn_encoder(x, lengths, params_layers, hidden):
    B, S, _ = x.shape

    def run_dir(inp, w_ih, w_hh, b, reverse):
        w_ih_b = w_ih.astype(jnp.bfloat16)
        w_hh_b = w_hh.astype(jnp.bfloat16)
        h = jnp.zeros((B, hidden), jnp.float32)
        c = jnp.zeros((B, hidden), jnp.float32)
        outs = [None] * S
        time_order = range(S - 1, -1, -1) if reverse else range(S)
        for t in time_order:
            x_t = inp[:, t, :].astype(jnp.bfloat16)
            gates = (jnp.dot(x_t, w_ih_b, preferred_element_type=jnp.float32)
                     + jnp.dot(h.astype(jnp.bfloat16), w_hh_b,
                               preferred_element_type=jnp.float32)
                     + b)
            i_g = _sigmoid(gates[:, :hidden])
            f_g = _sigmoid(gates[:, hidden:2 * hidden])
            g_g = jnp.tanh(gates[:, 2 * hidden:3 * hidden])
            o_g = _sigmoid(gates[:, 3 * hidden:])
            c_new = f_g * c + i_g * g_g
            h_new = o_g * jnp.tanh(c_new)
            mask = (t < lengths)[:, None]
            h = jnp.where(mask, h_new, h)
            c = jnp.where(mask, c_new, c)
            outs[t] = jnp.where(mask, h_new, 0.0)
        return jnp.stack(outs, axis=1)  # (B, S, H)

    inp = x
    for (wfi, wfh, bf, wbi, wbh, bb) in params_layers:
        of = run_dir(inp, wfi, wfh, bf, reverse=False)
        ob = run_dir(inp, wbi, wbh, bb, reverse=True)
        inp = jnp.concatenate([of, ob], axis=-1)
    return inp


# ----------------------------------- test ------------------------------------

def _make_layer_params(key, d_in, hidden):
    scale = 1.0 / math.sqrt(hidden)
    ks = jax.random.split(key, 8)

    def u(k, shape):
        return jax.random.uniform(k, shape, jnp.float32, -scale, scale)

    wfi = u(ks[0], (d_in, 4 * hidden))
    wfh = u(ks[1], (hidden, 4 * hidden))
    bf = u(ks[2], (1, 4 * hidden)) + u(ks[3], (1, 4 * hidden))  # b_ih + b_hh
    wbi = u(ks[4], (d_in, 4 * hidden))
    wbh = u(ks[5], (hidden, 4 * hidden))
    bb = u(ks[6], (1, 4 * hidden)) + u(ks[7], (1, 4 * hidden))
    return (wfi, wfh, bf, wbi, wbh, bb)


if __name__ == "__main__":
    key = jax.random.PRNGKey(0)
    B, S, D_IN, H, NUM_LAYERS = 2, 8, 16, 32, 2

    k_x, k_p0, k_p1 = jax.random.split(key, 3)
    x = jax.random.normal(k_x, (B, S, D_IN), dtype=jnp.float32)
    lengths = jnp.array([8, 5], dtype=jnp.int32)   # second sequence is padded

    params_layers = [
        _make_layer_params(k_p0, D_IN, H),
        _make_layer_params(k_p1, 2 * H, H),
    ]

    out = rnn_encoder_forward(x, lengths, params_layers, drop_prob=0.0,
                              training=False)
    out = jax.block_until_ready(out)

    ref = reference_rnn_encoder(x, lengths, params_layers, H)

    assert out.shape == (B, S, 2 * H), out.shape
    assert jnp.allclose(out, ref, atol=5e-3, rtol=5e-3), (
        float(jnp.max(jnp.abs(out - ref))))
    # Padded positions (t >= length) must be exactly zero, as produced by
    # pad_packed_sequence.
    assert jnp.all(out[1, 5:, :] == 0.0)

    print("KERNEL_OK")
</pallas_src>

<mosaic_0001>
module attributes {stable_mosaic.version = 11 : i64} {
  func.func @_bilstm_layer_kernel(%arg0: i32, %arg1: memref<2x1xi32, #tpu.memory_space<vmem>>, %arg2: memref<8x2x16xf32, #tpu.memory_space<vmem>>, %arg3: memref<8x2x16xf32, #tpu.memory_space<vmem>>, %arg4: memref<16x128xbf16, #tpu.memory_space<vmem>>, %arg5: memref<32x128xbf16, #tpu.memory_space<vmem>>, %arg6: memref<1x128xf32, #tpu.memory_space<vmem>>, %arg7: memref<16x128xbf16, #tpu.memory_space<vmem>>, %arg8: memref<32x128xbf16, #tpu.memory_space<vmem>>, %arg9: memref<1x128xf32, #tpu.memory_space<vmem>>, %arg10: memref<8x2x32xf32, #tpu.memory_space<vmem>>, %arg11: memref<8x2x32xf32, #tpu.memory_space<vmem>>, %arg12: memref<2x32xf32, #tpu.memory_space<vmem>>, %arg13: memref<2x32xf32, #tpu.memory_space<vmem>>, %arg14: memref<2x32xf32, #tpu.memory_space<vmem>>, %arg15: memref<2x32xf32, #tpu.memory_space<vmem>>) attributes {dimension_semantics = [#tpu.dimension_semantics<arbitrary>], iteration_bounds = array<i64: 1>, scalar_prefetch = 0 : i64, scratch_operands = 4 : i64, tpu.core_type = #tpu.core_type<tc>, window_params = [{pipeline_mode = #tpu.pipeline_mode<synchronous>, transform_indices = @transform_0, window_bounds = array<i64: 2, 1>}, {transform_indices = @transform_1, window_bounds = array<i64: 8, 2, 16>}, {transform_indices = @transform_2, window_bounds = array<i64: 8, 2, 16>}, {pipeline_mode = #tpu.pipeline_mode<synchronous>, transform_indices = @transform_3, window_bounds = array<i64: 16, 128>}, {pipeline_mode = #tpu.pipeline_mode<synchronous>, transform_indices = @transform_4, window_bounds = array<i64: 32, 128>}, {pipeline_mode = #tpu.pipeline_mode<synchronous>, transform_indices = @transform_5, window_bounds = array<i64: 1, 128>}, {pipeline_mode = #tpu.pipeline_mode<synchronous>, transform_indices = @transform_6, window_bounds = array<i64: 16, 128>}, {pipeline_mode = #tpu.pipeline_mode<synchronous>, transform_indices = @transform_7, window_bounds = array<i64: 32, 128>}, {pipeline_mode = #tpu.pipeline_mode<synchronous>, transform_indices = @transform_8, window_bounds = array<i64: 1, 128>}, {transform_indices = @transform_9, window_bounds = array<i64: 8, 2, 32>}, {transform_indices = @transform_10, window_bounds = array<i64: 8, 2, 32>}]} {
    %c0_i32 = arith.constant 0 : i32
    %0 = arith.cmpi eq, %arg0, %c0_i32 : i32
    %1 = arith.extui %0 : i1 to i32
    %c0_i32_0 = arith.constant 0 : i32
    %2 = arith.cmpi ne, %1, %c0_i32_0 : i32
    scf.if %2 {
      %cst_321 = arith.constant 0.000000e+00 : f32
      %917 = vector.broadcast %cst_321 : f32 to vector<2x32xf32>
      %c0_322 = arith.constant 0 : index
      %c0_323 = arith.constant 0 : index
      %918 = vector.load %arg12[%c0_322, %c0_323] : memref<2x32xf32, #tpu.memory_space<vmem>>, vector<2x32xf32>
      tpu.vector_store %arg12[%c0_322, %c0_323], %917 {strides = array<i32>} : memref<2x32xf32, #tpu.memory_space<vmem>>, vector<2x32xf32>,
      %cst_324 = arith.constant 0.000000e+00 : f32
      %919 = vector.broadcast %cst_324 : f32 to vector<2x32xf32>
      %c0_325 = arith.constant 0 : index
      %c0_326 = arith.constant 0 : index
      %920 = vector.load %arg13[%c0_325, %c0_326] : memref<2x32xf32, #tpu.memory_space<vmem>>, vector<2x32xf32>
      tpu.vector_store %arg13[%c0_325, %c0_326], %919 {strides = array<i32>} : memref<2x32xf32, #tpu.memory_space<vmem>>, vector<2x32xf32>,
      %cst_327 = arith.constant 0.000000e+00 : f32
      %921 = vector.broadcast %cst_327 : f32 to vector<2x32xf32>
      %c0_328 = arith.constant 0 : index
      %c0_329 = arith.constant 0 : index
      %922 = vector.load %arg14[%c0_328, %c0_329] : memref<2x32xf32, #tpu.memory_space<vmem>>, vector<2x32xf32>
      tpu.vector_store %arg14[%c0_328, %c0_329], %921 {strides = array<i32>} : memref<2x32xf32, #tpu.memory_space<vmem>>, vector<2x32xf32>,
      %cst_330 = arith.constant 0.000000e+00 : f32
      %923 = vector.broadcast %cst_330 : f32 to vector<2x32xf32>
      %c0_331 = arith.constant 0 : index
      %c0_332 = arith.constant 0 : index
      %924 = vector.load %arg15[%c0_331, %c0_332] : memref<2x32xf32, #tpu.memory_space<vmem>>, vector<2x32xf32>
      tpu.vector_store %arg15[%c0_331, %c0_332], %923 {strides = array<i32>} : memref<2x32xf32, #tpu.memory_space<vmem>>, vector<2x32xf32>,
    } else {
    }
    %c0 = arith.constant 0 : index
    %c0_1 = arith.constant 0 : index
    %3 = vector.load %arg1[%c0, %c0_1] : memref<2x1xi32, #tpu.memory_space<vmem>>, vector<2x1xi32>
    %c0_2 = arith.constant 0 : index
    %c0_3 = arith.constant 0 : index
    %4 = vector.load %arg4[%c0_2, %c0_3] : memref<16x128xbf16, #tpu.memory_space<vmem>>, vector<16x128xbf16>
    %c0_4 = arith.constant 0 : index
    %c0_5 = arith.constant 0 : index
    %5 = vector.load %arg5[%c0_4, %c0_5] : memref<32x128xbf16, #tpu.memory_space<vmem>>, vector<32x128xbf16>
    %c0_6 = arith.constant 0 : index
    %c0_7 = arith.constant 0 : index
    %6 = vector.load %arg6[%c0_6, %c0_7] : memref<1x128xf32, #tpu.memory_space<vmem>>, vector<1x128xf32>
    %c0_8 = arith.constant 0 : index
    %c0_9 = arith.constant 0 : index
    %7 = vector.load %arg7[%c0_8, %c0_9] : memref<16x128xbf16, #tpu.memory_space<vmem>>, vector<16x128xbf16>
    %c0_10 = arith.constant 0 : index
    %c0_11 = arith.constant 0 : index
    %8 = vector.load %arg8[%c0_10, %c0_11] : memref<32x128xbf16, #tpu.memory_space<vmem>>, vector<32x128xbf16>
    %c0_12 = arith.constant 0 : index
    %c0_13 = arith.constant 0 : index
    %9 = vector.load %arg9[%c0_12, %c0_13] : memref<1x128xf32, #tpu.memory_space<vmem>>, vector<1x128xf32>
    %c0_14 = arith.constant 0 : index
    %c0_15 = arith.constant 0 : index
    %10 = vector.load %arg12[%c0_14, %c0_15] : memref<2x32xf32, #tpu.memory_space<vmem>>, vector<2x32xf32>
    %c0_16 = arith.constant 0 : index
    %c0_17 = arith.constant 0 : index
    %11 = vector.load %arg13[%c0_16, %c0_17] : memref<2x32xf32, #tpu.memory_space<vmem>>, vector<2x32xf32>
    %c0_18 = arith.constant 0 : index
    %c0_19 = arith.constant 0 : index
    %12 = vector.load %arg14[%c0_18, %c0_19] : memref<2x32xf32, #tpu.memory_space<vmem>>, vector<2x32xf32>
    %c0_20 = arith.constant 0 : index
    %c0_21 = arith.constant 0 : index
    %13 = vector.load %arg15[%c0_20, %c0_21] : memref<2x32xf32, #tpu.memory_space<vmem>>, vector<2x32xf32>
    %c8_i32 = arith.constant 8 : i32
    %14 = arith.muli %arg0, %c8_i32 : i32
    %c0_i32_22 = arith.constant 0 : i32
    %15 = arith.subi %c0_i32_22, %arg0 : i32
    %c8_i32_23 = arith.constant 8 : i32
    %16 = arith.muli %15, %c8_i32_23 : i32
    %c0_24 = arith.constant 0 : index
    %c0_25 = arith.constant 0 : index
    %c0_26 = arith.constant 0 : index
    %17 = vector.load %arg2[%c0_24, %c0_25, %c0_26] : memref<8x2x16xf32, #tpu.memory_space<vmem>>, vector<1x2x16xf32>
    %18 = vector.shape_cast %17 : vector<1x2x16xf32> to vector<2x16xf32>
    %c0_i32_27 = arith.constant 0 : i32
    %19 = arith.addi %14, %c0_i32_27 : i32
    %20 = arith.truncf %18 : vector<2x16xf32> to vector<2x16xbf16>
    %cst = arith.constant dense<0.000000e+00> : vector<2x128xf32>
    %21 = tpu.matmul %20, %4, %cst {dimension_numbers = #tpu.dot_dimension_numbers<[1], [0], [0], [1], [0, 0, 1, 1], [], []>} : vector<2x16xbf16>, vector<16x128xbf16>, vector<2x128xf32> -> vector<2x128xf32>
    %22 = arith.truncf %10 : vector<2x32xf32> to vector<2x32xbf16>
    %cst_28 = arith.constant dense<0.000000e+00> : vector<2x128xf32>
    %23 = tpu.matmul %22, %5, %cst_28 {dimension_numbers = #tpu.dot_dimension_numbers<[1], [0], [0], [1], [0, 0, 1, 1], [], []>} : vector<2x32xbf16>, vector<32x128xbf16>, vector<2x128xf32> -> vector<2x128xf32>
    %24 = arith.addf %21, %23 : vector<2x128xf32>
    %25 = vector.broadcast %6 : vector<1x128xf32> to vector<2x128xf32>
    %26 = arith.addf %24, %25 : vector<2x128xf32>
    %27 = vector.extract_strided_slice %26 {offsets = [0, 0], sizes = [2, 32], strides = [1, 1]} : vector<2x128xf32> to vector<2x32xf32>
    %cst_29 = arith.constant 0.000000e+00 : f32
    %28 = vector.broadcast %cst_29 : f32 to vector<2x32xf32>
    %29 = arith.subf %28, %27 : vector<2x32xf32>
    %30 = math.exp %29 : vector<2x32xf32>
    %cst_30 = arith.constant 1.000000e+00 : f32
    %31 = vector.broadcast %cst_30 : f32 to vector<2x32xf32>
    %32 = arith.addf %31, %30 : vector<2x32xf32>
    %cst_31 = arith.constant 1.000000e+00 : f32
    %33 = vector.broadcast %cst_31 : f32 to vector<2x32xf32>
    %34 = arith.divf %33, %32 : vector<2x32xf32>
    %35 = vector.extract_strided_slice %26 {offsets = [0, 32], sizes = [2, 32], strides = [1, 1]} : vector<2x128xf32> to vector<2x32xf32>
    %cst_32 = arith.constant 0.000000e+00 : f32
    %36 = vector.broadcast %cst_32 : f32 to vector<2x32xf32>
    %37 = arith.subf %36, %35 : vector<2x32xf32>
    %38 = math.exp %37 : vector<2x32xf32>
    %cst_33 = arith.constant 1.000000e+00 : f32
    %39 = vector.broadcast %cst_33 : f32 to vector<2x32xf32>
    %40 = arith.addf %39, %38 : vector<2x32xf32>
    %cst_34 = arith.constant 1.000000e+00 : f32
    %41 = vector.broadcast %cst_34 : f32 to vector<2x32xf32>
    %42 = arith.divf %41, %40 : vector<2x32xf32>
    %43 = vector.extract_strided_slice %26 {offsets = [0, 64], sizes = [2, 32], strides = [1, 1]} : vector<2x128xf32> to vector<2x32xf32>
    %44 = math.tanh %43 : vector<2x32xf32>
    %45 = vector.extract_strided_slice %26 {offsets = [0, 96], sizes = [2, 32], strides = [1, 1]} : vector<2x128xf32> to vector<2x32xf32>
    %cst_35 = arith.constant 0.000000e+00 : f32
    %46 = vector.broadcast %cst_35 : f32 to vector<2x32xf32>
    %47 = arith.subf %46, %45 : vector<2x32xf32>
    %48 = math.exp %47 : vector<2x32xf32>
    %cst_36 = arith.constant 1.000000e+00 : f32
    %49 = vector.broadcast %cst_36 : f32 to vector<2x32xf32>
    %50 = arith.addf %49, %48 : vector<2x32xf32>
    %cst_37 = arith.constant 1.000000e+00 : f32
    %51 = vector.broadcast %cst_37 : f32 to vector<2x32xf32>
    %52 = arith.divf %51, %50 : vector<2x32xf32>
    %53 = arith.mulf %42, %11 : vector<2x32xf32>
    %54 = arith.mulf %34, %44 : vector<2x32xf32>
    %55 = arith.addf %53, %54 : vector<2x32xf32>
    %56 = math.tanh %55 : vector<2x32xf32>
    %57 = arith.mulf %52, %56 : vector<2x32xf32>
    %58 = vector.broadcast %19 : i32 to vector<2x1xi32>
    %59 = arith.cmpi slt, %58, %3 : vector<2x1xi32>
    %60 = vector.shape_cast %59 : vector<2x1xi1> to vector<2x1xi1>
    %61 = vector.broadcast %60 : vector<2x1xi1> to vector<2x32xi1>
    %62 = arith.select %61, %57, %10 : vector<2x32xi1>, vector<2x32xf32>
    %63 = vector.shape_cast %59 : vector<2x1xi1> to vector<2x1xi1>
    %64 = vector.broadcast %63 : vector<2x1xi1> to vector<2x32xi1>
    %65 = arith.select %64, %55, %11 : vector<2x32xi1>, vector<2x32xf32>
    %cst_38 = arith.constant 0.000000e+00 : f32
    %66 = vector.shape_cast %59 : vector<2x1xi1> to vector<2x1xi1>
    %67 = vector.broadcast %66 : vector<2x1xi1> to vector<2x32xi1>
    %68 = vector.broadcast %cst_38 : f32 to vector<2x32xf32>
    %69 = arith.select %67, %57, %68 : vector<2x32xi1>, vector<2x32xf32>
    %c0_39 = arith.constant 0 : index
    %c0_40 = arith.constant 0 : index
    %c0_41 = arith.constant 0 : index
    %70 = vector.load %arg10[%c0_39, %c0_40, %c0_41] : memref<8x2x32xf32, #tpu.memory_space<vmem>>, vector<1x2x32xf32>
    %71 = vector.shape_cast %70 : vector<1x2x32xf32> to vector<2x32xf32>
    %72 = vector.shape_cast %69 : vector<2x32xf32> to vector<1x2x32xf32>
    tpu.vector_store %arg10[%c0_39, %c0_40, %c0_41], %72 {strides = array<i32>} : memref<8x2x32xf32, #tpu.memory_space<vmem>>, vector<1x2x32xf32>,
    %c7 = arith.constant 7 : index
    %c0_42 = arith.constant 0 : index
    %c0_43 = arith.constant 0 : index
    %73 = vector.load %arg3[%c7, %c0_42, %c0_43] : memref<8x2x16xf32, #tpu.memory_space<vmem>>, vector<1x2x16xf32>
    %74 = vector.shape_cast %73 : vector<1x2x16xf32> to vector<2x16xf32>
    %c7_i32 = arith.constant 7 : i32
    %75 = arith.addi %16, %c7_i32 : i32
    %76 = arith.truncf %74 : vector<2x16xf32> to vector<2x16xbf16>
    %cst_44 = arith.constant dense<0.000000e+00> : vector<2x128xf32>
    %77 = tpu.matmul %76, %7, %cst_44 {dimension_numbers = #tpu.dot_dimension_numbers<[1], [0], [0], [1], [0, 0, 1, 1], [], []>} : vector<2x16xbf16>, vector<16x128xbf16>, vector<2x128xf32> -> vector<2x128xf32>
    %78 = arith.truncf %12 : vector<2x32xf32> to vector<2x32xbf16>
    %cst_45 = arith.constant dense<0.000000e+00> : vector<2x128xf32>
    %79 = tpu.matmul %78, %8, %cst_45 {dimension_numbers = #tpu.dot_dimension_numbers<[1], [0], [0], [1], [0, 0, 1, 1], [], []>} : vector<2x32xbf16>, vector<32x128xbf16>, vector<2x128xf32> -> vector<2x128xf32>
    %80 = arith.addf %77, %79 : vector<2x128xf32>
    %81 = vector.broadcast %9 : vector<1x128xf32> to vector<2x128xf32>
    %82 = arith.addf %80, %81 : vector<2x128xf32>
    %83 = vector.extract_strided_slice %82 {offsets = [0, 0], sizes = [2, 32], strides = [1, 1]} : vector<2x128xf32> to vector<2x32xf32>
    %cst_46 = arith.constant 0.000000e+00 : f32
    %84 = vector.broadcast %cst_46 : f32 to vector<2x32xf32>
    %85 = arith.subf %84, %83 : vector<2x32xf32>
    %86 = math.exp %85 : vector<2x32xf32>
    %cst_47 = arith.constant 1.000000e+00 : f32
    %87 = vector.broadcast %cst_47 : f32 to vector<2x32xf32>
    %88 = arith.addf %87, %86 : vector<2x32xf32>
    %cst_48 = arith.constant 1.000000e+00 : f32
    %89 = vector.broadcast %cst_48 : f32 to vector<2x32xf32>
    %90 = arith.divf %89, %88 : vector<2x32xf32>
    %91 = vector.extract_strided_slice %82 {offsets = [0, 32], sizes = [2, 32], strides = [1, 1]} : vector<2x128xf32> to vector<2x32xf32>
    %cst_49 = arith.constant 0.000000e+00 : f32
    %92 = vector.broadcast %cst_49 : f32 to vector<2x32xf32>
    %93 = arith.subf %92, %91 : vector<2x32xf32>
    %94 = math.exp %93 : vector<2x32xf32>
    %cst_50 = arith.constant 1.000000e+00 : f32
    %95 = vector.broadcast %cst_50 : f32 to vector<2x32xf32>
    %96 = arith.addf %95, %94 : vector<2x32xf32>
    %cst_51 = arith.constant 1.000000e+00 : f32
    %97 = vector.broadcast %cst_51 : f32 to vector<2x32xf32>
    %98 = arith.divf %97, %96 : vector<2x32xf32>
    %99 = vector.extract_strided_slice %82 {offsets = [0, 64], sizes = [2, 32], strides = [1, 1]} : vector<2x128xf32> to vector<2x32xf32>
    %100 = math.tanh %99 : vector<2x32xf32>
    %101 = vector.extract_strided_slice %82 {offsets = [0, 96], sizes = [2, 32], strides = [1, 1]} : vector<2x128xf32> to vector<2x32xf32>
    %cst_52 = arith.constant 0.000000e+00 : f32
    %102 = vector.broadcast %cst_52 : f32 to vector<2x32xf32>
    %103 = arith.subf %102, %101 : vector<2x32xf32>
    %104 = math.exp %103 : vector<2x32xf32>
    %cst_53 = arith.constant 1.000000e+00 : f32
    %105 = vector.broadcast %cst_53 : f32 to vector<2x32xf32>
    %106 = arith.addf %105, %104 : vector<2x32xf32>
    %cst_54 = arith.constant 1.000000e+00 : f32
    %107 = vector.broadcast %cst_54 : f32 to vector<2x32xf32>
    %108 = arith.divf %107, %106 : vector<2x32xf32>
    %109 = arith.mulf %98, %13 : vector<2x32xf32>
    %110 = arith.mulf %90, %100 : vector<2x32xf32>
    %111 = arith.addf %109, %110 : vector<2x32xf32>
    %112 = math.tanh %111 : vector<2x32xf32>
    %113 = arith.mulf %108, %112 : vector<2x32xf32>
    %114 = vector.broadcast %75 : i32 to vector<2x1xi32>
    %115 = arith.cmpi slt, %114, %3 : vector<2x1xi32>
    %116 = vector.shape_cast %115 : vector<2x1xi1> to vector<2x1xi1>
    %117 = vector.broadcast %116 : vector<2x1xi1> to vector<2x32xi1>
    %118 = arith.select %117, %113, %12 : vector<2x32xi1>, vector<2x32xf32>
    %119 = vector.shape_cast %115 : vector<2x1xi1> to vector<2x1xi1>
    %120 = vector.broadcast %119 : vector<2x1xi1> to vector<2x32xi1>
    %121 = arith.select %120, %111, %13 : vector<2x32xi1>, vector<2x32xf32>
    %cst_55 = arith.constant 0.000000e+00 : f32
    %122 = vector.shape_cast %115 : vector<2x1xi1> to vector<2x1xi1>
    %123 = vector.broadcast %122 : vector<2x1xi1> to vector<2x32xi1>
    %124 = vector.broadcast %cst_55 : f32 to vector<2x32xf32>
    %125 = arith.select %123, %113, %124 : vector<2x32xi1>, vector<2x32xf32>
    %c7_56 = arith.constant 7 : index
    %c0_57 = arith.constant 0 : index
    %c0_58 = arith.constant 0 : index
    %126 = vector.load %arg11[%c7_56, %c0_57, %c0_58] : memref<8x2x32xf32, #tpu.memory_space<vmem>>, vector<1x2x32xf32>
    %127 = vector.shape_cast %126 : vector<1x2x32xf32> to vector<2x32xf32>
    %128 = vector.shape_cast %125 : vector<2x32xf32> to vector<1x2x32xf32>
    tpu.vector_store %arg11[%c7_56, %c0_57, %c0_58], %128 {strides = array<i32>} : memref<8x2x32xf32, #tpu.memory_space<vmem>>, vector<1x2x32xf32>,
    %c1 = arith.constant 1 : index
    %c0_59 = arith.constant 0 : index
    %c0_60 = arith.constant 0 : index
    %129 = vector.load %arg2[%c1, %c0_59, %c0_60] : memref<8x2x16xf32, #tpu.memory_space<vmem>>, vector<1x2x16xf32>
    %130 = vector.shape_cast %129 : vector<1x2x16xf32> to vector<2x16xf32>
    %c1_i32 = arith.constant 1 : i32
    %131 = arith.addi %14, %c1_i32 : i32
    %132 = arith.truncf %130 : vector<2x16xf32> to vector<2x16xbf16>
    %cst_61 = arith.constant dense<0.000000e+00> : vector<2x128xf32>
    %133 = tpu.matmul %132, %4, %cst_61 {dimension_numbers = #tpu.dot_dimension_numbers<[1], [0], [0], [1], [0, 0, 1, 1], [], []>} : vector<2x16xbf16>, vector<16x128xbf16>, vector<2x128xf32> -> vector<2x128xf32>
    %134 = arith.truncf %62 : vector<2x32xf32> to vector<2x32xbf16>
    %cst_62 = arith.constant dense<0.000000e+00> : vector<2x128xf32>
    %135 = tpu.matmul %134, %5, %cst_62 {dimension_numbers = #tpu.dot_dimension_numbers<[1], [0], [0], [1], [0, 0, 1, 1], [], []>} : vector<2x32xbf16>, vector<32x128xbf16>, vector<2x128xf32> -> vector<2x128xf32>
    %136 = arith.addf %133, %135 : vector<2x128xf32>
    %137 = vector.broadcast %6 : vector<1x128xf32> to vector<2x128xf32>
    %138 = arith.addf %136, %137 : vector<2x128xf32>
    %139 = vector.extract_strided_slice %138 {offsets = [0, 0], sizes = [2, 32], strides = [1, 1]} : vector<2x128xf32> to vector<2x32xf32>
    %cst_63 = arith.constant 0.000000e+00 : f32
    %140 = vector.broadcast %cst_63 : f32 to vector<2x32xf32>
    %141 = arith.subf %140, %139 : vector<2x32xf32>
    %142 = math.exp %141 : vector<2x32xf32>
    %cst_64 = arith.constant 1.000000e+00 : f32
    %143 = vector.broadcast %cst_64 : f32 to vector<2x32xf32>
    %144 = arith.addf %143, %142 : vector<2x32xf32>
    %cst_65 = arith.constant 1.000000e+00 : f32
    %145 = vector.broadcast %cst_65 : f32 to vector<2x32xf32>
    %146 = arith.divf %145, %144 : vector<2x32xf32>
    %147 = vector.extract_strided_slice %138 {offsets = [0, 32], sizes = [2, 32], strides = [1, 1]} : vector<2x128xf32> to vector<2x32xf32>
    %cst_66 = arith.constant 0.000000e+00 : f32
    %148 = vector.broadcast %cst_66 : f32 to vector<2x32xf32>
    %149 = arith.subf %148, %147 : vector<2x32xf32>
    %150 = math.exp %149 : vector<2x32xf32>
    %cst_67 = arith.constant 1.000000e+00 : f32
    %151 = vector.broadcast %cst_67 : f32 to vector<2x32xf32>
    %152 = arith.addf %151, %150 : vector<2x32xf32>
    %cst_68 = arith.constant 1.000000e+00 : f32
    %153 = vector.broadcast %cst_68 : f32 to vector<2x32xf32>
    %154 = arith.divf %153, %152 : vector<2x32xf32>
    %155 = vector.extract_strided_slice %138 {offsets = [0, 64], sizes = [2, 32], strides = [1, 1]} : vector<2x128xf32> to vector<2x32xf32>
    %156 = math.tanh %155 : vector<2x32xf32>
    %157 = vector.extract_strided_slice %138 {offsets = [0, 96], sizes = [2, 32], strides = [1, 1]} : vector<2x128xf32> to vector<2x32xf32>
    %cst_69 = arith.constant 0.000000e+00 : f32
    %158 = vector.broadcast %cst_69 : f32 to vector<2x32xf32>
    %159 = arith.subf %158, %157 : vector<2x32xf32>
    %160 = math.exp %159 : vector<2x32xf32>
    %cst_70 = arith.constant 1.000000e+00 : f32
    %161 = vector.broadcast %cst_70 : f32 to vector<2x32xf32>
    %162 = arith.addf %161, %160 : vector<2x32xf32>
    %cst_71 = arith.constant 1.000000e+00 : f32
    %163 = vector.broadcast %cst_71 : f32 to vector<2x32xf32>
    %164 = arith.divf %163, %162 : vector<2x32xf32>
    %165 = arith.mulf %154, %65 : vector<2x32xf32>
    %166 = arith.mulf %146, %156 : vector<2x32xf32>
    %167 = arith.addf %165, %166 : vector<2x32xf32>
    %168 = math.tanh %167 : vector<2x32xf32>
    %169 = arith.mulf %164, %168 : vector<2x32xf32>
    %170 = vector.broadcast %131 : i32 to vector<2x1xi32>
    %171 = arith.cmpi slt, %170, %3 : vector<2x1xi32>
    %172 = vector.shape_cast %171 : vector<2x1xi1> to vector<2x1xi1>
    %173 = vector.broadcast %172 : vector<2x1xi1> to vector<2x32xi1>
    %174 = arith.select %173, %169, %62 : vector<2x32xi1>, vector<2x32xf32>
    %175 = vector.shape_cast %171 : vector<2x1xi1> to vector<2x1xi1>
    %176 = vector.broadcast %175 : vector<2x1xi1> to vector<2x32xi1>
    %177 = arith.select %176, %167, %65 : vector<2x32xi1>, vector<2x32xf32>
    %cst_72 = arith.constant 0.000000e+00 : f32
    %178 = vector.shape_cast %171 : vector<2x1xi1> to vector<2x1xi1>
    %179 = vector.broadcast %178 : vector<2x1xi1> to vector<2x32xi1>
    %180 = vector.broadcast %cst_72 : f32 to vector<2x32xf32>
    %181 = arith.select %179, %169, %180 : vector<2x32xi1>, vector<2x32xf32>
    %c1_73 = arith.constant 1 : index
    %c0_74 = arith.constant 0 : index
    %c0_75 = arith.constant 0 : index
    %182 = vector.load %arg10[%c1_73, %c0_74, %c0_75] : memref<8x2x32xf32, #tpu.memory_space<vmem>>, vector<1x2x32xf32>
    %183 = vector.shape_cast %182 : vector<1x2x32xf32> to vector<2x32xf32>
    %184 = vector.shape_cast %181 : vector<2x32xf32> to vector<1x2x32xf32>
    tpu.vector_store %arg10[%c1_73, %c0_74, %c0_75], %184 {strides = array<i32>} : memref<8x2x32xf32, #tpu.memory_space<vmem>>, vector<1x2x32xf32>,
    %c6 = arith.constant 6 : index
    %c0_76 = arith.constant 0 : index
    %c0_77 = arith.constant 0 : index
    %185 = vector.load %arg3[%c6, %c0_76, %c0_77] : memref<8x2x16xf32, #tpu.memory_space<vmem>>, vector<1x2x16xf32>
    %186 = vector.shape_cast %185 : vector<1x2x16xf32> to vector<2x16xf32>
    %c6_i32 = arith.constant 6 : i32
    %187 = arith.addi %16, %c6_i32 : i32
    %188 = arith.truncf %186 : vector<2x16xf32> to vector<2x16xbf16>
    %cst_78 = arith.constant dense<0.000000e+00> : vector<2x128xf32>
    %189 = tpu.matmul %188, %7, %cst_78 {dimension_numbers = #tpu.dot_dimension_numbers<[1], [0], [0], [1], [0, 0, 1, 1], [], []>} : vector<2x16xbf16>, vector<16x128xbf16>, vector<2x128xf32> -> vector<2x128xf32>
    %190 = arith.truncf %118 : vector<2x32xf32> to vector<2x32xbf16>
    %cst_79 = arith.constant dense<0.000000e+00> : vector<2x128xf32>
    %191 = tpu.matmul %190, %8, %cst_79 {dimension_numbers = #tpu.dot_dimension_numbers<[1], [0], [0], [1], [0, 0, 1, 1], [], []>} : vector<2x32xbf16>, vector<32x128xbf16>, vector<2x128xf32> -> vector<2x128xf32>
    %192 = arith.addf %189, %191 : vector<2x128xf32>
    %193 = vector.broadcast %9 : vector<1x128xf32> to vector<2x128xf32>
    %194 = arith.addf %192, %193 : vector<2x128xf32>
    %195 = vector.extract_strided_slice %194 {offsets = [0, 0], sizes = [2, 32], strides = [1, 1]} : vector<2x128xf32> to vector<2x32xf32>
    %cst_80 = arith.constant 0.000000e+00 : f32
    %196 = vector.broadcast %cst_80 : f32 to vector<2x32xf32>
    %197 = arith.subf %196, %195 : vector<2x32xf32>
    %198 = math.exp %197 : vector<2x32xf32>
    %cst_81 = arith.constant 1.000000e+00 : f32
    %199 = vector.broadcast %cst_81 : f32 to vector<2x32xf32>
    %200 = arith.addf %199, %198 : vector<2x32xf32>
    %cst_82 = arith.constant 1.000000e+00 : f32
    %201 = vector.broadcast %cst_82 : f32 to vector<2x32xf32>
    %202 = arith.divf %201, %200 : vector<2x32xf32>
    %203 = vector.extract_strided_slice %194 {offsets = [0, 32], sizes = [2, 32], strides = [1, 1]} : vector<2x128xf32> to vector<2x32xf32>
    %cst_83 = arith.constant 0.000000e+00 : f32
    %204 = vector.broadcast %cst_83 : f32 to vector<2x32xf32>
    %205 = arith.subf %204, %203 : vector<2x32xf32>
    %206 = math.exp %205 : vector<2x32xf32>
    %cst_84 = arith.constant 1.000000e+00 : f32
    %207 = vector.broadcast %cst_84 : f32 to vector<2x32xf32>
    %208 = arith.addf %207, %206 : vector<2x32xf32>
    %cst_85 = arith.constant 1.000000e+00 : f32
    %209 = vector.broadcast %cst_85 : f32 to vector<2x32xf32>
    %210 = arith.divf %209, %208 : vector<2x32xf32>
    %211 = vector.extract_strided_slice %194 {offsets = [0, 64], sizes = [2, 32], strides = [1, 1]} : vector<2x128xf32> to vector<2x32xf32>
    %212 = math.tanh %211 : vector<2x32xf32>
    %213 = vector.extract_strided_slice %194 {offsets = [0, 96], sizes = [2, 32], strides = [1, 1]} : vector<2x128xf32> to vector<2x32xf32>
    %cst_86 = arith.constant 0.000000e+00 : f32
    %214 = vector.broadcast %cst_86 : f32 to vector<2x32xf32>
    %215 = arith.subf %214, %213 : vector<2x32xf32>
    %216 = math.exp %215 : vector<2x32xf32>
    %cst_87 = arith.constant 1.000000e+00 : f32
    %217 = vector.broadcast %cst_87 : f32 to vector<2x32xf32>
    %218 = arith.addf %217, %216 : vector<2x32xf32>
    %cst_88 = arith.constant 1.000000e+00 : f32
    %219 = vector.broadcast %cst_88 : f32 to vector<2x32xf32>
    %220 = arith.divf %219, %218 : vector<2x32xf32>
    %221 = arith.mulf %210, %121 : vector<2x32xf32>
    %222 = arith.mulf %202, %212 : vector<2x32xf32>
    %223 = arith.addf %221, %222 : vector<2x32xf32>
    %224 = math.tanh %223 : vector<2x32xf32>
    %225 = arith.mulf %220, %224 : vector<2x32xf32>
    %226 = vector.broadcast %187 : i32 to vector<2x1xi32>
    %227 = arith.cmpi slt, %226, %3 : vector<2x1xi32>
    %228 = vector.shape_cast %227 : vector<2x1xi1> to vector<2x1xi1>
    %229 = vector.broadcast %228 : vector<2x1xi1> to vector<2x32xi1>
    %230 = arith.select %229, %225, %118 : vector<2x32xi1>, vector<2x32xf32>
    %231 = vector.shape_cast %227 : vector<2x1xi1> to vector<2x1xi1>
    %232 = vector.broadcast %231 : vector<2x1xi1> to vector<2x32xi1>
    %233 = arith.select %232, %223, %121 : vector<2x32xi1>, vector<2x32xf32>
    %cst_89 = arith.constant 0.000000e+00 : f32
    %234 = vector.shape_cast %227 : vector<2x1xi1> to vector<2x1xi1>
    %235 = vector.broadcast %234 : vector<2x1xi1> to vector<2x32xi1>
    %236 = vector.broadcast %cst_89 : f32 to vector<2x32xf32>
    %237 = arith.select %235, %225, %236 : vector<2x32xi1>, vector<2x32xf32>
    %c6_90 = arith.constant 6 : index
    %c0_91 = arith.constant 0 : index
    %c0_92 = arith.constant 0 : index
    %238 = vector.load %arg11[%c6_90, %c0_91, %c0_92] : memref<8x2x32xf32, #tpu.memory_space<vmem>>, vector<1x2x32xf32>
    %239 = vector.shape_cast %238 : vector<1x2x32xf32> to vector<2x32xf32>
    %240 = vector.shape_cast %237 : vector<2x32xf32> to vector<1x2x32xf32>
    tpu.vector_store %arg11[%c6_90, %c0_91, %c0_92], %240 {strides = array<i32>} : memref<8x2x32xf32, #tpu.memory_space<vmem>>, vector<1x2x32xf32>,
    %c2 = arith.constant 2 : index
    %c0_93 = arith.constant 0 : index
    %c0_94 = arith.constant 0 : index
    %241 = vector.load %arg2[%c2, %c0_93, %c0_94] : memref<8x2x16xf32, #tpu.memory_space<vmem>>, vector<1x2x16xf32>
    %242 = vector.shape_cast %241 : vector<1x2x16xf32> to vector<2x16xf32>
    %c2_i32 = arith.constant 2 : i32
    %243 = arith.addi %14, %c2_i32 : i32
    %244 = arith.truncf %242 : vector<2x16xf32> to vector<2x16xbf16>
    %cst_95 = arith.constant dense<0.000000e+00> : vector<2x128xf32>
    %245 = tpu.matmul %244, %4, %cst_95 {dimension_numbers = #tpu.dot_dimension_numbers<[1], [0], [0], [1], [0, 0, 1, 1], [], []>} : vector<2x16xbf16>, vector<16x128xbf16>, vector<2x128xf32> -> vector<2x128xf32>
    %246 = arith.truncf %174 : vector<2x32xf32> to vector<2x32xbf16>
    %cst_96 = arith.constant dense<0.000000e+00> : vector<2x128xf32>
    %247 = tpu.matmul %246, %5, %cst_96 {dimension_numbers = #tpu.dot_dimension_numbers<[1], [0], [0], [1], [0, 0, 1, 1], [], []>} : vector<2x32xbf16>, vector<32x128xbf16>, vector<2x128xf32> -> vector<2x128xf32>
    %248 = arith.addf %245, %247 : vector<2x128xf32>
    %249 = vector.broadcast %6 : vector<1x128xf32> to vector<2x128xf32>
    %250 = arith.addf %248, %249 : vector<2x128xf32>
    %251 = vector.extract_strided_slice %250 {offsets = [0, 0], sizes = [2, 32], strides = [1, 1]} : vector<2x128xf32> to vector<2x32xf32>
    %cst_97 = arith.constant 0.000000e+00 : f32
    %252 = vector.broadcast %cst_97 : f32 to vector<2x32xf32>
    %253 = arith.subf %252, %251 : vector<2x32xf32>
    %254 = math.exp %253 : vector<2x32xf32>
    %cst_98 = arith.constant 1.000000e+00 : f32
    %255 = vector.broadcast %cst_98 : f32 to vector<2x32xf32>
    %256 = arith.addf %255, %254 : vector<2x32xf32>
    %cst_99 = arith.constant 1.000000e+00 : f32
    %257 = vector.broadcast %cst_99 : f32 to vector<2x32xf32>
    %258 = arith.divf %257, %256 : vector<2x32xf32>
    %259 = vector.extract_strided_slice %250 {offsets = [0, 32], sizes = [2, 32], strides = [1, 1]} : vector<2x128xf32> to vector<2x32xf32>
    %cst_100 = arith.constant 0.000000e+00 : f32
    %260 = vector.broadcast %cst_100 : f32 to vector<2x32xf32>
    %261 = arith.subf %260, %259 : vector<2x32xf32>
    %262 = math.exp %261 : vector<2x32xf32>
    %cst_101 = arith.constant 1.000000e+00 : f32
    %263 = vector.broadcast %cst_101 : f32 to vector<2x32xf32>
    %264 = arith.addf %263, %262 : vector<2x32xf32>
    %cst_102 = arith.constant 1.000000e+00 : f32
    %265 = vector.broadcast %cst_102 : f32 to vector<2x32xf32>
    %266 = arith.divf %265, %264 : vector<2x32xf32>
    %267 = vector.extract_strided_slice %250 {offsets = [0, 64], sizes = [2, 32], strides = [1, 1]} : vector<2x128xf32> to vector<2x32xf32>
    %268 = math.tanh %267 : vector<2x32xf32>
    %269 = vector.extract_strided_slice %250 {offsets = [0, 96], sizes = [2, 32], strides = [1, 1]} : vector<2x128xf32> to vector<2x32xf32>
    %cst_103 = arith.constant 0.000000e+00 : f32
    %270 = vector.broadcast %cst_103 : f32 to vector<2x32xf32>
    %271 = arith.subf %270, %269 : vector<2x32xf32>
    %272 = math.exp %271 : vector<2x32xf32>
    %cst_104 = arith.constant 1.000000e+00 : f32
    %273 = vector.broadcast %cst_104 : f32 to vector<2x32xf32>
    %274 = arith.addf %273, %272 : vector<2x32xf32>
    %cst_105 = arith.constant 1.000000e+00 : f32
    %275 = vector.broadcast %cst_105 : f32 to vector<2x32xf32>
    %276 = arith.divf %275, %274 : vector<2x32xf32>
    %277 = arith.mulf %266, %177 : vector<2x32xf32>
    %278 = arith.mulf %258, %268 : vector<2x32xf32>
    %279 = arith.addf %277, %278 : vector<2x32xf32>
    %280 = math.tanh %279 : vector<2x32xf32>
    %281 = arith.mulf %276, %280 : vector<2x32xf32>
    %282 = vector.broadcast %243 : i32 to vector<2x1xi32>
    %283 = arith.cmpi slt, %282, %3 : vector<2x1xi32>
    %284 = vector.shape_cast %283 : vector<2x1xi1> to vector<2x1xi1>
    %285 = vector.broadcast %284 : vector<2x1xi1> to vector<2x32xi1>
    %286 = arith.select %285, %281, %174 : vector<2x32xi1>, vector<2x32xf32>
    %287 = vector.shape_cast %283 : vector<2x1xi1> to vector<2x1xi1>
    %288 = vector.broadcast %287 : vector<2x1xi1> to vector<2x32xi1>
    %289 = arith.select %288, %279, %177 : vector<2x32xi1>, vector<2x32xf32>
    %cst_106 = arith.constant 0.000000e+00 : f32
    %290 = vector.shape_cast %283 : vector<2x1xi1> to vector<2x1xi1>
    %291 = vector.broadcast %290 : vector<2x1xi1> to vector<2x32xi1>
    %292 = vector.broadcast %cst_106 : f32 to vector<2x32xf32>
    %293 = arith.select %291, %281, %292 : vector<2x32xi1>, vector<2x32xf32>
    %c2_107 = arith.constant 2 : index
    %c0_108 = arith.constant 0 : index
    %c0_109 = arith.constant 0 : index
    %294 = vector.load %arg10[%c2_107, %c0_108, %c0_109] : memref<8x2x32xf32, #tpu.memory_space<vmem>>, vector<1x2x32xf32>
    %295 = vector.shape_cast %294 : vector<1x2x32xf32> to vector<2x32xf32>
    %296 = vector.shape_cast %293 : vector<2x32xf32> to vector<1x2x32xf32>
    tpu.vector_store %arg10[%c2_107, %c0_108, %c0_109], %296 {strides = array<i32>} : memref<8x2x32xf32, #tpu.memory_space<vmem>>, vector<1x2x32xf32>,
    %c5 = arith.constant 5 : index
    %c0_110 = arith.constant 0 : index
    %c0_111 = arith.constant 0 : index
    %297 = vector.load %arg3[%c5, %c0_110, %c0_111] : memref<8x2x16xf32, #tpu.memory_space<vmem>>, vector<1x2x16xf32>
    %298 = vector.shape_cast %297 : vector<1x2x16xf32> to vector<2x16xf32>
    %c5_i32 = arith.constant 5 : i32
    %299 = arith.addi %16, %c5_i32 : i32
    %300 = arith.truncf %298 : vector<2x16xf32> to vector<2x16xbf16>
    %cst_112 = arith.constant dense<0.000000e+00> : vector<2x128xf32>
    %301 = tpu.matmul %300, %7, %cst_112 {dimension_numbers = #tpu.dot_dimension_numbers<[1], [0], [0], [1], [0, 0, 1, 1], [], []>} : vector<2x16xbf16>, vector<16x128xbf16>, vector<2x128xf32> -> vector<2x128xf32>
    %302 = arith.truncf %230 : vector<2x32xf32> to vector<2x32xbf16>
    %cst_113 = arith.constant dense<0.000000e+00> : vector<2x128xf32>
    %303 = tpu.matmul %302, %8, %cst_113 {dimension_numbers = #tpu.dot_dimension_numbers<[1], [0], [0], [1], [0, 0, 1, 1], [], []>} : vector<2x32xbf16>, vector<32x128xbf16>, vector<2x128xf32> -> vector<2x128xf32>
    %304 = arith.addf %301, %303 : vector<2x128xf32>
    %305 = vector.broadcast %9 : vector<1x128xf32> to vector<2x128xf32>
    %306 = arith.addf %304, %305 : vector<2x128xf32>
    %307 = vector.extract_strided_slice %306 {offsets = [0, 0], sizes = [2, 32], strides = [1, 1]} : vector<2x128xf32> to vector<2x32xf32>
    %cst_114 = arith.constant 0.000000e+00 : f32
    %308 = vector.broadcast %cst_114 : f32 to vector<2x32xf32>
    %309 = arith.subf %308, %307 : vector<2x32xf32>
    %310 = math.exp %309 : vector<2x32xf32>
    %cst_115 = arith.constant 1.000000e+00 : f32
    %311 = vector.broadcast %cst_115 : f32 to vector<2x32xf32>
    %312 = arith.addf %311, %310 : vector<2x32xf32>
    %cst_116 = arith.constant 1.000000e+00 : f32
    %313 = vector.broadcast %cst_116 : f32 to vector<2x32xf32>
    %314 = arith.divf %313, %312 : vector<2x32xf32>
    %315 = vector.extract_strided_slice %306 {offsets = [0, 32], sizes = [2, 32], strides = [1, 1]} : vector<2x128xf32> to vector<2x32xf32>
    %cst_117 = arith.constant 0.000000e+00 : f32
    %316 = vector.broadcast %cst_117 : f32 to vector<2x32xf32>
    %317 = arith.subf %316, %315 : vector<2x32xf32>
    %318 = math.exp %317 : vector<2x32xf32>
    %cst_118 = arith.constant 1.000000e+00 : f32
    %319 = vector.broadcast %cst_118 : f32 to vector<2x32xf32>
    %320 = arith.addf %319, %318 : vector<2x32xf32>
    %cst_119 = arith.constant 1.000000e+00 : f32
    %321 = vector.broadcast %cst_119 : f32 to vector<2x32xf32>
    %322 = arith.divf %321, %320 : vector<2x32xf32>
    %323 = vector.extract_strided_slice %306 {offsets = [0, 64], sizes = [2, 32], strides = [1, 1]} : vector<2x128xf32> to vector<2x32xf32>
    %324 = math.tanh %323 : vector<2x32xf32>
    %325 = vector.extract_strided_slice %306 {offsets = [0, 96], sizes = [2, 32], strides = [1, 1]} : vector<2x128xf32> to vector<2x32xf32>
    %cst_120 = arith.constant 0.000000e+00 : f32
    %326 = vector.broadcast %cst_120 : f32 to vector<2x32xf32>
    %327 = arith.subf %326, %325 : vector<2x32xf32>
    %328 = math.exp %327 : vector<2x32xf32>
    %cst_121 = arith.constant 1.000000e+00 : f32
    %329 = vector.broadcast %cst_121 : f32 to vector<2x32xf32>
    %330 = arith.addf %329, %328 : vector<2x32xf32>
    %cst_122 = arith.constant 1.000000e+00 : f32
    %331 = vector.broadcast %cst_122 : f32 to vector<2x32xf32>
    %332 = arith.divf %331, %330 : vector<2x32xf32>
    %333 = arith.mulf %322, %233 : vector<2x32xf32>
    %334 = arith.mulf %314, %324 : vector<2x32xf32>
    %335 = arith.addf %333, %334 : vector<2x32xf32>
    %336 = math.tanh %335 : vector<2x32xf32>
    %337 = arith.mulf %332, %336 : vector<2x32xf32>
    %338 = vector.broadcast %299 : i32 to vector<2x1xi32>
    %339 = arith.cmpi slt, %338, %3 : vector<2x1xi32>
    %340 = vector.shape_cast %339 : vector<2x1xi1> to vector<2x1xi1>
    %341 = vector.broadcast %340 : vector<2x1xi1> to vector<2x32xi1>
    %342 = arith.select %341, %337, %230 : vector<2x32xi1>, vector<2x32xf32>
    %343 = vector.shape_cast %339 : vector<2x1xi1> to vector<2x1xi1>
    %344 = vector.broadcast %343 : vector<2x1xi1> to vector<2x32xi1>
    %345 = arith.select %344, %335, %233 : vector<2x32xi1>, vector<2x32xf32>
    %cst_123 = arith.constant 0.000000e+00 : f32
    %346 = vector.shape_cast %339 : vector<2x1xi1> to vector<2x1xi1>
    %347 = vector.broadcast %346 : vector<2x1xi1> to vector<2x32xi1>
    %348 = vector.broadcast %cst_123 : f32 to vector<2x32xf32>
    %349 = arith.select %347, %337, %348 : vector<2x32xi1>, vector<2x32xf32>
    %c5_124 = arith.constant 5 : index
    %c0_125 = arith.constant 0 : index
    %c0_126 = arith.constant 0 : index
    %350 = vector.load %arg11[%c5_124, %c0_125, %c0_126] : memref<8x2x32xf32, #tpu.memory_space<vmem>>, vector<1x2x32xf32>
    %351 = vector.shape_cast %350 : vector<1x2x32xf32> to vector<2x32xf32>
    %352 = vector.shape_cast %349 : vector<2x32xf32> to vector<1x2x32xf32>
    tpu.vector_store %arg11[%c5_124, %c0_125, %c0_126], %352 {strides = array<i32>} : memref<8x2x32xf32, #tpu.memory_space<vmem>>, vector<1x2x32xf32>,
    %c3 = arith.constant 3 : index
    %c0_127 = arith.constant 0 : index
    %c0_128 = arith.constant 0 : index
    %353 = vector.load %arg2[%c3, %c0_127, %c0_128] : memref<8x2x16xf32, #tpu.memory_space<vmem>>, vector<1x2x16xf32>
    %354 = vector.shape_cast %353 : vector<1x2x16xf32> to vector<2x16xf32>
    %c3_i32 = arith.constant 3 : i32
    %355 = arith.addi %14, %c3_i32 : i32
    %356 = arith.truncf %354 : vector<2x16xf32> to vector<2x16xbf16>
    %cst_129 = arith.constant dense<0.000000e+00> : vector<2x128xf32>
    %357 = tpu.matmul %356, %4, %cst_129 {dimension_numbers = #tpu.dot_dimension_numbers<[1], [0], [0], [1], [0, 0, 1, 1], [], []>} : vector<2x16xbf16>, vector<16x128xbf16>, vector<2x128xf32> -> vector<2x128xf32>
    %358 = arith.truncf %286 : vector<2x32xf32> to vector<2x32xbf16>
    %cst_130 = arith.constant dense<0.000000e+00> : vector<2x128xf32>
    %359 = tpu.matmul %358, %5, %cst_130 {dimension_numbers = #tpu.dot_dimension_numbers<[1], [0], [0], [1], [0, 0, 1, 1], [], []>} : vector<2x32xbf16>, vector<32x128xbf16>, vector<2x128xf32> -> vector<2x128xf32>
    %360 = arith.addf %357, %359 : vector<2x128xf32>
    %361 = vector.broadcast %6 : vector<1x128xf32> to vector<2x128xf32>
    %362 = arith.addf %360, %361 : vector<2x128xf32>
    %363 = vector.extract_strided_slice %362 {offsets = [0, 0], sizes = [2, 32], strides = [1, 1]} : vector<2x128xf32> to vector<2x32xf32>
    %cst_131 = arith.constant 0.000000e+00 : f32
    %364 = vector.broadcast %cst_131 : f32 to vector<2x32xf32>
    %365 = arith.subf %364, %363 : vector<2x32xf32>
    %366 = math.exp %365 : vector<2x32xf32>
    %cst_132 = arith.constant 1.000000e+00 : f32
    %367 = vector.broadcast %cst_132 : f32 to vector<2x32xf32>
    %368 = arith.addf %367, %366 : vector<2x32xf32>
    %cst_133 = arith.constant 1.000000e+00 : f32
    %369 = vector.broadcast %cst_133 : f32 to vector<2x32xf32>
    %370 = arith.divf %369, %368 : vector<2x32xf32>
    %371 = vector.extract_strided_slice %362 {offsets = [0, 32], sizes = [2, 32], strides = [1, 1]} : vector<2x128xf32> to vector<2x32xf32>
    %cst_134 = arith.constant 0.000000e+00 : f32
    %372 = vector.broadcast %cst_134 : f32 to vector<2x32xf32>
    %373 = arith.subf %372, %371 : vector<2x32xf32>
    %374 = math.exp %373 : vector<2x32xf32>
    %cst_135 = arith.constant 1.000000e+00 : f32
    %375 = vector.broadcast %cst_135 : f32 to vector<2x32xf32>
    %376 = arith.addf %375, %374 : vector<2x32xf32>
    %cst_136 = arith.constant 1.000000e+00 : f32
    %377 = vector.broadcast %cst_136 : f32 to vector<2x32xf32>
    %378 = arith.divf %377, %376 : vector<2x32xf32>
    %379 = vector.extract_strided_slice %362 {offsets = [0, 64], sizes = [2, 32], strides = [1, 1]} : vector<2x128xf32> to vector<2x32xf32>
    %380 = math.tanh %379 : vector<2x32xf32>
    %381 = vector.extract_strided_slice %362 {offsets = [0, 96], sizes = [2, 32], strides = [1, 1]} : vector<2x128xf32> to vector<2x32xf32>
    %cst_137 = arith.constant 0.000000e+00 : f32
    %382 = vector.broadcast %cst_137 : f32 to vector<2x32xf32>
    %383 = arith.subf %382, %381 : vector<2x32xf32>
    %384 = math.exp %383 : vector<2x32xf32>
    %cst_138 = arith.constant 1.000000e+00 : f32
    %385 = vector.broadcast %cst_138 : f32 to vector<2x32xf32>
    %386 = arith.addf %385, %384 : vector<2x32xf32>
    %cst_139 = arith.constant 1.000000e+00 : f32
    %387 = vector.broadcast %cst_139 : f32 to vector<2x32xf32>
    %388 = arith.divf %387, %386 : vector<2x32xf32>
    %389 = arith.mulf %378, %289 : vector<2x32xf32>
    %390 = arith.mulf %370, %380 : vector<2x32xf32>
    %391 = arith.addf %389, %390 : vector<2x32xf32>
    %392 = math.tanh %391 : vector<2x32xf32>
    %393 = arith.mulf %388, %392 : vector<2x32xf32>
    %394 = vector.broadcast %355 : i32 to vector<2x1xi32>
    %395 = arith.cmpi slt, %394, %3 : vector<2x1xi32>
    %396 = vector.shape_cast %395 : vector<2x1xi1> to vector<2x1xi1>
    %397 = vector.broadcast %396 : vector<2x1xi1> to vector<2x32xi1>
    %398 = arith.select %397, %393, %286 : vector<2x32xi1>, vector<2x32xf32>
    %399 = vector.shape_cast %395 : vector<2x1xi1> to vector<2x1xi1>
    %400 = vector.broadcast %399 : vector<2x1xi1> to vector<2x32xi1>
    %401 = arith.select %400, %391, %289 : vector<2x32xi1>, vector<2x32xf32>
    %cst_140 = arith.constant 0.000000e+00 : f32
    %402 = vector.shape_cast %395 : vector<2x1xi1> to vector<2x1xi1>
    %403 = vector.broadcast %402 : vector<2x1xi1> to vector<2x32xi1>
    %404 = vector.broadcast %cst_140 : f32 to vector<2x32xf32>
    %405 = arith.select %403, %393, %404 : vector<2x32xi1>, vector<2x32xf32>
    %c3_141 = arith.constant 3 : index
    %c0_142 = arith.constant 0 : index
    %c0_143 = arith.constant 0 : index
    %406 = vector.load %arg10[%c3_141, %c0_142, %c0_143] : memref<8x2x32xf32, #tpu.memory_space<vmem>>, vector<1x2x32xf32>
    %407 = vector.shape_cast %406 : vector<1x2x32xf32> to vector<2x32xf32>
    %408 = vector.shape_cast %405 : vector<2x32xf32> to vector<1x2x32xf32>
    tpu.vector_store %arg10[%c3_141, %c0_142, %c0_143], %408 {strides = array<i32>} : memref<8x2x32xf32, #tpu.memory_space<vmem>>, vector<1x2x32xf32>,
    %c4 = arith.constant 4 : index
    %c0_144 = arith.constant 0 : index
    %c0_145 = arith.constant 0 : index
    %409 = vector.load %arg3[%c4, %c0_144, %c0_145] : memref<8x2x16xf32, #tpu.memory_space<vmem>>, vector<1x2x16xf32>
    %410 = vector.shape_cast %409 : vector<1x2x16xf32> to vector<2x16xf32>
    %c4_i32 = arith.constant 4 : i32
    %411 = arith.addi %16, %c4_i32 : i32
    %412 = arith.truncf %410 : vector<2x16xf32> to vector<2x16xbf16>
    %cst_146 = arith.constant dense<0.000000e+00> : vector<2x128xf32>
    %413 = tpu.matmul %412, %7, %cst_146 {dimension_numbers = #tpu.dot_dimension_numbers<[1], [0], [0], [1], [0, 0, 1, 1], [], []>} : vector<2x16xbf16>, vector<16x128xbf16>, vector<2x128xf32> -> vector<2x128xf32>
    %414 = arith.truncf %342 : vector<2x32xf32> to vector<2x32xbf16>
    %cst_147 = arith.constant dense<0.000000e+00> : vector<2x128xf32>
    %415 = tpu.matmul %414, %8, %cst_147 {dimension_numbers = #tpu.dot_dimension_numbers<[1], [0], [0], [1], [0, 0, 1, 1], [], []>} : vector<2x32xbf16>, vector<32x128xbf16>, vector<2x128xf32> -> vector<2x128xf32>
    %416 = arith.addf %413, %415 : vector<2x128xf32>
    %417 = vector.broadcast %9 : vector<1x128xf32> to vector<2x128xf32>
    %418 = arith.addf %416, %417 : vector<2x128xf32>
    %419 = vector.extract_strided_slice %418 {offsets = [0, 0], sizes = [2, 32], strides = [1, 1]} : vector<2x128xf32> to vector<2x32xf32>
    %cst_148 = arith.constant 0.000000e+00 : f32
    %420 = vector.broadcast %cst_148 : f32 to vector<2x32xf32>
    %421 = arith.subf %420, %419 : vector<2x32xf32>
    %422 = math.exp %421 : vector<2x32xf32>
    %cst_149 = arith.constant 1.000000e+00 : f32
    %423 = vector.broadcast %cst_149 : f32 to vector<2x32xf32>
    %424 = arith.addf %423, %422 : vector<2x32xf32>
    %cst_150 = arith.constant 1.000000e+00 : f32
    %425 = vector.broadcast %cst_150 : f32 to vector<2x32xf32>
    %426 = arith.divf %425, %424 : vector<2x32xf32>
    %427 = vector.extract_strided_slice %418 {offsets = [0, 32], sizes = [2, 32], strides = [1, 1]} : vector<2x128xf32> to vector<2x32xf32>
    %cst_151 = arith.constant 0.000000e+00 : f32
    %428 = vector.broadcast %cst_151 : f32 to vector<2x32xf32>
    %429 = arith.subf %428, %427 : vector<2x32xf32>
    %430 = math.exp %429 : vector<2x32xf32>
    %cst_152 = arith.constant 1.000000e+00 : f32
    %431 = vector.broadcast %cst_152 : f32 to vector<2x32xf32>
    %432 = arith.addf %431, %430 : vector<2x32xf32>
    %cst_153 = arith.constant 1.000000e+00 : f32
    %433 = vector.broadcast %cst_153 : f32 to vector<2x32xf32>
    %434 = arith.divf %433, %432 : vector<2x32xf32>
    %435 = vector.extract_strided_slice %418 {offsets = [0, 64], sizes = [2, 32], strides = [1, 1]} : vector<2x128xf32> to vector<2x32xf32>
    %436 = math.tanh %435 : vector<2x32xf32>
    %437 = vector.extract_strided_slice %418 {offsets = [0, 96], sizes = [2, 32], strides = [1, 1]} : vector<2x128xf32> to vector<2x32xf32>
    %cst_154 = arith.constant 0.000000e+00 : f32
    %438 = vector.broadcast %cst_154 : f32 to vector<2x32xf32>
    %439 = arith.subf %438, %437 : vector<2x32xf32>
    %440 = math.exp %439 : vector<2x32xf32>
    %cst_155 = arith.constant 1.000000e+00 : f32
    %441 = vector.broadcast %cst_155 : f32 to vector<2x32xf32>
    %442 = arith.addf %441, %440 : vector<2x32xf32>
    %cst_156 = arith.constant 1.000000e+00 : f32
    %443 = vector.broadcast %cst_156 : f32 to vector<2x32xf32>
    %444 = arith.divf %443, %442 : vector<2x32xf32>
    %445 = arith.mulf %434, %345 : vector<2x32xf32>
    %446 = arith.mulf %426, %436 : vector<2x32xf32>
    %447 = arith.addf %445, %446 : vector<2x32xf32>
    %448 = math.tanh %447 : vector<2x32xf32>
    %449 = arith.mulf %444, %448 : vector<2x32xf32>
    %450 = vector.broadcast %411 : i32 to vector<2x1xi32>
    %451 = arith.cmpi slt, %450, %3 : vector<2x1xi32>
    %452 = vector.shape_cast %451 : vector<2x1xi1> to vector<2x1xi1>
    %453 = vector.broadcast %452 : vector<2x1xi1> to vector<2x32xi1>
    %454 = arith.select %453, %449, %342 : vector<2x32xi1>, vector<2x32xf32>
    %455 = vector.shape_cast %451 : vector<2x1xi1> to vector<2x1xi1>
    %456 = vector.broadcast %455 : vector<2x1xi1> to vector<2x32xi1>
    %457 = arith.select %456, %447, %345 : vector<2x32xi1>, vector<2x32xf32>
    %cst_157 = arith.constant 0.000000e+00 : f32
    %458 = vector.shape_cast %451 : vector<2x1xi1> to vector<2x1xi1>
    %459 = vector.broadcast %458 : vector<2x1xi1> to vector<2x32xi1>
    %460 = vector.broadcast %cst_157 : f32 to vector<2x32xf32>
    %461 = arith.select %459, %449, %460 : vector<2x32xi1>, vector<2x32xf32>
    %c4_158 = arith.constant 4 : index
    %c0_159 = arith.constant 0 : index
    %c0_160 = arith.constant 0 : index
    %462 = vector.load %arg11[%c4_158, %c0_159, %c0_160] : memref<8x2x32xf32, #tpu.memory_space<vmem>>, vector<1x2x32xf32>
    %463 = vector.shape_cast %462 : vector<1x2x32xf32> to vector<2x32xf32>
    %464 = vector.shape_cast %461 : vector<2x32xf32> to vector<1x2x32xf32>
    tpu.vector_store %arg11[%c4_158, %c0_159, %c0_160], %464 {strides = array<i32>} : memref<8x2x32xf32, #tpu.memory_space<vmem>>, vector<1x2x32xf32>,
    %c4_161 = arith.constant 4 : index
    %c0_162 = arith.constant 0 : index
    %c0_163 = arith.constant 0 : index
    %465 = vector.load %arg2[%c4_161, %c0_162, %c0_163] : memref<8x2x16xf32, #tpu.memory_space<vmem>>, vector<1x2x16xf32>
    %466 = vector.shape_cast %465 : vector<1x2x16xf32> to vector<2x16xf32>
    %c4_i32_164 = arith.constant 4 : i32
    %467 = arith.addi %14, %c4_i32_164 : i32
    %468 = arith.truncf %466 : vector<2x16xf32> to vector<2x16xbf16>
    %cst_165 = arith.constant dense<0.000000e+00> : vector<2x128xf32>
    %469 = tpu.matmul %468, %4, %cst_165 {dimension_numbers = #tpu.dot_dimension_numbers<[1], [0], [0], [1], [0, 0, 1, 1], [], []>} : vector<2x16xbf16>, vector<16x128xbf16>, vector<2x128xf32> -> vector<2x128xf32>
    %470 = arith.truncf %398 : vector<2x32xf32> to vector<2x32xbf16>
    %cst_166 = arith.constant dense<0.000000e+00> : vector<2x128xf32>
    %471 = tpu.matmul %470, %5, %cst_166 {dimension_numbers = #tpu.dot_dimension_numbers<[1], [0], [0], [1], [0, 0, 1, 1], [], []>} : vector<2x32xbf16>, vector<32x128xbf16>, vector<2x128xf32> -> vector<2x128xf32>
    %472 = arith.addf %469, %471 : vector<2x128xf32>
    %473 = vector.broadcast %6 : vector<1x128xf32> to vector<2x128xf32>
    %474 = arith.addf %472, %473 : vector<2x128xf32>
    %475 = vector.extract_strided_slice %474 {offsets = [0, 0], sizes = [2, 32], strides = [1, 1]} : vector<2x128xf32> to vector<2x32xf32>
    %cst_167 = arith.constant 0.000000e+00 : f32
    %476 = vector.broadcast %cst_167 : f32 to vector<2x32xf32>
    %477 = arith.subf %476, %475 : vector<2x32xf32>
    %478 = math.exp %477 : vector<2x32xf32>
    %cst_168 = arith.constant 1.000000e+00 : f32
    %479 = vector.broadcast %cst_168 : f32 to vector<2x32xf32>
    %480 = arith.addf %479, %478 : vector<2x32xf32>
    %cst_169 = arith.constant 1.000000e+00 : f32
    %481 = vector.broadcast %cst_169 : f32 to vector<2x32xf32>
    %482 = arith.divf %481, %480 : vector<2x32xf32>
    %483 = vector.extract_strided_slice %474 {offsets = [0, 32], sizes = [2, 32], strides = [1, 1]} : vector<2x128xf32> to vector<2x32xf32>
    %cst_170 = arith.constant 0.000000e+00 : f32
    %484 = vector.broadcast %cst_170 : f32 to vector<2x32xf32>
    %485 = arith.subf %484, %483 : vector<2x32xf32>
    %486 = math.exp %485 : vector<2x32xf32>
    %cst_171 = arith.constant 1.000000e+00 : f32
    %487 = vector.broadcast %cst_171 : f32 to vector<2x32xf32>
    %488 = arith.addf %487, %486 : vector<2x32xf32>
    %cst_172 = arith.constant 1.000000e+00 : f32
    %489 = vector.broadcast %cst_172 : f32 to vector<2x32xf32>
    %490 = arith.divf %489, %488 : vector<2x32xf32>
    %491 = vector.extract_strided_slice %474 {offsets = [0, 64], sizes = [2, 32], strides = [1, 1]} : vector<2x128xf32> to vector<2x32xf32>
    %492 = math.tanh %491 : vector<2x32xf32>
    %493 = vector.extract_strided_slice %474 {offsets = [0, 96], sizes = [2, 32], strides = [1, 1]} : vector<2x128xf32> to vector<2x32xf32>
    %cst_173 = arith.constant 0.000000e+00 : f32
    %494 = vector.broadcast %cst_173 : f32 to vector<2x32xf32>
    %495 = arith.subf %494, %493 : vector<2x32xf32>
    %496 = math.exp %495 : vector<2x32xf32>
    %cst_174 = arith.constant 1.000000e+00 : f32
    %497 = vector.broadcast %cst_174 : f32 to vector<2x32xf32>
    %498 = arith.addf %497, %496 : vector<2x32xf32>
    %cst_175 = arith.constant 1.000000e+00 : f32
    %499 = vector.broadcast %cst_175 : f32 to vector<2x32xf32>
    %500 = arith.divf %499, %498 : vector<2x32xf32>
    %501 = arith.mulf %490, %401 : vector<2x32xf32>
    %502 = arith.mulf %482, %492 : vector<2x32xf32>
    %503 = arith.addf %501, %502 : vector<2x32xf32>
    %504 = math.tanh %503 : vector<2x32xf32>
    %505 = arith.mulf %500, %504 : vector<2x32xf32>
    %506 = vector.broadcast %467 : i32 to vector<2x1xi32>
    %507 = arith.cmpi slt, %506, %3 : vector<2x1xi32>
    %508 = vector.shape_cast %507 : vector<2x1xi1> to vector<2x1xi1>
    %509 = vector.broadcast %508 : vector<2x1xi1> to vector<2x32xi1>
    %510 = arith.select %509, %505, %398 : vector<2x32xi1>, vector<2x32xf32>
    %511 = vector.shape_cast %507 : vector<2x1xi1> to vector<2x1xi1>
    %512 = vector.broadcast %511 : vector<2x1xi1> to vector<2x32xi1>
    %513 = arith.select %512, %503, %401 : vector<2x32xi1>, vector<2x32xf32>
    %cst_176 = arith.constant 0.000000e+00 : f32
    %514 = vector.shape_cast %507 : vector<2x1xi1> to vector<2x1xi1>
    %515 = vector.broadcast %514 : vector<2x1xi1> to vector<2x32xi1>
    %516 = vector.broadcast %cst_176 : f32 to vector<2x32xf32>
    %517 = arith.select %515, %505, %516 : vector<2x32xi1>, vector<2x32xf32>
    %c4_177 = arith.constant 4 : index
    %c0_178 = arith.constant 0 : index
    %c0_179 = arith.constant 0 : index
    %518 = vector.load %arg10[%c4_177, %c0_178, %c0_179] : memref<8x2x32xf32, #tpu.memory_space<vmem>>, vector<1x2x32xf32>
    %519 = vector.shape_cast %518 : vector<1x2x32xf32> to vector<2x32xf32>
    %520 = vector.shape_cast %517 : vector<2x32xf32> to vector<1x2x32xf32>
    tpu.vector_store %arg10[%c4_177, %c0_178, %c0_179], %520 {strides = array<i32>} : memref<8x2x32xf32, #tpu.memory_space<vmem>>, vector<1x2x32xf32>,
    %c3_180 = arith.constant 3 : index
    %c0_181 = arith.constant 0 : index
    %c0_182 = arith.constant 0 : index
    %521 = vector.load %arg3[%c3_180, %c0_181, %c0_182] : memref<8x2x16xf32, #tpu.memory_space<vmem>>, vector<1x2x16xf32>
    %522 = vector.shape_cast %521 : vector<1x2x16xf32> to vector<2x16xf32>
    %c3_i32_183 = arith.constant 3 : i32
    %523 = arith.addi %16, %c3_i32_183 : i32
    %524 = arith.truncf %522 : vector<2x16xf32> to vector<2x16xbf16>
    %cst_184 = arith.constant dense<0.000000e+00> : vector<2x128xf32>
    %525 = tpu.matmul %524, %7, %cst_184 {dimension_numbers = #tpu.dot_dimension_numbers<[1], [0], [0], [1], [0, 0, 1, 1], [], []>} : vector<2x16xbf16>, vector<16x128xbf16>, vector<2x128xf32> -> vector<2x128xf32>
    %526 = arith.truncf %454 : vector<2x32xf32> to vector<2x32xbf16>
    %cst_185 = arith.constant dense<0.000000e+00> : vector<2x128xf32>
    %527 = tpu.matmul %526, %8, %cst_185 {dimension_numbers = #tpu.dot_dimension_numbers<[1], [0], [0], [1], [0, 0, 1, 1], [], []>} : vector<2x32xbf16>, vector<32x128xbf16>, vector<2x128xf32> -> vector<2x128xf32>
    %528 = arith.addf %525, %527 : vector<2x128xf32>
    %529 = vector.broadcast %9 : vector<1x128xf32> to vector<2x128xf32>
    %530 = arith.addf %528, %529 : vector<2x128xf32>
    %531 = vector.extract_strided_slice %530 {offsets = [0, 0], sizes = [2, 32], strides = [1, 1]} : vector<2x128xf32> to vector<2x32xf32>
    %cst_186 = arith.constant 0.000000e+00 : f32
    %532 = vector.broadcast %cst_186 : f32 to vector<2x32xf32>
    %533 = arith.subf %532, %531 : vector<2x32xf32>
    %534 = math.exp %533 : vector<2x32xf32>
    %cst_187 = arith.constant 1.000000e+00 : f32
    %535 = vector.broadcast %cst_187 : f32 to vector<2x32xf32>
    %536 = arith.addf %535, %534 : vector<2x32xf32>
    %cst_188 = arith.constant 1.000000e+00 : f32
    %537 = vector.broadcast %cst_188 : f32 to vector<2x32xf32>
    %538 = arith.divf %537, %536 : vector<2x32xf32>
    %539 = vector.extract_strided_slice %530 {offsets = [0, 32], sizes = [2, 32], strides = [1, 1]} : vector<2x128xf32> to vector<2x32xf32>
    %cst_189 = arith.constant 0.000000e+00 : f32
    %540 = vector.broadcast %cst_189 : f32 to vector<2x32xf32>
    %541 = arith.subf %540, %539 : vector<2x32xf32>
    %542 = math.exp %541 : vector<2x32xf32>
    %cst_190 = arith.constant 1.000000e+00 : f32
    %543 = vector.broadcast %cst_190 : f32 to vector<2x32xf32>
    %544 = arith.addf %543, %542 : vector<2x32xf32>
    %cst_191 = arith.constant 1.000000e+00 : f32
    %545 = vector.broadcast %cst_191 : f32 to vector<2x32xf32>
    %546 = arith.divf %545, %544 : vector<2x32xf32>
    %547 = vector.extract_strided_slice %530 {offsets = [0, 64], sizes = [2, 32], strides = [1, 1]} : vector<2x128xf32> to vector<2x32xf32>
    %548 = math.tanh %547 : vector<2x32xf32>
    %549 = vector.extract_strided_slice %530 {offsets = [0, 96], sizes = [2, 32], strides = [1, 1]} : vector<2x128xf32> to vector<2x32xf32>
    %cst_192 = arith.constant 0.000000e+00 : f32
    %550 = vector.broadcast %cst_192 : f32 to vector<2x32xf32>
    %551 = arith.subf %550, %549 : vector<2x32xf32>
    %552 = math.exp %551 : vector<2x32xf32>
    %cst_193 = arith.constant 1.000000e+00 : f32
    %553 = vector.broadcast %cst_193 : f32 to vector<2x32xf32>
    %554 = arith.addf %553, %552 : vector<2x32xf32>
    %cst_194 = arith.constant 1.000000e+00 : f32
    %555 = vector.broadcast %cst_194 : f32 to vector<2x32xf32>
    %556 = arith.divf %555, %554 : vector<2x32xf32>
    %557 = arith.mulf %546, %457 : vector<2x32xf32>
    %558 = arith.mulf %538, %548 : vector<2x32xf32>
    %559 = arith.addf %557, %558 : vector<2x32xf32>
    %560 = math.tanh %559 : vector<2x32xf32>
    %561 = arith.mulf %556, %560 : vector<2x32xf32>
    %562 = vector.broadcast %523 : i32 to vector<2x1xi32>
    %563 = arith.cmpi slt, %562, %3 : vector<2x1xi32>
    %564 = vector.shape_cast %563 : vector<2x1xi1> to vector<2x1xi1>
    %565 = vector.broadcast %564 : vector<2x1xi1> to vector<2x32xi1>
    %566 = arith.select %565, %561, %454 : vector<2x32xi1>, vector<2x32xf32>
    %567 = vector.shape_cast %563 : vector<2x1xi1> to vector<2x1xi1>
    %568 = vector.broadcast %567 : vector<2x1xi1> to vector<2x32xi1>
    %569 = arith.select %568, %559, %457 : vector<2x32xi1>, vector<2x32xf32>
    %cst_195 = arith.constant 0.000000e+00 : f32
    %570 = vector.shape_cast %563 : vector<2x1xi1> to vector<2x1xi1>
    %571 = vector.broadcast %570 : vector<2x1xi1> to vector<2x32xi1>
    %572 = vector.broadcast %cst_195 : f32 to vector<2x32xf32>
    %573 = arith.select %571, %561, %572 : vector<2x32xi1>, vector<2x32xf32>
    %c3_196 = arith.constant 3 : index
    %c0_197 = arith.constant 0 : index
    %c0_198 = arith.constant 0 : index
    %574 = vector.load %arg11[%c3_196, %c0_197, %c0_198] : memref<8x2x32xf32, #tpu.memory_space<vmem>>, vector<1x2x32xf32>
    %575 = vector.shape_cast %574 : vector<1x2x32xf32> to vector<2x32xf32>
    %576 = vector.shape_cast %573 : vector<2x32xf32> to vector<1x2x32xf32>
    tpu.vector_store %arg11[%c3_196, %c0_197, %c0_198], %576 {strides = array<i32>} : memref<8x2x32xf32, #tpu.memory_space<vmem>>, vector<1x2x32xf32>,
    %c5_199 = arith.constant 5 : index
    %c0_200 = arith.constant 0 : index
    %c0_201 = arith.constant 0 : index
    %577 = vector.load %arg2[%c5_199, %c0_200, %c0_201] : memref<8x2x16xf32, #tpu.memory_space<vmem>>, vector<1x2x16xf32>
    %578 = vector.shape_cast %577 : vector<1x2x16xf32> to vector<2x16xf32>
    %c5_i32_202 = arith.constant 5 : i32
    %579 = arith.addi %14, %c5_i32_202 : i32
    %580 = arith.truncf %578 : vector<2x16xf32> to vector<2x16xbf16>
    %cst_203 = arith.constant dense<0.000000e+00> : vector<2x128xf32>
    %581 = tpu.matmul %580, %4, %cst_203 {dimension_numbers = #tpu.dot_dimension_numbers<[1], [0], [0], [1], [0, 0, 1, 1], [], []>} : vector<2x16xbf16>, vector<16x128xbf16>, vector<2x128xf32> -> vector<2x128xf32>
    %582 = arith.truncf %510 : vector<2x32xf32> to vector<2x32xbf16>
    %cst_204 = arith.constant dense<0.000000e+00> : vector<2x128xf32>
    %583 = tpu.matmul %582, %5, %cst_204 {dimension_numbers = #tpu.dot_dimension_numbers<[1], [0], [0], [1], [0, 0, 1, 1], [], []>} : vector<2x32xbf16>, vector<32x128xbf16>, vector<2x128xf32> -> vector<2x128xf32>
    %584 = arith.addf %581, %583 : vector<2x128xf32>
    %585 = vector.broadcast %6 : vector<1x128xf32> to vector<2x128xf32>
    %586 = arith.addf %584, %585 : vector<2x128xf32>
    %587 = vector.extract_strided_slice %586 {offsets = [0, 0], sizes = [2, 32], strides = [1, 1]} : vector<2x128xf32> to vector<2x32xf32>
    %cst_205 = arith.constant 0.000000e+00 : f32
    %588 = vector.broadcast %cst_205 : f32 to vector<2x32xf32>
    %589 = arith.subf %588, %587 : vector<2x32xf32>
    %590 = math.exp %589 : vector<2x32xf32>
    %cst_206 = arith.constant 1.000000e+00 : f32
    %591 = vector.broadcast %cst_206 : f32 to vector<2x32xf32>
    %592 = arith.addf %591, %590 : vector<2x32xf32>
    %cst_207 = arith.constant 1.000000e+00 : f32
    %593 = vector.broadcast %cst_207 : f32 to vector<2x32xf32>
    %594 = arith.divf %593, %592 : vector<2x32xf32>
    %595 = vector.extract_strided_slice %586 {offsets = [0, 32], sizes = [2, 32], strides = [1, 1]} : vector<2x128xf32> to vector<2x32xf32>
    %cst_208 = arith.constant 0.000000e+00 : f32
    %596 = vector.broadcast %cst_208 : f32 to vector<2x32xf32>
    %597 = arith.subf %596, %595 : vector<2x32xf32>
    %598 = math.exp %597 : vector<2x32xf32>
    %cst_209 = arith.constant 1.000000e+00 : f32
    %599 = vector.broadcast %cst_209 : f32 to vector<2x32xf32>
    %600 = arith.addf %599, %598 : vector<2x32xf32>
    %cst_210 = arith.constant 1.000000e+00 : f32
    %601 = vector.broadcast %cst_210 : f32 to vector<2x32xf32>
    %602 = arith.divf %601, %600 : vector<2x32xf32>
    %603 = vector.extract_strided_slice %586 {offsets = [0, 64], sizes = [2, 32], strides = [1, 1]} : vector<2x128xf32> to vector<2x32xf32>
    %604 = math.tanh %603 : vector<2x32xf32>
    %605 = vector.extract_strided_slice %586 {offsets = [0, 96], sizes = [2, 32], strides = [1, 1]} : vector<2x128xf32> to vector<2x32xf32>
    %cst_211 = arith.constant 0.000000e+00 : f32
    %606 = vector.broadcast %cst_211 : f32 to vector<2x32xf32>
    %607 = arith.subf %606, %605 : vector<2x32xf32>
    %608 = math.exp %607 : vector<2x32xf32>
    %cst_212 = arith.constant 1.000000e+00 : f32
    %609 = vector.broadcast %cst_212 : f32 to vector<2x32xf32>
    %610 = arith.addf %609, %608 : vector<2x32xf32>
    %cst_213 = arith.constant 1.000000e+00 : f32
    %611 = vector.broadcast %cst_213 : f32 to vector<2x32xf32>
    %612 = arith.divf %611, %610 : vector<2x32xf32>
    %613 = arith.mulf %602, %513 : vector<2x32xf32>
    %614 = arith.mulf %594, %604 : vector<2x32xf32>
    %615 = arith.addf %613, %614 : vector<2x32xf32>
    %616 = math.tanh %615 : vector<2x32xf32>
    %617 = arith.mulf %612, %616 : vector<2x32xf32>
    %618 = vector.broadcast %579 : i32 to vector<2x1xi32>
    %619 = arith.cmpi slt, %618, %3 : vector<2x1xi32>
    %620 = vector.shape_cast %619 : vector<2x1xi1> to vector<2x1xi1>
    %621 = vector.broadcast %620 : vector<2x1xi1> to vector<2x32xi1>
    %622 = arith.select %621, %617, %510 : vector<2x32xi1>, vector<2x32xf32>
    %623 = vector.shape_cast %619 : vector<2x1xi1> to vector<2x1xi1>
    %624 = vector.broadcast %623 : vector<2x1xi1> to vector<2x32xi1>
    %625 = arith.select %624, %615, %513 : vector<2x32xi1>, vector<2x32xf32>
    %cst_214 = arith.constant 0.000000e+00 : f32
    %626 = vector.shape_cast %619 : vector<2x1xi1> to vector<2x1xi1>
    %627 = vector.broadcast %626 : vector<2x1xi1> to vector<2x32xi1>
    %628 = vector.broadcast %cst_214 : f32 to vector<2x32xf32>
    %629 = arith.select %627, %617, %628 : vector<2x32xi1>, vector<2x32xf32>
    %c5_215 = arith.constant 5 : index
    %c0_216 = arith.constant 0 : index
    %c0_217 = arith.constant 0 : index
    %630 = vector.load %arg10[%c5_215, %c0_216, %c0_217] : memref<8x2x32xf32, #tpu.memory_space<vmem>>, vector<1x2x32xf32>
    %631 = vector.shape_cast %630 : vector<1x2x32xf32> to vector<2x32xf32>
    %632 = vector.shape_cast %629 : vector<2x32xf32> to vector<1x2x32xf32>
    tpu.vector_store %arg10[%c5_215, %c0_216, %c0_217], %632 {strides = array<i32>} : memref<8x2x32xf32, #tpu.memory_space<vmem>>, vector<1x2x32xf32>,
    %c2_218 = arith.constant 2 : index
    %c0_219 = arith.constant 0 : index
    %c0_220 = arith.constant 0 : index
    %633 = vector.load %arg3[%c2_218, %c0_219, %c0_220] : memref<8x2x16xf32, #tpu.memory_space<vmem>>, vector<1x2x16xf32>
    %634 = vector.shape_cast %633 : vector<1x2x16xf32> to vector<2x16xf32>
    %c2_i32_221 = arith.constant 2 : i32
    %635 = arith.addi %16, %c2_i32_221 : i32
    %636 = arith.truncf %634 : vector<2x16xf32> to vector<2x16xbf16>
    %cst_222 = arith.constant dense<0.000000e+00> : vector<2x128xf32>
    %637 = tpu.matmul %636, %7, %cst_222 {dimension_numbers = #tpu.dot_dimension_numbers<[1], [0], [0], [1], [0, 0, 1, 1], [], []>} : vector<2x16xbf16>, vector<16x128xbf16>, vector<2x128xf32> -> vector<2x128xf32>
    %638 = arith.truncf %566 : vector<2x32xf32> to vector<2x32xbf16>
    %cst_223 = arith.constant dense<0.000000e+00> : vector<2x128xf32>
    %639 = tpu.matmul %638, %8, %cst_223 {dimension_numbers = #tpu.dot_dimension_numbers<[1], [0], [0], [1], [0, 0, 1, 1], [], []>} : vector<2x32xbf16>, vector<32x128xbf16>, vector<2x128xf32> -> vector<2x128xf32>
    %640 = arith.addf %637, %639 : vector<2x128xf32>
    %641 = vector.broadcast %9 : vector<1x128xf32> to vector<2x128xf32>
    %642 = arith.addf %640, %641 : vector<2x128xf32>
    %643 = vector.extract_strided_slice %642 {offsets = [0, 0], sizes = [2, 32], strides = [1, 1]} : vector<2x128xf32> to vector<2x32xf32>
    %cst_224 = arith.constant 0.000000e+00 : f32
    %644 = vector.broadcast %cst_224 : f32 to vector<2x32xf32>
    %645 = arith.subf %644, %643 : vector<2x32xf32>
    %646 = math.exp %645 : vector<2x32xf32>
    %cst_225 = arith.constant 1.000000e+00 : f32
    %647 = vector.broadcast %cst_225 : f32 to vector<2x32xf32>
    %648 = arith.addf %647, %646 : vector<2x32xf32>
    %cst_226 = arith.constant 1.000000e+00 : f32
    %649 = vector.broadcast %cst_226 : f32 to vector<2x32xf32>
    %650 = arith.divf %649, %648 : vector<2x32xf32>
    %651 = vector.extract_strided_slice %642 {offsets = [0, 32], sizes = [2, 32], strides = [1, 1]} : vector<2x128xf32> to vector<2x32xf32>
    %cst_227 = arith.constant 0.000000e+00 : f32
    %652 = vector.broadcast %cst_227 : f32 to vector<2x32xf32>
    %653 = arith.subf %652, %651 : vector<2x32xf32>
    %654 = math.exp %653 : vector<2x32xf32>
    %cst_228 = arith.constant 1.000000e+00 : f32
    %655 = vector.broadcast %cst_228 : f32 to vector<2x32xf32>
    %656 = arith.addf %655, %654 : vector<2x32xf32>
    %cst_229 = arith.constant 1.000000e+00 : f32
    %657 = vector.broadcast %cst_229 : f32 to vector<2x32xf32>
    %658 = arith.divf %657, %656 : vector<2x32xf32>
    %659 = vector.extract_strided_slice %642 {offsets = [0, 64], sizes = [2, 32], strides = [1, 1]} : vector<2x128xf32> to vector<2x32xf32>
    %660 = math.tanh %659 : vector<2x32xf32>
    %661 = vector.extract_strided_slice %642 {offsets = [0, 96], sizes = [2, 32], strides = [1, 1]} : vector<2x128xf32> to vector<2x32xf32>
    %cst_230 = arith.constant 0.000000e+00 : f32
    %662 = vector.broadcast %cst_230 : f32 to vector<2x32xf32>
    %663 = arith.subf %662, %661 : vector<2x32xf32>
    %664 = math.exp %663 : vector<2x32xf32>
    %cst_231 = arith.constant 1.000000e+00 : f32
    %665 = vector.broadcast %cst_231 : f32 to vector<2x32xf32>
    %666 = arith.addf %665, %664 : vector<2x32xf32>
    %cst_232 = arith.constant 1.000000e+00 : f32
    %667 = vector.broadcast %cst_232 : f32 to vector<2x32xf32>
    %668 = arith.divf %667, %666 : vector<2x32xf32>
    %669 = arith.mulf %658, %569 : vector<2x32xf32>
    %670 = arith.mulf %650, %660 : vector<2x32xf32>
    %671 = arith.addf %669, %670 : vector<2x32xf32>
    %672 = math.tanh %671 : vector<2x32xf32>
    %673 = arith.mulf %668, %672 : vector<2x32xf32>
    %674 = vector.broadcast %635 : i32 to vector<2x1xi32>
    %675 = arith.cmpi slt, %674, %3 : vector<2x1xi32>
    %676 = vector.shape_cast %675 : vector<2x1xi1> to vector<2x1xi1>
    %677 = vector.broadcast %676 : vector<2x1xi1> to vector<2x32xi1>
    %678 = arith.select %677, %673, %566 : vector<2x32xi1>, vector<2x32xf32>
    %679 = vector.shape_cast %675 : vector<2x1xi1> to vector<2x1xi1>
    %680 = vector.broadcast %679 : vector<2x1xi1> to vector<2x32xi1>
    %681 = arith.select %680, %671, %569 : vector<2x32xi1>, vector<2x32xf32>
    %cst_233 = arith.constant 0.000000e+00 : f32
    %682 = vector.shape_cast %675 : vector<2x1xi1> to vector<2x1xi1>
    %683 = vector.broadcast %682 : vector<2x1xi1> to vector<2x32xi1>
    %684 = vector.broadcast %cst_233 : f32 to vector<2x32xf32>
    %685 = arith.select %683, %673, %684 : vector<2x32xi1>, vector<2x32xf32>
    %c2_234 = arith.constant 2 : index
    %c0_235 = arith.constant 0 : index
    %c0_236 = arith.constant 0 : index
    %686 = vector.load %arg11[%c2_234, %c0_235, %c0_236] : memref<8x2x32xf32, #tpu.memory_space<vmem>>, vector<1x2x32xf32>
    %687 = vector.shape_cast %686 : vector<1x2x32xf32> to vector<2x32xf32>
    %688 = vector.shape_cast %685 : vector<2x32xf32> to vector<1x2x32xf32>
    tpu.vector_store %arg11[%c2_234, %c0_235, %c0_236], %688 {strides = array<i32>} : memref<8x2x32xf32, #tpu.memory_space<vmem>>, vector<1x2x32xf32>,
    %c6_237 = arith.constant 6 : index
    %c0_238 = arith.constant 0 : index
    %c0_239 = arith.constant 0 : index
    %689 = vector.load %arg2[%c6_237, %c0_238, %c0_239] : memref<8x2x16xf32, #tpu.memory_space<vmem>>, vector<1x2x16xf32>
    %690 = vector.shape_cast %689 : vector<1x2x16xf32> to vector<2x16xf32>
    %c6_i32_240 = arith.constant 6 : i32
    %691 = arith.addi %14, %c6_i32_240 : i32
    %692 = arith.truncf %690 : vector<2x16xf32> to vector<2x16xbf16>
    %cst_241 = arith.constant dense<0.000000e+00> : vector<2x128xf32>
    %693 = tpu.matmul %692, %4, %cst_241 {dimension_numbers = #tpu.dot_dimension_numbers<[1], [0], [0], [1], [0, 0, 1, 1], [], []>} : vector<2x16xbf16>, vector<16x128xbf16>, vector<2x128xf32> -> vector<2x128xf32>
    %694 = arith.truncf %622 : vector<2x32xf32> to vector<2x32xbf16>
    %cst_242 = arith.constant dense<0.000000e+00> : vector<2x128xf32>
    %695 = tpu.matmul %694, %5, %cst_242 {dimension_numbers = #tpu.dot_dimension_numbers<[1], [0], [0], [1], [0, 0, 1, 1], [], []>} : vector<2x32xbf16>, vector<32x128xbf16>, vector<2x128xf32> -> vector<2x128xf32>
    %696 = arith.addf %693, %695 : vector<2x128xf32>
    %697 = vector.broadcast %6 : vector<1x128xf32> to vector<2x128xf32>
    %698 = arith.addf %696, %697 : vector<2x128xf32>
    %699 = vector.extract_strided_slice %698 {offsets = [0, 0], sizes = [2, 32], strides = [1, 1]} : vector<2x128xf32> to vector<2x32xf32>
    %cst_243 = arith.constant 0.000000e+00 : f32
    %700 = vector.broadcast %cst_243 : f32 to vector<2x32xf32>
    %701 = arith.subf %700, %699 : vector<2x32xf32>
    %702 = math.exp %701 : vector<2x32xf32>
    %cst_244 = arith.constant 1.000000e+00 : f32
    %703 = vector.broadcast %cst_244 : f32 to vector<2x32xf32>
    %704 = arith.addf %703, %702 : vector<2x32xf32>
    %cst_245 = arith.constant 1.000000e+00 : f32
    %705 = vector.broadcast %cst_245 : f32 to vector<2x32xf32>
    %706 = arith.divf %705, %704 : vector<2x32xf32>
    %707 = vector.extract_strided_slice %698 {offsets = [0, 32], sizes = [2, 32], strides = [1, 1]} : vector<2x128xf32> to vector<2x32xf32>
    %cst_246 = arith.constant 0.000000e+00 : f32
    %708 = vector.broadcast %cst_246 : f32 to vector<2x32xf32>
    %709 = arith.subf %708, %707 : vector<2x32xf32>
    %710 = math.exp %709 : vector<2x32xf32>
    %cst_247 = arith.constant 1.000000e+00 : f32
    %711 = vector.broadcast %cst_247 : f32 to vector<2x32xf32>
    %712 = arith.addf %711, %710 : vector<2x32xf32>
    %cst_248 = arith.constant 1.000000e+00 : f32
    %713 = vector.broadcast %cst_248 : f32 to vector<2x32xf32>
    %714 = arith.divf %713, %712 : vector<2x32xf32>
    %715 = vector.extract_strided_slice %698 {offsets = [0, 64], sizes = [2, 32], strides = [1, 1]} : vector<2x128xf32> to vector<2x32xf32>
    %716 = math.tanh %715 : vector<2x32xf32>
    %717 = vector.extract_strided_slice %698 {offsets = [0, 96], sizes = [2, 32], strides = [1, 1]} : vector<2x128xf32> to vector<2x32xf32>
    %cst_249 = arith.constant 0.000000e+00 : f32
    %718 = vector.broadcast %cst_249 : f32 to vector<2x32xf32>
    %719 = arith.subf %718, %717 : vector<2x32xf32>
    %720 = math.exp %719 : vector<2x32xf32>
    %cst_250 = arith.constant 1.000000e+00 : f32
    %721 = vector.broadcast %cst_250 : f32 to vector<2x32xf32>
    %722 = arith.addf %721, %720 : vector<2x32xf32>
    %cst_251 = arith.constant 1.000000e+00 : f32
    %723 = vector.broadcast %cst_251 : f32 to vector<2x32xf32>
    %724 = arith.divf %723, %722 : vector<2x32xf32>
    %725 = arith.mulf %714, %625 : vector<2x32xf32>
    %726 = arith.mulf %706, %716 : vector<2x32xf32>
    %727 = arith.addf %725, %726 : vector<2x32xf32>
    %728 = math.tanh %727 : vector<2x32xf32>
    %729 = arith.mulf %724, %728 : vector<2x32xf32>
    %730 = vector.broadcast %691 : i32 to vector<2x1xi32>
    %731 = arith.cmpi slt, %730, %3 : vector<2x1xi32>
    %732 = vector.shape_cast %731 : vector<2x1xi1> to vector<2x1xi1>
    %733 = vector.broadcast %732 : vector<2x1xi1> to vector<2x32xi1>
    %734 = arith.select %733, %729, %622 : vector<2x32xi1>, vector<2x32xf32>
    %735 = vector.shape_cast %731 : vector<2x1xi1> to vector<2x1xi1>
    %736 = vector.broadcast %735 : vector<2x1xi1> to vector<2x32xi1>
    %737 = arith.select %736, %727, %625 : vector<2x32xi1>, vector<2x32xf32>
    %cst_252 = arith.constant 0.000000e+00 : f32
    %738 = vector.shape_cast %731 : vector<2x1xi1> to vector<2x1xi1>
    %739 = vector.broadcast %738 : vector<2x1xi1> to vector<2x32xi1>
    %740 = vector.broadcast %cst_252 : f32 to vector<2x32xf32>
    %741 = arith.select %739, %729, %740 : vector<2x32xi1>, vector<2x32xf32>
    %c6_253 = arith.constant 6 : index
    %c0_254 = arith.constant 0 : index
    %c0_255 = arith.constant 0 : index
    %742 = vector.load %arg10[%c6_253, %c0_254, %c0_255] : memref<8x2x32xf32, #tpu.memory_space<vmem>>, vector<1x2x32xf32>
    %743 = vector.shape_cast %742 : vector<1x2x32xf32> to vector<2x32xf32>
    %744 = vector.shape_cast %741 : vector<2x32xf32> to vector<1x2x32xf32>
    tpu.vector_store %arg10[%c6_253, %c0_254, %c0_255], %744 {strides = array<i32>} : memref<8x2x32xf32, #tpu.memory_space<vmem>>, vector<1x2x32xf32>,
    %c1_256 = arith.constant 1 : index
    %c0_257 = arith.constant 0 : index
    %c0_258 = arith.constant 0 : index
    %745 = vector.load %arg3[%c1_256, %c0_257, %c0_258] : memref<8x2x16xf32, #tpu.memory_space<vmem>>, vector<1x2x16xf32>
    %746 = vector.shape_cast %745 : vector<1x2x16xf32> to vector<2x16xf32>
    %c1_i32_259 = arith.constant 1 : i32
    %747 = arith.addi %16, %c1_i32_259 : i32
    %748 = arith.truncf %746 : vector<2x16xf32> to vector<2x16xbf16>
    %cst_260 = arith.constant dense<0.000000e+00> : vector<2x128xf32>
    %749 = tpu.matmul %748, %7, %cst_260 {dimension_numbers = #tpu.dot_dimension_numbers<[1], [0], [0], [1], [0, 0, 1, 1], [], []>} : vector<2x16xbf16>, vector<16x128xbf16>, vector<2x128xf32> -> vector<2x128xf32>
    %750 = arith.truncf %678 : vector<2x32xf32> to vector<2x32xbf16>
    %cst_261 = arith.constant dense<0.000000e+00> : vector<2x128xf32>
    %751 = tpu.matmul %750, %8, %cst_261 {dimension_numbers = #tpu.dot_dimension_numbers<[1], [0], [0], [1], [0, 0, 1, 1], [], []>} : vector<2x32xbf16>, vector<32x128xbf16>, vector<2x128xf32> -> vector<2x128xf32>
    %752 = arith.addf %749, %751 : vector<2x128xf32>
    %753 = vector.broadcast %9 : vector<1x128xf32> to vector<2x128xf32>
    %754 = arith.addf %752, %753 : vector<2x128xf32>
    %755 = vector.extract_strided_slice %754 {offsets = [0, 0], sizes = [2, 32], strides = [1, 1]} : vector<2x128xf32> to vector<2x32xf32>
    %cst_262 = arith.constant 0.000000e+00 : f32
    %756 = vector.broadcast %cst_262 : f32 to vector<2x32xf32>
    %757 = arith.subf %756, %755 : vector<2x32xf32>
    %758 = math.exp %757 : vector<2x32xf32>
    %cst_263 = arith.constant 1.000000e+00 : f32
    %759 = vector.broadcast %cst_263 : f32 to vector<2x32xf32>
    %760 = arith.addf %759, %758 : vector<2x32xf32>
    %cst_264 = arith.constant 1.000000e+00 : f32
    %761 = vector.broadcast %cst_264 : f32 to vector<2x32xf32>
    %762 = arith.divf %761, %760 : vector<2x32xf32>
    %763 = vector.extract_strided_slice %754 {offsets = [0, 32], sizes = [2, 32], strides = [1, 1]} : vector<2x128xf32> to vector<2x32xf32>
    %cst_265 = arith.constant 0.000000e+00 : f32
    %764 = vector.broadcast %cst_265 : f32 to vector<2x32xf32>
    %765 = arith.subf %764, %763 : vector<2x32xf32>
    %766 = math.exp %765 : vector<2x32xf32>
    %cst_266 = arith.constant 1.000000e+00 : f32
    %767 = vector.broadcast %cst_266 : f32 to vector<2x32xf32>
    %768 = arith.addf %767, %766 : vector<2x32xf32>
    %cst_267 = arith.constant 1.000000e+00 : f32
    %769 = vector.broadcast %cst_267 : f32 to vector<2x32xf32>
    %770 = arith.divf %769, %768 : vector<2x32xf32>
    %771 = vector.extract_strided_slice %754 {offsets = [0, 64], sizes = [2, 32], strides = [1, 1]} : vector<2x128xf32> to vector<2x32xf32>
    %772 = math.tanh %771 : vector<2x32xf32>
    %773 = vector.extract_strided_slice %754 {offsets = [0, 96], sizes = [2, 32], strides = [1, 1]} : vector<2x128xf32> to vector<2x32xf32>
    %cst_268 = arith.constant 0.000000e+00 : f32
    %774 = vector.broadcast %cst_268 : f32 to vector<2x32xf32>
    %775 = arith.subf %774, %773 : vector<2x32xf32>
    %776 = math.exp %775 : vector<2x32xf32>
    %cst_269 = arith.constant 1.000000e+00 : f32
    %777 = vector.broadcast %cst_269 : f32 to vector<2x32xf32>
    %778 = arith.addf %777, %776 : vector<2x32xf32>
    %cst_270 = arith.constant 1.000000e+00 : f32
    %779 = vector.broadcast %cst_270 : f32 to vector<2x32xf32>
    %780 = arith.divf %779, %778 : vector<2x32xf32>
    %781 = arith.mulf %770, %681 : vector<2x32xf32>
    %782 = arith.mulf %762, %772 : vector<2x32xf32>
    %783 = arith.addf %781, %782 : vector<2x32xf32>
    %784 = math.tanh %783 : vector<2x32xf32>
    %785 = arith.mulf %780, %784 : vector<2x32xf32>
    %786 = vector.broadcast %747 : i32 to vector<2x1xi32>
    %787 = arith.cmpi slt, %786, %3 : vector<2x1xi32>
    %788 = vector.shape_cast %787 : vector<2x1xi1> to vector<2x1xi1>
    %789 = vector.broadcast %788 : vector<2x1xi1> to vector<2x32xi1>
    %790 = arith.select %789, %785, %678 : vector<2x32xi1>, vector<2x32xf32>
    %791 = vector.shape_cast %787 : vector<2x1xi1> to vector<2x1xi1>
    %792 = vector.broadcast %791 : vector<2x1xi1> to vector<2x32xi1>
    %793 = arith.select %792, %783, %681 : vector<2x32xi1>, vector<2x32xf32>
    %cst_271 = arith.constant 0.000000e+00 : f32
    %794 = vector.shape_cast %787 : vector<2x1xi1> to vector<2x1xi1>
    %795 = vector.broadcast %794 : vector<2x1xi1> to vector<2x32xi1>
    %796 = vector.broadcast %cst_271 : f32 to vector<2x32xf32>
    %797 = arith.select %795, %785, %796 : vector<2x32xi1>, vector<2x32xf32>
    %c1_272 = arith.constant 1 : index
    %c0_273 = arith.constant 0 : index
    %c0_274 = arith.constant 0 : index
    %798 = vector.load %arg11[%c1_272, %c0_273, %c0_274] : memref<8x2x32xf32, #tpu.memory_space<vmem>>, vector<1x2x32xf32>
    %799 = vector.shape_cast %798 : vector<1x2x32xf32> to vector<2x32xf32>
    %800 = vector.shape_cast %797 : vector<2x32xf32> to vector<1x2x32xf32>
    tpu.vector_store %arg11[%c1_272, %c0_273, %c0_274], %800 {strides = array<i32>} : memref<8x2x32xf32, #tpu.memory_space<vmem>>, vector<1x2x32xf32>,
    %c7_275 = arith.constant 7 : index
    %c0_276 = arith.constant 0 : index
    %c0_277 = arith.constant 0 : index
    %801 = vector.load %arg2[%c7_275, %c0_276, %c0_277] : memref<8x2x16xf32, #tpu.memory_space<vmem>>, vector<1x2x16xf32>
    %802 = vector.shape_cast %801 : vector<1x2x16xf32> to vector<2x16xf32>
    %c7_i32_278 = arith.constant 7 : i32
    %803 = arith.addi %14, %c7_i32_278 : i32
    %804 = arith.truncf %802 : vector<2x16xf32> to vector<2x16xbf16>
    %cst_279 = arith.constant dense<0.000000e+00> : vector<2x128xf32>
    %805 = tpu.matmul %804, %4, %cst_279 {dimension_numbers = #tpu.dot_dimension_numbers<[1], [0], [0], [1], [0, 0, 1, 1], [], []>} : vector<2x16xbf16>, vector<16x128xbf16>, vector<2x128xf32> -> vector<2x128xf32>
    %806 = arith.truncf %734 : vector<2x32xf32> to vector<2x32xbf16>
    %cst_280 = arith.constant dense<0.000000e+00> : vector<2x128xf32>
    %807 = tpu.matmul %806, %5, %cst_280 {dimension_numbers = #tpu.dot_dimension_numbers<[1], [0], [0], [1], [0, 0, 1, 1], [], []>} : vector<2x32xbf16>, vector<32x128xbf16>, vector<2x128xf32> -> vector<2x128xf32>
    %808 = arith.addf %805, %807 : vector<2x128xf32>
    %809 = vector.broadcast %6 : vector<1x128xf32> to vector<2x128xf32>
    %810 = arith.addf %808, %809 : vector<2x128xf32>
    %811 = vector.extract_strided_slice %810 {offsets = [0, 0], sizes = [2, 32], strides = [1, 1]} : vector<2x128xf32> to vector<2x32xf32>
    %cst_281 = arith.constant 0.000000e+00 : f32
    %812 = vector.broadcast %cst_281 : f32 to vector<2x32xf32>
    %813 = arith.subf %812, %811 : vector<2x32xf32>
    %814 = math.exp %813 : vector<2x32xf32>
    %cst_282 = arith.constant 1.000000e+00 : f32
    %815 = vector.broadcast %cst_282 : f32 to vector<2x32xf32>
    %816 = arith.addf %815, %814 : vector<2x32xf32>
    %cst_283 = arith.constant 1.000000e+00 : f32
    %817 = vector.broadcast %cst_283 : f32 to vector<2x32xf32>
    %818 = arith.divf %817, %816 : vector<2x32xf32>
    %819 = vector.extract_strided_slice %810 {offsets = [0, 32], sizes = [2, 32], strides = [1, 1]} : vector<2x128xf32> to vector<2x32xf32>
    %cst_284 = arith.constant 0.000000e+00 : f32
    %820 = vector.broadcast %cst_284 : f32 to vector<2x32xf32>
    %821 = arith.subf %820, %819 : vector<2x32xf32>
    %822 = math.exp %821 : vector<2x32xf32>
    %cst_285 = arith.constant 1.000000e+00 : f32
    %823 = vector.broadcast %cst_285 : f32 to vector<2x32xf32>
    %824 = arith.addf %823, %822 : vector<2x32xf32>
    %cst_286 = arith.constant 1.000000e+00 : f32
    %825 = vector.broadcast %cst_286 : f32 to vector<2x32xf32>
    %826 = arith.divf %825, %824 : vector<2x32xf32>
    %827 = vector.extract_strided_slice %810 {offsets = [0, 64], sizes = [2, 32], strides = [1, 1]} : vector<2x128xf32> to vector<2x32xf32>
    %828 = math.tanh %827 : vector<2x32xf32>
    %829 = vector.extract_strided_slice %810 {offsets = [0, 96], sizes = [2, 32], strides = [1, 1]} : vector<2x128xf32> to vector<2x32xf32>
    %cst_287 = arith.constant 0.000000e+00 : f32
    %830 = vector.broadcast %cst_287 : f32 to vector<2x32xf32>
    %831 = arith.subf %830, %829 : vector<2x32xf32>
    %832 = math.exp %831 : vector<2x32xf32>
    %cst_288 = arith.constant 1.000000e+00 : f32
    %833 = vector.broadcast %cst_288 : f32 to vector<2x32xf32>
    %834 = arith.addf %833, %832 : vector<2x32xf32>
    %cst_289 = arith.constant 1.000000e+00 : f32
    %835 = vector.broadcast %cst_289 : f32 to vector<2x32xf32>
    %836 = arith.divf %835, %834 : vector<2x32xf32>
    %837 = arith.mulf %826, %737 : vector<2x32xf32>
    %838 = arith.mulf %818, %828 : vector<2x32xf32>
    %839 = arith.addf %837, %838 : vector<2x32xf32>
    %840 = math.tanh %839 : vector<2x32xf32>
    %841 = arith.mulf %836, %840 : vector<2x32xf32>
    %842 = vector.broadcast %803 : i32 to vector<2x1xi32>
    %843 = arith.cmpi slt, %842, %3 : vector<2x1xi32>
    %844 = vector.shape_cast %843 : vector<2x1xi1> to vector<2x1xi1>
    %845 = vector.broadcast %844 : vector<2x1xi1> to vector<2x32xi1>
    %846 = arith.select %845, %841, %734 : vector<2x32xi1>, vector<2x32xf32>
    %847 = vector.shape_cast %843 : vector<2x1xi1> to vector<2x1xi1>
    %848 = vector.broadcast %847 : vector<2x1xi1> to vector<2x32xi1>
    %849 = arith.select %848, %839, %737 : vector<2x32xi1>, vector<2x32xf32>
    %cst_290 = arith.constant 0.000000e+00 : f32
    %850 = vector.shape_cast %843 : vector<2x1xi1> to vector<2x1xi1>
    %851 = vector.broadcast %850 : vector<2x1xi1> to vector<2x32xi1>
    %852 = vector.broadcast %cst_290 : f32 to vector<2x32xf32>
    %853 = arith.select %851, %841, %852 : vector<2x32xi1>, vector<2x32xf32>
    %c7_291 = arith.constant 7 : index
    %c0_292 = arith.constant 0 : index
    %c0_293 = arith.constant 0 : index
    %854 = vector.load %arg10[%c7_291, %c0_292, %c0_293] : memref<8x2x32xf32, #tpu.memory_space<vmem>>, vector<1x2x32xf32>
    %855 = vector.shape_cast %854 : vector<1x2x32xf32> to vector<2x32xf32>
    %856 = vector.shape_cast %853 : vector<2x32xf32> to vector<1x2x32xf32>
    tpu.vector_store %arg10[%c7_291, %c0_292, %c0_293], %856 {strides = array<i32>} : memref<8x2x32xf32, #tpu.memory_space<vmem>>, vector<1x2x32xf32>,
    %c0_294 = arith.constant 0 : index
    %c0_295 = arith.constant 0 : index
    %c0_296 = arith.constant 0 : index
    %857 = vector.load %arg3[%c0_294, %c0_295, %c0_296] : memref<8x2x16xf32, #tpu.memory_space<vmem>>, vector<1x2x16xf32>
    %858 = vector.shape_cast %857 : vector<1x2x16xf32> to vector<2x16xf32>
    %c0_i32_297 = arith.constant 0 : i32
    %859 = arith.addi %16, %c0_i32_297 : i32
    %860 = arith.truncf %858 : vector<2x16xf32> to vector<2x16xbf16>
    %cst_298 = arith.constant dense<0.000000e+00> : vector<2x128xf32>
    %861 = tpu.matmul %860, %7, %cst_298 {dimension_numbers = #tpu.dot_dimension_numbers<[1], [0], [0], [1], [0, 0, 1, 1], [], []>} : vector<2x16xbf16>, vector<16x128xbf16>, vector<2x128xf32> -> vector<2x128xf32>
    %862 = arith.truncf %790 : vector<2x32xf32> to vector<2x32xbf16>
    %cst_299 = arith.constant dense<0.000000e+00> : vector<2x128xf32>
    %863 = tpu.matmul %862, %8, %cst_299 {dimension_numbers = #tpu.dot_dimension_numbers<[1], [0], [0], [1], [0, 0, 1, 1], [], []>} : vector<2x32xbf16>, vector<32x128xbf16>, vector<2x128xf32> -> vector<2x128xf32>
    %864 = arith.addf %861, %863 : vector<2x128xf32>
    %865 = vector.broadcast %9 : vector<1x128xf32> to vector<2x128xf32>
    %866 = arith.addf %864, %865 : vector<2x128xf32>
    %867 = vector.extract_strided_slice %866 {offsets = [0, 0], sizes = [2, 32], strides = [1, 1]} : vector<2x128xf32> to vector<2x32xf32>
    %cst_300 = arith.constant 0.000000e+00 : f32
    %868 = vector.broadcast %cst_300 : f32 to vector<2x32xf32>
    %869 = arith.subf %868, %867 : vector<2x32xf32>
    %870 = math.exp %869 : vector<2x32xf32>
    %cst_301 = arith.constant 1.000000e+00 : f32
    %871 = vector.broadcast %cst_301 : f32 to vector<2x32xf32>
    %872 = arith.addf %871, %870 : vector<2x32xf32>
    %cst_302 = arith.constant 1.000000e+00 : f32
    %873 = vector.broadcast %cst_302 : f32 to vector<2x32xf32>
    %874 = arith.divf %873, %872 : vector<2x32xf32>
    %875 = vector.extract_strided_slice %866 {offsets = [0, 32], sizes = [2, 32], strides = [1, 1]} : vector<2x128xf32> to vector<2x32xf32>
    %cst_303 = arith.constant 0.000000e+00 : f32
    %876 = vector.broadcast %cst_303 : f32 to vector<2x32xf32>
    %877 = arith.subf %876, %875 : vector<2x32xf32>
    %878 = math.exp %877 : vector<2x32xf32>
    %cst_304 = arith.constant 1.000000e+00 : f32
    %879 = vector.broadcast %cst_304 : f32 to vector<2x32xf32>
    %880 = arith.addf %879, %878 : vector<2x32xf32>
    %cst_305 = arith.constant 1.000000e+00 : f32
    %881 = vector.broadcast %cst_305 : f32 to vector<2x32xf32>
    %882 = arith.divf %881, %880 : vector<2x32xf32>
    %883 = vector.extract_strided_slice %866 {offsets = [0, 64], sizes = [2, 32], strides = [1, 1]} : vector<2x128xf32> to vector<2x32xf32>
    %884 = math.tanh %883 : vector<2x32xf32>
    %885 = vector.extract_strided_slice %866 {offsets = [0, 96], sizes = [2, 32], strides = [1, 1]} : vector<2x128xf32> to vector<2x32xf32>
    %cst_306 = arith.constant 0.000000e+00 : f32
    %886 = vector.broadcast %cst_306 : f32 to vector<2x32xf32>
    %887 = arith.subf %886, %885 : vector<2x32xf32>
    %888 = math.exp %887 : vector<2x32xf32>
    %cst_307 = arith.constant 1.000000e+00 : f32
    %889 = vector.broadcast %cst_307 : f32 to vector<2x32xf32>
    %890 = arith.addf %889, %888 : vector<2x32xf32>
    %cst_308 = arith.constant 1.000000e+00 : f32
    %891 = vector.broadcast %cst_308 : f32 to vector<2x32xf32>
    %892 = arith.divf %891, %890 : vector<2x32xf32>
    %893 = arith.mulf %882, %793 : vector<2x32xf32>
    %894 = arith.mulf %874, %884 : vector<2x32xf32>
    %895 = arith.addf %893, %894 : vector<2x32xf32>
    %896 = math.tanh %895 : vector<2x32xf32>
    %897 = arith.mulf %892, %896 : vector<2x32xf32>
    %898 = vector.broadcast %859 : i32 to vector<2x1xi32>
    %899 = arith.cmpi slt, %898, %3 : vector<2x1xi32>
    %900 = vector.shape_cast %899 : vector<2x1xi1> to vector<2x1xi1>
    %901 = vector.broadcast %900 : vector<2x1xi1> to vector<2x32xi1>
    %902 = arith.select %901, %897, %790 : vector<2x32xi1>, vector<2x32xf32>
    %903 = vector.shape_cast %899 : vector<2x1xi1> to vector<2x1xi1>
    %904 = vector.broadcast %903 : vector<2x1xi1> to vector<2x32xi1>
    %905 = arith.select %904, %895, %793 : vector<2x32xi1>, vector<2x32xf32>
    %cst_309 = arith.constant 0.000000e+00 : f32
    %906 = vector.shape_cast %899 : vector<2x1xi1> to vector<2x1xi1>
    %907 = vector.broadcast %906 : vector<2x1xi1> to vector<2x32xi1>
    %908 = vector.broadcast %cst_309 : f32 to vector<2x32xf32>
    %909 = arith.select %907, %897, %908 : vector<2x32xi1>, vector<2x32xf32>
    %c0_310 = arith.constant 0 : index
    %c0_311 = arith.constant 0 : index
    %c0_312 = arith.constant 0 : index
    %910 = vector.load %arg11[%c0_310, %c0_311, %c0_312] : memref<8x2x32xf32, #tpu.memory_space<vmem>>, vector<1x2x32xf32>
    %911 = vector.shape_cast %910 : vector<1x2x32xf32> to vector<2x32xf32>
    %912 = vector.shape_cast %909 : vector<2x32xf32> to vector<1x2x32xf32>
    tpu.vector_store %arg11[%c0_310, %c0_311, %c0_312], %912 {strides = array<i32>} : memref<8x2x32xf32, #tpu.memory_space<vmem>>, vector<1x2x32xf32>,
    %c0_313 = arith.constant 0 : index
    %c0_314 = arith.constant 0 : index
    %913 = vector.load %arg12[%c0_313, %c0_314] : memref<2x32xf32, #tpu.memory_space<vmem>>, vector<2x32xf32>
    tpu.vector_store %arg12[%c0_313, %c0_314], %846 {strides = array<i32>} : memref<2x32xf32, #tpu.memory_space<vmem>>, vector<2x32xf32>,
    %c0_315 = arith.constant 0 : index
    %c0_316 = arith.constant 0 : index
    %914 = vector.load %arg13[%c0_315, %c0_316] : memref<2x32xf32, #tpu.memory_space<vmem>>, vector<2x32xf32>
    tpu.vector_store %arg13[%c0_315, %c0_316], %849 {strides = array<i32>} : memref<2x32xf32, #tpu.memory_space<vmem>>, vector<2x32xf32>,
    %c0_317 = arith.constant 0 : index
    %c0_318 = arith.constant 0 : index
    %915 = vector.load %arg14[%c0_317, %c0_318] : memref<2x32xf32, #tpu.memory_space<vmem>>, vector<2x32xf32>
    tpu.vector_store %arg14[%c0_317, %c0_318], %902 {strides = array<i32>} : memref<2x32xf32, #tpu.memory_space<vmem>>, vector<2x32xf32>,
    %c0_319 = arith.constant 0 : index
    %c0_320 = arith.constant 0 : index
    %916 = vector.load %arg15[%c0_319, %c0_320] : memref<2x32xf32, #tpu.memory_space<vmem>>, vector<2x32xf32>
    tpu.vector_store %arg15[%c0_319, %c0_320], %905 {strides = array<i32>} : memref<2x32xf32, #tpu.memory_space<vmem>>, vector<2x32xf32>,
    return
  }
  func.func @transform_0(%arg0: i32) -> (i32, i32) {
    %c0_i32 = arith.constant 0 : i32
    %c0_i32_0 = arith.constant 0 : i32
    %c0_i32_1 = arith.constant 0 : i32
    return %c0_i32, %c0_i32_0 : i32, i32
  }
  func.func @transform_1(%arg0: i32) -> (i32, i32, i32) {
    %c0_i32 = arith.constant 0 : i32
    %c0_i32_0 = arith.constant 0 : i32
    %c0_i32_1 = arith.constant 0 : i32
    return %arg0, %c0_i32, %c0_i32_0 : i32, i32, i32
  }
  func.func @transform_2(%arg0: i32) -> (i32, i32, i32) {
    %c0_i32 = arith.constant 0 : i32
    %0 = arith.subi %c0_i32, %arg0 : i32
    %c0_i32_0 = arith.constant 0 : i32
    %c0_i32_1 = arith.constant 0 : i32
    %c0_i32_2 = arith.constant 0 : i32
    return %0, %c0_i32_0, %c0_i32_1 : i32, i32, i32
  }
  func.func @transform_3(%arg0: i32) -> (i32, i32) {
    %c0_i32 = arith.constant 0 : i32
    %c0_i32_0 = arith.constant 0 : i32
    %c0_i32_1 = arith.constant 0 : i32
    return %c0_i32, %c0_i32_0 : i32, i32
  }
  func.func @transform_4(%arg0: i32) -> (i32, i32) {
    %c0_i32 = arith.constant 0 : i32
    %c0_i32_0 = arith.constant 0 : i32
    %c0_i32_1 = arith.constant 0 : i32
    return %c0_i32, %c0_i32_0 : i32, i32
  }
  func.func @transform_5(%arg0: i32) -> (i32, i32) {
    %c0_i32 = arith.constant 0 : i32
    %c0_i32_0 = arith.constant 0 : i32
    %c0_i32_1 = arith.constant 0 : i32
    return %c0_i32, %c0_i32_0 : i32, i32
  }
  func.func @transform_6(%arg0: i32) -> (i32, i32) {
    %c0_i32 = arith.constant 0 : i32
    %c0_i32_0 = arith.constant 0 : i32
    %c0_i32_1 = arith.constant 0 : i32
    return %c0_i32, %c0_i32_0 : i32, i32
  }
  func.func @transform_7(%arg0: i32) -> (i32, i32) {
    %c0_i32 = arith.constant 0 : i32
    %c0_i32_0 = arith.constant 0 : i32
    %c0_i32_1 = arith.constant 0 : i32
    return %c0_i32, %c0_i32_0 : i32, i32
  }
  func.func @transform_8(%arg0: i32) -> (i32, i32) {
    %c0_i32 = arith.constant 0 : i32
    %c0_i32_0 = arith.constant 0 : i32
    %c0_i32_1 = arith.constant 0 : i32
    return %c0_i32, %c0_i32_0 : i32, i32
  }
  func.func @transform_9(%arg0: i32) -> (i32, i32, i32) {
    %c0_i32 = arith.constant 0 : i32
    %c0_i32_0 = arith.constant 0 : i32
    %c0_i32_1 = arith.constant 0 : i32
    return %arg0, %c0_i32, %c0_i32_0 : i32, i32, i32
  }
  func.func @transform_10(%arg0: i32) -> (i32, i32, i32) {
    %c0_i32 = arith.constant 0 : i32
    %0 = arith.subi %c0_i32, %arg0 : i32
    %c0_i32_0 = arith.constant 0 : i32
    %c0_i32_1 = arith.constant 0 : i32
    %c0_i32_2 = arith.constant 0 : i32
    return %0, %c0_i32_0, %c0_i32_1 : i32, i32, i32
  }
}

</mosaic_0001>

<bundles_post_ra>
// kernel: tpu_custom_call.1
= control target key start
LH: loop header
LB: loop body
LE: loop exit
PB: predicated region body
PF: predicated region fallthrough
CT: control target
= control target key end

     0   :  { %16 = vsyncpa [#allocation7], 0  ;;  %s4013_s0 = inlined_call_operand.vmem [shape: s32[2,1], index: 0, kind: input, shape index: {}]   ;;  %s4014_s1 = inlined_call_operand.hbm [shape: f32[8,2,16], index: 1, kind: input, shape index: {}]   ;;  %s4015_s2 = inlined_call_operand.hbm [shape: f32[8,2,16], index: 2, kind: input, shape index: {}]   ;;  %s4016_s3 = inlined_call_operand.vmem [shape: bf16[16,128], index: 3, kind: input, shape index: {}]   ;;  %s4017_s4 = inlined_call_operand.hbm [shape: bf16[32,128], index: 4, kind: input, shape index: {}]   ;;  %s4018_s5 = inlined_call_operand.vmem [shape: f32[1,128], index: 5, kind: input, shape index: {}]   ;;  %s4019_s6 = inlined_call_operand.hbm [shape: bf16[16,128], index: 6, kind: input, shape index: {}]   ;;  %s4020_s7 = inlined_call_operand.hbm [shape: bf16[32,128], index: 7, kind: input, shape index: {}]   ;;  %s4021_s8 = inlined_call_operand.vmem [shape: f32[1,128], index: 8, kind: input, shape index: {}]   ;;  %s4022_s9 = inlined_call_operand.hbm [shape: f32[8,2,32], index: 9, kind: output, shape index: {0}]   ;;  %s4023_s10 = inlined_call_operand.hbm [shape: f32[8,2,32], index: 10, kind: output, shape index: {1}]  }
   0x1   :  { %17 = vsyncpa [#allocation10], 0 }
   0x2   :  { %18 = vsyncpa [#allocation13], 0 }
   0x3   :  { %19 = vsyncpa [#allocation8], 0 }
   0x4   :  { %20 = vsyncpa [#allocation17], 0  ;;  %s3091_s13 = smov [#allocation9]  }
   0x5   :  { %s44_s14 = sshll.u32 %s3091_s13, 4  ;;  %s45_s14 = int_to_ptr.vmem [resolvable:$true] %s44_s14 }
   0x6   :  { %s2949_s15 = scalar_lea.vmem %s45_s14, 256  ;;  %p2954_p1 = scmp.lt.s32.totalorder %s45_s14, %s45_s14 }
   0x7   :  { %p2950_p0 = scmp.ne.s32.totalorder %s45_s14, %s2949_s15  ;;  %p2955_p2 = scmp.lt.s32.totalorder %s2949_s15, %s2949_s15 }
   0x9   :  { %p2956_p3 = por %p2955_p2, %p2954_p1 }
   0xb   :  { %p2957_p4 = pnand %p2956_p3, %p2950_p0 }
   0xd   :  { %2960 = shalt.err (!%p2957_p4)
}
   0xe   :  { %s3092_s16 = smov 32   ;;  %s3093_s17 = smov 2  }
   0xf   :  { %50 = dma.hbm_to_vmem [thread:$0]  %s4015_s2, 256, %s45_s14, [#allocation10], %s3092_s16, %s3092_s16, %s3093_s17  }
  0x10   :  { %s3094_s20 = smov [#allocation12]   ;;  %s3095_s22 = smov [#allocation6]  }
  0x11   :  { %s72_s21 = sshll.u32 %s3094_s20, 4  ;;  %s28_s23 = sshll.u32 %s3095_s22, 4  ;;  %s73_s21 = int_to_ptr.vmem [resolvable:$true] %s72_s21  ;;  %s29_s23 = int_to_ptr.vmem [resolvable:$true] %s28_s23 }
  0x12   :  { %s2969_s24 = scalar_lea.vmem %s73_s21, 128  ;;  %p2974_p6 = scmp.lt.s32.totalorder %s73_s21, %s73_s21 }
  0x13   :  { %p2970_p5 = scmp.ne.s32.totalorder %s73_s21, %s2969_s24  ;;  %p2975_p7 = scmp.lt.s32.totalorder %s2969_s24, %s2969_s24 }
  0x15   :  { %p2976_p8 = por %p2975_p7, %p2974_p6 }
  0x17   :  { %p2977_p9 = pnand %p2976_p8, %p2970_p5 }
  0x19   :  { %2980 = shalt.err (!%p2977_p9)
}
  0x1a   :  { %s3096_s25 = smov 64   ;;  %s3097_s26 = smov 4  }
  0x1b   :  { %78 = dma.hbm_to_vmem [thread:$0]  %s4019_s6, 128, %s73_s21, [#allocation13], %s3096_s25, %s3096_s25, %s3097_s26  }
  0x1c   :  { %s2989_s2 = scalar_lea.vmem %s29_s23, 256  ;;  %p2994_p11 = scmp.lt.s32.totalorder %s29_s23, %s29_s23 }
  0x1d   :  { %p2990_p10 = scmp.ne.s32.totalorder %s29_s23, %s2989_s2  ;;  %p2995_p12 = scmp.lt.s32.totalorder %s2989_s2, %s2989_s2 }
  0x1f   :  { %p2996_p13 = por %p2995_p12, %p2994_p11 }
  0x21   :  { %p2997_p0 = pnand %p2996_p13, %p2990_p10 }
  0x23   :  { %3000 = shalt.err (!%p2997_p0)
}
  0x24   :  { %34 = dma.hbm_to_vmem [thread:$0]  %s4014_s1, 256, %s29_s23, [#allocation7], %s3092_s16, %s3092_s16, %s3093_s17  }
  0x25   :  { %s3098_s11 = smov [#allocation11]   ;;  %s3099_s13 = smov [#allocation14]  }
  0x26   :  { %s58_s12 = sshll.u32 %s3098_s11, 4  ;;  %s84_s6 = sshll.u32 %s3099_s13, 4  ;;  %s59_s12 = int_to_ptr.vmem [resolvable:$true] %s58_s12  ;;  %s85_s6 = int_to_ptr.vmem [resolvable:$true] %s84_s6 }
  0x27   :  { %s3009_s14 = scalar_lea.vmem %s59_s12, 256  ;;  %p3014_p2 = scmp.lt.s32.totalorder %s59_s12, %s59_s12 }
  0x28   :  { %p3010_p1 = scmp.ne.s32.totalorder %s59_s12, %s3009_s14  ;;  %p3015_p3 = scmp.lt.s32.totalorder %s3009_s14, %s3009_s14 }
  0x2a   :  { %p3016_p4 = por %p3015_p3, %p3014_p2 }
  0x2c   :  { %p3017_p5 = pnand %p3016_p4, %p3010_p1 }
  0x2e   :  { %3020 = shalt.err (!%p3017_p5)
}
  0x2f   :  { %64 = dma.hbm_to_vmem [thread:$0]  %s4017_s4, 256, %s59_s12, [#allocation10], %s3096_s25, %s3096_s25, %s3097_s26  }
  0x30   :  { %s3029_s1 = scalar_lea.vmem %s85_s6, 256  ;;  %p3034_p7 = scmp.lt.s32.totalorder %s85_s6, %s85_s6 }
  0x31   :  { %p3030_p6 = scmp.ne.s32.totalorder %s85_s6, %s3029_s1  ;;  %p3035_p8 = scmp.lt.s32.totalorder %s3029_s1, %s3029_s1 }
  0x33   :  { %p3036_p9 = por %p3035_p8, %p3034_p7 }
  0x35   :  { %p3037_p10 = pnand %p3036_p9, %p3030_p6 }
  0x37   :  { %3040 = shalt.err (!%p3037_p10)
}
  0x38   :  { %90 = dma.hbm_to_vmem [thread:$0]  %s4020_s7, 256, %s85_s6, [#allocation13], %s3096_s25, %s3096_s25, %s3097_s26  }
  0x39   :  { %3081 = dma.done.wait [#allocation7], 256  }
  0x3a   :  { %3082 = vsyncadd [#allocation7], 4294967040 }
  0x3b   :  { %3083 = dma.done.wait [#allocation10], 512  }
  0x3c   :  { %3084 = vsyncadd [#allocation10], 4294966784 }
  0x3d   :  { %3085 = dma.done.wait [#allocation13], 384  }
  0x3e   :  { %3086 = vsyncadd [#allocation13], 4294966912  ;;  %vm4024_vm0 = vcmask 254976   ;;  %v3100_v0 = vmov 0.0   ;;  %vm3101_vm1 = vmmov 0   ;;  %v3205_v1 = vld [vmem:[#allocation11 + $0x8] sm:$0xff]  }
  0x3f   :  { %2558 = vmatprep.subr.bf16.mxu0 %v3100_v0  ;;  %2566 = vmatprep.subr.bf16.mxu1 %v3100_v0  ;;  %118 = vst.msk [vmem:[#allocation2] sm:$0x3] %vm4024_vm0, %v3100_v0  ;;  %119 = vst.msk [vmem:[#allocation3] sm:$0x3] %vm4024_vm0, %v3100_v0  ;;  %v3210_v2 = vld [vmem:[%s4016_s3] sm:$0xff]   ;;  %vm209_vm2 = vcmask 130048  }
  0x40   :  { %120 = vst.msk [vmem:[#allocation4] sm:$0x3] %vm4024_vm0, %v3100_v0  ;;  %121 = vst.msk [vmem:[#allocation5] sm:$0x3] %vm4024_vm0, %v3100_v0  ;;  %2568 = vmatprep.mubr.msk.bf16.mxu1 %vm3101_vm1, %v3100_v0  ;;  %2562 = vmatprep.mubr.msk.bf16.mxu0 %vm3101_vm1, %v3100_v0  ;;  %v144_v3 = vld [vmem:[#allocation6] sm:$0x3] }
  0x41   :  { %2559 = vmatpush3.bf16.msra.mxu0 %v3205_v1  ;;  %2567 = vmatpush3.bf16.msra.mxu1 %v3210_v2  ;;  %v145_v4 = vpack.c.bf16 %v144_v3, %v144_v3  ;;  %v3215_v5 = vld [vmem:[#allocation11] sm:$0xff]   ;;  %vm159_vm3 = vcmask 261120   ;;  %v3226_v9 = vld [vmem:[#allocation12] sm:$0xff]   ;;  %v3229_v10 = vld [vmem:[#allocation14] sm:$0xff]   ;;  %v3102_v16 = vmov 0  }
  0x42   :  { %2560 = vmatprep.subr.bf16.mxu0 %v3100_v0  ;;  %2572 = vmatprep.subr.bf16.mxu1 %v3100_v0  ;;  %v3218_v6 = vld [vmem:[#allocation14 + $0x8] sm:$0xff]   ;;  %v309_v14 = vld [vmem:[#allocation9 + $0xe] sm:$0x3]  ;;  %v3264_v19 = vld [vmem:[%s4018_s5] ss:$0 sm:$0xff] }
  0x43   :  { %v311_v15 = vpack.c.bf16 %v309_v14, %v309_v14  ;;  %2797 = vset.pattern.permute.xlu0 %v3102_v16  ;;  %2798 = vset.pattern.permute.xlu1 %v3102_v16  ;;  %v3270_v30 = vld [vmem:[%s4021_s8] ss:$0 sm:$0xff] }
  0x44   :  { %2569 = vmatmul.mubr.msk.bf16.vlgmr.msra.gmra.mxu1 %vm209_vm2, %v145_v4  ;;  %v3277_v41 = vld [vmem:[%s4013_s0] sm:$0x3]  ;;  %s3103_s0 = smov 96  }
  0x45   :  { %2561 = vmatpush3.bf16.msra.mxu0 %v3215_v5  ;;  %2573 = vmatpush3.bf16.msra.mxu1 %v3218_v6  ;;  %vm2428_vm4 = vcmp.gt.s32.totalorder %v3277_v41, 0  ;;  %vm2435_vm5 = vcmp.gt.s32.totalorder %v3277_v41, 7  ;;  %vm2438_vm8 = vcmp.gt.s32.totalorder %v3277_v41, 1  ;;  %vm2441_vm9 = vcmp.gt.s32.totalorder %v3277_v41, 6 }
  0x46   :  { %v3220_v7 = vld [vmem:[#allocation2] sm:$0x3]  ;;  %2580 = vmatprep.subr.bf16.mxu0 %v3100_v0  ;;  %v138_v12 = vld [vmem:[#allocation3] sm:$0x3]  ;;  %2574 = vmatprep.subr.bf16.mxu1 %v3100_v0  ;;  %v3283_v43 = vsel %vm2428_vm4, 1, %v3102_v16  ;;  %v3288_v44 = vsel %vm2435_vm5, 1, %v3102_v16 }
  0x47   :  { %v146_v8 = vpack.c.bf16 %v3220_v7, %v3220_v7  ;;  %v3232_v11 = vld [vmem:[#allocation4] sm:$0x3]  ;;  %2576 = vmatprep.mubr.msk.bf16.mxu1 %vm3101_vm1, %v3100_v0  ;;  %268 = vrot.lane.b32.xlu1 %v138_v12, %s3092_s16  ;;  %v140_v42 = vld [vmem:[#allocation5] sm:$0x3]  ;;  %v473_v12 = vld [vmem:[#allocation6 + $0x2] sm:$0x3] }
  0x48   :  { %v312_v13 = vpack.c.bf16 %v3232_v11, %v3232_v11  ;;  %vm2444_vm12 = vcmp.gt.s32.totalorder %v3277_v41, 2  ;;  %vm2447_vm13 = vcmp.gt.s32.totalorder %v3277_v41, 5  ;;  %vm2450_vm4 = vcmp.gt.s32.totalorder %v3277_v41, 3 }
  0x49   :  { %2563 = vmatmul.mubr.msk.bf16.vlgmr.msra.gmra.mxu0 %vm159_vm3, %v146_v8  ;;  %2575 = vmatpush3.bf16.msra.mxu1 %v3229_v10  ;;  %vm2453_vm5 = vcmp.gt.s32.totalorder %v3277_v41, 4 }
  0x4a   :  { %2581 = vmatpush3.bf16.msra.mxu0 %v3226_v9  ;;  %2582 = vmatprep.mubr.msk.bf16.mxu0 %vm3101_vm1, %v3100_v0 }
  0x4b   :  { %2594 = vmatprep.subr.bf16.mxu0 %v3100_v0  ;;  %2586 = vmatprep.subr.bf16.mxu1 %v3100_v0 }
  0x4c   :  { %2577 = vmatmul.mubr.msk.bf16.vlgmr.msra.gmra.mxu1 %vm159_vm3, %v312_v13  ;;  %v475_v13 = vpack.c.bf16 %v473_v12, %v473_v12 }
  0x4d   :  { %2587 = vmatpush3.bf16.msra.mxu1 %v3205_v1  ;;  %2590 = vmatprep.mubr.msk.bf16.mxu1 %vm3101_vm1, %v3100_v0 }
  0x4e   :  { %2588 = vmatprep.subr.bf16.mxu1 %v3100_v0 }
  0x51   :  { %2583 = vmatmul.mubr.msk.bf16.vlgmr.msra.gmra.mxu0 %vm209_vm2, %v311_v15  ;;  %2589 = vmatpush3.bf16.msra.mxu1 %v3215_v5  ;;  %v608_v15 = vld [vmem:[#allocation9 + $0xc] sm:$0x3] }
  0x52   :  { %2595 = vmatpush3.bf16.msra.mxu0 %v3210_v2  ;;  %2596 = vmatprep.mubr.msk.bf16.mxu0 %vm3101_vm1, %v3100_v0 }
  0x53   :  { %2608 = vmatprep.subr.bf16.mxu0 %v3100_v0  ;;  %2600 = vmatprep.subr.bf16.mxu1 %v3100_v0 }
  0x59   :  { %2597 = vmatmul.mubr.msk.bf16.vlgmr.msra.gmra.mxu0 %vm209_vm2, %v475_v13 }
  0x5a   :  { %2609 = vmatpush3.bf16.msra.mxu0 %v3226_v9  ;;  %2610 = vmatprep.mubr.msk.bf16.mxu0 %vm3101_vm1, %v3100_v0 }
  0x5b   :  { %2622 = vmatprep.subr.bf16.mxu0 %v3100_v0 }
  0xb9   :  { %v3295_v59 = vpop.permute.xlu1 %268 }
 0x104   :  { %v247_v17 = vpop.f32.mrf.mxu1 }
 0x106   :  { %v2570_v18 = vpop.f32.mrf.mxu1 }
 0x108   :  { %v250_v22 = vpop.f32.mrf.mxu1 }
 0x109   :  { %v197_v20 = vpop.f32.mrf.mxu0 }
 0x10a   :  { %v248_v21 = vadd.f32 %v247_v17, %v197_v20  ;;  %v2571_v25 = vpop.f32.mrf.mxu1  ;;  %v610_v17 = vpack.c.bf16 %v608_v15, %v608_v15 }
 0x10b   :  { %v2564_v23 = vpop.f32.mrf.mxu0 }
 0x10c   :  { %v259_v24 = vadd.f32 %v3264_v19, %v248_v21  ;;  %v362_v27 = vpop.f32.mrf.mxu1  ;;  %2611 = vmatmul.mubr.msk.bf16.vlgmr.msra.gmra.mxu0 %vm209_vm2, %v610_v17 }
 0x10d   :  { %v200_v26 = vpop.f32.mrf.mxu0  ;;  %2623 = vmatpush3.bf16.msra.mxu0 %v3210_v2  ;;  %2624 = vmatprep.mubr.msk.bf16.mxu0 %vm3101_vm1, %v3100_v0 }
 0x10e   :  { %2805 = vtanh.f32 %v259_v24  ;;  %v2578_v29 = vpop.f32.mrf.mxu1  ;;  %v260_v45 = vsub.f32 0.0, %v259_v24  ;;  %2636 = vmatprep.subr.bf16.mxu0 %v3100_v0 }
 0x10f   :  { %v2565_v28 = vpop.f32.mrf.mxu0 }
 0x110   :  { %v365_v32 = vpop.f32.mrf.mxu1  ;;  %v261_v46 = vmul.f32 1.442695, %v260_v45 }
 0x111   :  { %v411_v31 = vpop.f32.mrf.mxu0 }
 0x112   :  { %v412_v33 = vadd.f32 %v411_v31, %v362_v27  ;;  %v2579_v36 = vpop.f32.mrf.mxu1 }
 0x113   :  { %v2584_v34 = vpop.f32.mrf.mxu0 }
 0x114   :  { %v423_v35 = vadd.f32 %v3270_v30, %v412_v33 }
 0x115   :  { %v414_v37 = vpop.f32.mrf.mxu0 }
 0x116   :  { %2807 = vtanh.f32 %v423_v35  ;;  %v424_v47 = vsub.f32 0.0, %v423_v35 }
 0x117   :  { %v2585_v38 = vpop.f32.mrf.mxu0  ;;  %2809 = vpow2.f32 %v261_v46 }
 0x118   :  { %v425_v48 = vmul.f32 1.442695, %v424_v47 }
 0x119   :  { %v560_v31 = vpop.f32.mrf.mxu0 }
 0x11a   :  { %2811 = vpow2.f32 %v425_v48 }
 0x11b   :  { %v2806_v39 = vpop.eup %2805  ;;  %v2598_v32 = vpop.f32.mrf.mxu0 }
 0x11c   :  { %273 = vrot.lane.b32.xlu0 %v2806_v39, %s3096_s25 }
 0x11d   :  { %v563_v33 = vpop.f32.mrf.mxu0 }
 0x11f   :  { %v2599_v34 = vpop.f32.mrf.mxu0 }
 0x123   :  { %v2808_v40 = vpop.eup %2807 }
 0x124   :  { %437 = vrot.lane.b32.xlu0 %v2808_v40, %s3096_s25  ;;  %v2810_v49 = vpop.eup %2809 }
 0x125   :  { %v263_v50 = vadd.f32 1.0, %v2810_v49 }
 0x127   :  { %2813 = vrcp.f32 %v263_v50  ;;  %v2812_v51 = vpop.eup %2811 }
 0x128   :  { %432 = vrot.lane.b32.xlu0 %v140_v42, %s3092_s16  ;;  %v427_v52 = vadd.f32 1.0, %v2812_v51 }
 0x12a   :  { %2815 = vrcp.f32 %v427_v52 }
 0x12c   :  { %292 = vperm.xlu0 %2797, %v3283_v43  }
 0x130   :  { %456 = vperm.xlu0 %2797, %v3288_v44  }
 0x134   :  { %v2814_v53 = vpop.eup %2813  ;;  %460 = vrot.lane.b32.xlu0 %v3232_v11, %s3103_s0 }
 0x135   :  { %v271_v60 = vmul.f32 %v2814_v53, %v3295_v59 }
 0x137   :  { %v2816_v56 = vpop.eup %2815 }
 0x18e   :  { %v274_v54 = vpop.permute.xlu0 %273 }
 0x18f   :  { %v276_v55 = vmul.f32 %v2814_v53, %v274_v54 }
 0x191   :  { %278 = vrot.lane.b32.xlu1 %v276_v55, %s3092_s16 }
 0x196   :  { %v438_v57 = vpop.permute.xlu0 %437 }
 0x197   :  { %v440_v58 = vmul.f32 %v2816_v56, %v438_v57 }
 0x199   :  { %442 = vrot.lane.b32.xlu1 %v440_v58, %s3092_s16 }
 0x19a   :  { %v3301_v63 = vpop.permute.xlu0 %432 }
 0x19b   :  { %v435_v3 = vmul.f32 %v2816_v56, %v3301_v63 }
 0x1cc   :  { %v695_v37 = vpop.f32.mrf.mxu0 }
 0x1ce   :  { %v2612_v38 = vpop.f32.mrf.mxu0 }
 0x1d0   :  { %v698_v39 = vpop.f32.mrf.mxu0 }
 0x1d2   :  { %v2613_v40 = vpop.f32.mrf.mxu0 }
 0x203   :  { %v279_v61 = vpop.permute.xlu1 %278 }
 0x204   :  { %v3298_v62 = vadd.f32 %v279_v61, %v271_v60 }
 0x206   :  { %2817 = vtanh.f32 %v3298_v62 }
 0x20b   :  { %v443_v4 = vpop.permute.xlu1 %442 }
 0x20c   :  { %v3304_v8 = vadd.f32 %v443_v4, %v435_v3 }
 0x20e   :  { %2819 = vtanh.f32 %v3304_v8 }
 0x213   :  { %v2818_v11 = vpop.eup %2817 }
 0x214   :  { %284 = vrot.lane.b32.xlu1 %v2818_v11, %s3096_s25 }
 0x218   :  { %296 = vrot.lane.b32.xlu1 %v3220_v7, %s3103_s0  ;;  %v3320_v7 = vpop.permute.xlu0 %292 }
 0x219   :  { %vm294_vm6 = vcmp.eq.s32.totalorder %v3320_v7, 1 }
 0x21b   :  { %v2820_v14 = vpop.eup %2819 }
 0x21c   :  { %448 = vrot.lane.b32.xlu1 %v2820_v14, %s3096_s25  ;;  %v3326_v21 = vpop.permute.xlu0 %456 }
 0x21d   :  { %vm458_vm7 = vcmp.eq.s32.totalorder %v3326_v21, 1 }
 0x21e   :  { %v3391_v34 = vsel %vm458_vm7, %v3304_v8, %v3301_v63  ;;  %v878_v8 = vld [vmem:[#allocation9 + $0xa] sm:$0x3] }
 0x21f   :  { %v880_v39 = vpack.c.bf16 %v878_v8, %v878_v8 }
 0x220   :  { %v461_v26 = vpop.permute.xlu0 %460 }
 0x286   :  { %v285_v18 = vpop.permute.xlu1 %284 }
 0x287   :  { %v3323_v20 = vmul.f32 %v2814_v53, %v285_v18  ;;  %v3368_v18 = vsel %vm2438_vm8, 1, %v3102_v16 }
 0x28a   :  { %v297_v22 = vpop.permute.xlu1 %296 }
 0x28b   :  { %v3331_v23 = vsel %vm294_vm6, %v3323_v20, %v297_v22 }
 0x28c   :  { %v476_v24 = vpack.c.bf16 %v3331_v23, %v3331_v23 }
 0x28e   :  { %478 = vrot.lane.b32.xlu1 %v476_v24, %s3092_s16  ;;  %v449_v25 = vpop.permute.xlu1 %448 }
 0x28f   :  { %v3336_v27 = vmul.f32 %v2816_v56, %v449_v25  ;;  %v3373_v25 = vsel %vm2441_vm9, 1, %v3102_v16 }
 0x291   :  { %v3342_v28 = vsel %vm458_vm7, %v3336_v27, %v461_v26  ;;  %v465_v7 = vsel %vm458_vm7, %v3336_v27, 0.0 }
 0x292   :  { %v611_v29 = vpack.c.bf16 %v3342_v28, %v3342_v28 }
 0x294   :  { %613 = vrot.lane.b32.xlu0 %v611_v29, %s3092_s16  ;;  %v3381_v29 = vsel %vm294_vm6, %v3298_v62, %v3295_v59  ;;  %v743_v62 = vld [vmem:[#allocation6 + $0x4] sm:$0x3] }
 0x295   :  { %v745_v38 = vpack.c.bf16 %v743_v62, %v743_v62 }
 0x297   :  { %2625 = vmatmul.mubr.msk.bf16.vlgmr.msra.gmra.mxu0 %vm209_vm2, %v745_v38 }
 0x298   :  { %2637 = vmatpush3.bf16.msra.mxu0 %v3226_v9  ;;  %2638 = vmatprep.mubr.msk.bf16.mxu0 %vm3101_vm1, %v3100_v0 }
 0x299   :  { %2650 = vmatprep.subr.bf16.mxu0 %v3100_v0 }
 0x29f   :  { %2639 = vmatmul.mubr.msk.bf16.vlgmr.msra.gmra.mxu0 %vm209_vm2, %v880_v39 }
 0x2a0   :  { %2651 = vmatpush3.bf16.msra.mxu0 %v3210_v2  ;;  %2652 = vmatprep.mubr.msk.bf16.mxu0 %vm3101_vm1, %v3100_v0 }
 0x2a1   :  { %2664 = vmatprep.subr.bf16.mxu0 %v3100_v0 }
 0x300   :  { %v479_v35 = vpop.permute.xlu1 %478 }
 0x301   :  { %2591 = vmatmul.mubr.msk.bf16.vlgmr.msra.gmra.mxu1 %vm159_vm3, %v479_v35 }
 0x302   :  { %2601 = vmatpush3.bf16.msra.mxu1 %v3218_v6  ;;  %2604 = vmatprep.mubr.msk.bf16.mxu1 %vm3101_vm1, %v3100_v0 }
 0x303   :  { %2602 = vmatprep.subr.bf16.mxu1 %v3100_v0 }
 0x306   :  { %2603 = vmatpush3.bf16.msra.mxu1 %v3229_v10  ;;  %v614_v36 = vpop.permute.xlu0 %613 }
 0x307   :  { %2614 = vmatprep.subr.bf16.mxu1 %v3100_v0 }
 0x309   :  { %2605 = vmatmul.mubr.msk.bf16.vlgmr.msra.gmra.mxu1 %vm159_vm3, %v614_v36 }
 0x30a   :  { %2615 = vmatpush3.bf16.msra.mxu1 %v3205_v1  ;;  %2618 = vmatprep.mubr.msk.bf16.mxu1 %vm3101_vm1, %v3100_v0 }
 0x30b   :  { %2616 = vmatprep.subr.bf16.mxu1 %v3100_v0 }
 0x30e   :  { %2617 = vmatpush3.bf16.msra.mxu1 %v3215_v5 }
 0x30f   :  { %2628 = vmatprep.subr.bf16.mxu1 %v3100_v0 }
 0x3c1   :  { %v517_v42 = vpop.f32.mrf.mxu1 }
 0x3c2   :  { %v561_v45 = vadd.f32 %v560_v31, %v517_v42 }
 0x3c3   :  { %v2592_v46 = vpop.f32.mrf.mxu1 }
 0x3c4   :  { %v566_v47 = vadd.f32 %v3264_v19, %v561_v45 }
 0x3c5   :  { %v520_v48 = vpop.f32.mrf.mxu1 }
 0x3c6   :  { %2821 = vtanh.f32 %v566_v47  ;;  %v567_v58 = vsub.f32 0.0, %v566_v47 }
 0x3c7   :  { %v2593_v49 = vpop.f32.mrf.mxu1 }
 0x3c8   :  { %v568_v60 = vmul.f32 1.442695, %v567_v58 }
 0x3c9   :  { %v652_v50 = vpop.f32.mrf.mxu1 }
 0x3ca   :  { %v696_v51 = vadd.f32 %v695_v37, %v652_v50 }
 0x3cb   :  { %v2606_v52 = vpop.f32.mrf.mxu1 }
 0x3cc   :  { %v701_v53 = vadd.f32 %v3270_v30, %v696_v51  ;;  %v830_v52 = vpop.f32.mrf.mxu0 }
 0x3cd   :  { %v655_v54 = vpop.f32.mrf.mxu1 }
 0x3ce   :  { %2823 = vtanh.f32 %v701_v53  ;;  %v702_v61 = vsub.f32 0.0, %v701_v53  ;;  %v2626_v53 = vpop.f32.mrf.mxu0 }
 0x3cf   :  { %v2607_v55 = vpop.f32.mrf.mxu1  ;;  %2825 = vpow2.f32 %v568_v60 }
 0x3d0   :  { %v703_v3 = vmul.f32 1.442695, %v702_v61  ;;  %v833_v54 = vpop.f32.mrf.mxu0 }
 0x3d2   :  { %2827 = vpow2.f32 %v703_v3  ;;  %v2627_v55 = vpop.f32.mrf.mxu0 }
 0x3d3   :  { %v2822_v56 = vpop.eup %2821  ;;  %v3463_v55 = vsel %vm2447_vm13, 1, %v3102_v16 }
 0x3d4   :  { %576 = vrot.lane.b32.xlu1 %v2822_v56, %s3096_s25 }
 0x3db   :  { %v2824_v57 = vpop.eup %2823 }
 0x3dc   :  { %711 = vrot.lane.b32.xlu0 %v2824_v57, %s3096_s25  ;;  %v2826_v4 = vpop.eup %2825  ;;  %v965_v57 = vpop.f32.mrf.mxu0 }
 0x3dd   :  { %v570_v11 = vadd.f32 1.0, %v2826_v4 }
 0x3de   :  { %v2640_v58 = vpop.f32.mrf.mxu0 }
 0x3df   :  { %2829 = vrcp.f32 %v570_v11  ;;  %v2828_v12 = vpop.eup %2827 }
 0x3e0   :  { %v705_v13 = vadd.f32 1.0, %v2828_v12  ;;  %v968_v60 = vpop.f32.mrf.mxu0 }
 0x3e2   :  { %2831 = vrcp.f32 %v705_v13  ;;  %v2641_v61 = vpop.f32.mrf.mxu0 }
 0x3ec   :  { %v2830_v14 = vpop.eup %2829 }
 0x3ed   :  { %v574_v31 = vmul.f32 %v2830_v14, %v3381_v29 }
 0x3ef   :  { %v2832_v22 = vpop.eup %2831 }
 0x3f0   :  { %v709_v35 = vmul.f32 %v2832_v22, %v3391_v34 }
 0x446   :  { %v577_v15 = vpop.permute.xlu1 %576 }
 0x447   :  { %v579_v17 = vmul.f32 %v2830_v14, %v577_v15 }
 0x449   :  { %581 = vrot.lane.b32.xlu1 %v579_v17, %s3092_s16 }
 0x44d   :  { %595 = vperm.xlu1 %2798, %v3368_v18  }
 0x44e   :  { %v712_v24 = vpop.permute.xlu0 %711 }
 0x44f   :  { %v714_v26 = vmul.f32 %v2832_v22, %v712_v24 }
 0x451   :  { %730 = vperm.xlu1 %2798, %v3373_v25   ;;  %716 = vrot.lane.b32.xlu0 %v714_v26, %s3092_s16 }
 0x4bb   :  { %v582_v32 = vpop.permute.xlu1 %581 }
 0x4bc   :  { %v3384_v33 = vadd.f32 %v582_v32, %v574_v31 }
 0x4be   :  { %2833 = vtanh.f32 %v3384_v33 }
 0x4c3   :  { %v717_v36 = vpop.permute.xlu0 %716 }
 0x4c4   :  { %v3394_v37 = vadd.f32 %v717_v36, %v709_v35 }
 0x4c6   :  { %2835 = vtanh.f32 %v3394_v37 }
 0x4c8   :  { %v3409_v40 = vpop.permute.xlu1 %595 }
 0x4c9   :  { %vm597_vm10 = vcmp.eq.s32.totalorder %v3409_v40, 1 }
 0x4cb   :  { %v2834_v59 = vpop.eup %2833 }
 0x4cc   :  { %587 = vrot.lane.b32.xlu0 %v2834_v59, %s3096_s25  ;;  %v3423_v48 = vpop.permute.xlu1 %730 }
 0x4cd   :  { %vm732_vm11 = vcmp.eq.s32.totalorder %v3423_v48, 1 }
 0x4ce   :  { %v3481_v61 = vsel %vm732_vm11, %v3394_v37, %v3391_v34  ;;  %v1148_v37 = vld [vmem:[#allocation9 + $0x8] sm:$0x3] }
 0x4d3   :  { %v2836_v63 = vpop.eup %2835 }
 0x4d4   :  { %722 = vrot.lane.b32.xlu0 %v2836_v63, %s3096_s25 }
 0x53e   :  { %v588_v42 = vpop.permute.xlu0 %587 }
 0x53f   :  { %v3411_v45 = vmul.f32 %v2830_v14, %v588_v42 }
 0x541   :  { %v3418_v46 = vsel %vm597_vm10, %v3411_v45, %v3331_v23 }
 0x542   :  { %v746_v47 = vpack.c.bf16 %v3418_v46, %v3418_v46 }
 0x544   :  { %748 = vrot.lane.b32.xlu1 %v746_v47, %s3092_s16 }
 0x546   :  { %v723_v49 = vpop.permute.xlu0 %722 }
 0x547   :  { %v3425_v50 = vmul.f32 %v2832_v22, %v723_v49 }
 0x549   :  { %v3432_v51 = vsel %vm732_vm11, %v3425_v50, %v3342_v28  ;;  %v735_v40 = vsel %vm732_vm11, %v3425_v50, 0.0 }
 0x54a   :  { %v881_v23 = vpack.c.bf16 %v3432_v51, %v3432_v51 }
 0x54c   :  { %883 = vrot.lane.b32.xlu0 %v881_v23, %s3092_s16 }
 0x5b6   :  { %v749_v56 = vpop.permute.xlu1 %748 }
 0x5b7   :  { %2619 = vmatmul.mubr.msk.bf16.vlgmr.msra.gmra.mxu1 %vm159_vm3, %v749_v56 }
 0x5b8   :  { %2629 = vmatpush3.bf16.msra.mxu1 %v3218_v6  ;;  %2632 = vmatprep.mubr.msk.bf16.mxu1 %vm3101_vm1, %v3100_v0 }
 0x5b9   :  { %2630 = vmatprep.subr.bf16.mxu1 %v3100_v0 }
 0x5bc   :  { %2631 = vmatpush3.bf16.msra.mxu1 %v3229_v10 }
 0x5bd   :  { %2642 = vmatprep.subr.bf16.mxu1 %v3100_v0 }
 0x5be   :  { %v884_v28 = vpop.permute.xlu0 %883 }
 0x5bf   :  { %2633 = vmatmul.mubr.msk.bf16.vlgmr.msra.gmra.mxu1 %vm159_vm3, %v884_v28  ;;  %v3471_v28 = vsel %vm597_vm10, %v3384_v33, %v3381_v29  ;;  %v1013_v33 = vld [vmem:[#allocation6 + $0x6] sm:$0x3] }
 0x5c0   :  { %2643 = vmatpush3.bf16.msra.mxu1 %v3205_v1  ;;  %2646 = vmatprep.mubr.msk.bf16.mxu1 %vm3101_vm1, %v3100_v0 }
 0x5c1   :  { %2644 = vmatprep.subr.bf16.mxu1 %v3100_v0 }
 0x5c4   :  { %2645 = vmatpush3.bf16.msra.mxu1 %v3215_v5 }
 0x5c5   :  { %2656 = vmatprep.subr.bf16.mxu1 %v3100_v0 }
 0x677   :  { %v787_v3 = vpop.f32.mrf.mxu1 }
 0x678   :  { %v831_v4 = vadd.f32 %v830_v52, %v787_v3  ;;  %v3458_v52 = vsel %vm2444_vm12, 1, %v3102_v16 }
 0x679   :  { %v2620_v11 = vpop.f32.mrf.mxu1 }
 0x67a   :  { %v836_v12 = vadd.f32 %v3264_v19, %v831_v4 }
 0x67b   :  { %v790_v13 = vpop.f32.mrf.mxu1 }
 0x67c   :  { %2837 = vtanh.f32 %v836_v12  ;;  %v837_v36 = vsub.f32 0.0, %v836_v12  ;;  %v1015_v12 = vpack.c.bf16 %v1013_v33, %v1013_v33  ;;  %v1150_v13 = vpack.c.bf16 %v1148_v37, %v1148_v37 }
 0x67d   :  { %v2621_v14 = vpop.f32.mrf.mxu1 }
 0x67e   :  { %v838_v59 = vmul.f32 1.442695, %v837_v36  ;;  %2653 = vmatmul.mubr.msk.bf16.vlgmr.msra.gmra.mxu0 %vm209_vm2, %v1015_v12 }
 0x67f   :  { %v922_v15 = vpop.f32.mrf.mxu1  ;;  %2665 = vmatpush3.bf16.msra.mxu0 %v3226_v9  ;;  %2666 = vmatprep.mubr.msk.bf16.mxu0 %vm3101_vm1, %v3100_v0 }
 0x680   :  { %v966_v17 = vadd.f32 %v965_v57, %v922_v15  ;;  %2678 = vmatprep.subr.bf16.mxu0 %v3100_v0 }
 0x681   :  { %v2634_v22 = vpop.f32.mrf.mxu1 }
 0x682   :  { %v971_v24 = vadd.f32 %v3270_v30, %v966_v17 }
 0x683   :  { %v925_v26 = vpop.f32.mrf.mxu1 }
 0x684   :  { %2839 = vtanh.f32 %v971_v24  ;;  %v972_v62 = vsub.f32 0.0, %v971_v24 }
 0x685   :  { %v2635_v31 = vpop.f32.mrf.mxu1  ;;  %2841 = vpow2.f32 %v838_v59 }
 0x686   :  { %v973_v38 = vmul.f32 1.442695, %v972_v62  ;;  %2667 = vmatmul.mubr.msk.bf16.vlgmr.msra.gmra.mxu0 %vm209_vm2, %v1150_v13 }
 0x687   :  { %2679 = vmatpush3.bf16.msra.mxu0 %v3210_v2  ;;  %2680 = vmatprep.mubr.msk.bf16.mxu0 %vm3101_vm1, %v3100_v0 }
 0x688   :  { %2843 = vpow2.f32 %v973_v38  ;;  %2692 = vmatprep.subr.bf16.mxu0 %v3100_v0 }
 0x689   :  { %v2838_v32 = vpop.eup %2837 }
 0x68a   :  { %846 = vrot.lane.b32.xlu1 %v2838_v32, %s3096_s25 }
 0x691   :  { %v2840_v35 = vpop.eup %2839 }
 0x692   :  { %981 = vrot.lane.b32.xlu0 %v2840_v35, %s3096_s25  ;;  %v2842_v63 = vpop.eup %2841 }
 0x693   :  { %v840_v8 = vadd.f32 1.0, %v2842_v63 }
 0x695   :  { %2845 = vrcp.f32 %v840_v8  ;;  %v2844_v39 = vpop.eup %2843 }
 0x696   :  { %v975_v42 = vadd.f32 1.0, %v2844_v39 }
 0x698   :  { %2847 = vrcp.f32 %v975_v42 }
 0x6a2   :  { %v2846_v47 = vpop.eup %2845 }
 0x6a3   :  { %v844_v57 = vmul.f32 %v2846_v47, %v3471_v28 }
 0x6a5   :  { %v2848_v53 = vpop.eup %2847 }
 0x6a6   :  { %v979_v3 = vmul.f32 %v2848_v53, %v3481_v61 }
 0x6fc   :  { %v847_v49 = vpop.permute.xlu1 %846 }
 0x6fd   :  { %v849_v23 = vmul.f32 %v2846_v47, %v847_v49 }
 0x6ff   :  { %851 = vrot.lane.b32.xlu1 %v849_v23, %s3092_s16 }
 0x703   :  { %865 = vperm.xlu1 %2798, %v3458_v52  }
 0x704   :  { %v982_v54 = vpop.permute.xlu0 %981 }
 0x705   :  { %v984_v56 = vmul.f32 %v2848_v53, %v982_v54 }
 0x707   :  { %1000 = vperm.xlu1 %2798, %v3463_v55   ;;  %986 = vrot.lane.b32.xlu0 %v984_v56, %s3092_s16 }
 0x73e   :  { %v1100_v36 = vpop.f32.mrf.mxu0 }
 0x740   :  { %v2654_v59 = vpop.f32.mrf.mxu0 }
 0x742   :  { %v1103_v62 = vpop.f32.mrf.mxu0 }
 0x744   :  { %v2655_v38 = vpop.f32.mrf.mxu0 }
 0x746   :  { %v1235_v8 = vpop.f32.mrf.mxu0 }
 0x748   :  { %v2668_v39 = vpop.f32.mrf.mxu0 }
 0x74a   :  { %v1238_v42 = vpop.f32.mrf.mxu0 }
 0x771   :  { %v852_v58 = vpop.permute.xlu1 %851 }
 0x772   :  { %v3474_v60 = vadd.f32 %v852_v58, %v844_v57 }
 0x774   :  { %2849 = vtanh.f32 %v3474_v60 }
 0x779   :  { %v987_v4 = vpop.permute.xlu0 %986 }
 0x77a   :  { %v3484_v11 = vadd.f32 %v987_v4, %v979_v3 }
 0x77c   :  { %2851 = vtanh.f32 %v3484_v11 }
 0x77e   :  { %v3499_v14 = vpop.permute.xlu1 %865 }
 0x77f   :  { %vm867_vm14 = vcmp.eq.s32.totalorder %v3499_v14, 1 }
 0x781   :  { %v2850_v29 = vpop.eup %2849 }
 0x782   :  { %857 = vrot.lane.b32.xlu0 %v2850_v29, %s3096_s25  ;;  %v3513_v26 = vpop.permute.xlu1 %1000 }
 0x783   :  { %vm1002_vm15 = vcmp.eq.s32.totalorder %v3513_v26, 1 }
 0x789   :  { %v2852_v34 = vpop.eup %2851 }
 0x78a   :  { %992 = vrot.lane.b32.xlu0 %v2852_v34, %s3096_s25 }
 0x7f4   :  { %v858_v15 = vpop.permute.xlu0 %857 }
 0x7f5   :  { %v3501_v17 = vmul.f32 %v2846_v47, %v858_v15  ;;  %v2669_v47 = vpop.f32.mrf.mxu0 }
 0x7f6   :  { %v3553_v47 = vsel %vm2453_vm5, 1, %v3102_v16 }
 0x7f7   :  { %v3508_v22 = vsel %vm867_vm14, %v3501_v17, %v3418_v46 }
 0x7f8   :  { %v1016_v24 = vpack.c.bf16 %v3508_v22, %v3508_v22 }
 0x7fa   :  { %1018 = vrot.lane.b32.xlu1 %v1016_v24, %s3092_s16 }
 0x7fc   :  { %v993_v31 = vpop.permute.xlu0 %992 }
 0x7fd   :  { %v3515_v32 = vmul.f32 %v2848_v53, %v993_v31 }
 0x7ff   :  { %v3522_v35 = vsel %vm1002_vm15, %v3515_v32, %v3432_v51  ;;  %v1005_v27 = vsel %vm1002_vm15, %v3515_v32, 0.0 }
 0x800   :  { %v1151_v46 = vpack.c.bf16 %v3522_v35, %v3522_v35 }
 0x802   :  { %1153 = vrot.lane.b32.xlu0 %v1151_v46, %s3092_s16 }
 0x86c   :  { %v1019_v63 = vpop.permute.xlu1 %1018 }
 0x86d   :  { %2647 = vmatmul.mubr.msk.bf16.vlgmr.msra.gmra.mxu1 %vm159_vm3, %v1019_v63 }
 0x86e   :  { %2657 = vmatpush3.bf16.msra.mxu1 %v3218_v6  ;;  %2660 = vmatprep.mubr.msk.bf16.mxu1 %vm3101_vm1, %v3100_v0 }
 0x86f   :  { %2658 = vmatprep.subr.bf16.mxu1 %v3100_v0 }
 0x872   :  { %2659 = vmatpush3.bf16.msra.mxu1 %v3229_v10 }
 0x873   :  { %2670 = vmatprep.subr.bf16.mxu1 %v3100_v0 }
 0x874   :  { %v1154_v51 = vpop.permute.xlu0 %1153 }
 0x875   :  { %2661 = vmatmul.mubr.msk.bf16.vlgmr.msra.gmra.mxu1 %vm159_vm3, %v1154_v51 }
 0x876   :  { %2671 = vmatpush3.bf16.msra.mxu1 %v3205_v1  ;;  %2674 = vmatprep.mubr.msk.bf16.mxu1 %vm3101_vm1, %v3100_v0 }
 0x877   :  { %2672 = vmatprep.subr.bf16.mxu1 %v3100_v0 }
 0x87a   :  { %2673 = vmatpush3.bf16.msra.mxu1 %v3215_v5 }
 0x87b   :  { %2684 = vmatprep.subr.bf16.mxu1 %v3100_v0 }
 0x92d   :  { %v1057_v49 = vpop.f32.mrf.mxu1 }
 0x92e   :  { %v1101_v23 = vadd.f32 %v1100_v36, %v1057_v49 }
 0x92f   :  { %v2648_v53 = vpop.f32.mrf.mxu1 }
 0x930   :  { %v1106_v54 = vadd.f32 %v3264_v19, %v1101_v23  ;;  %v3561_v23 = vsel %vm867_vm14, %v3474_v60, %v3471_v28  ;;  %v1283_v60 = vld [vmem:[#allocation6 + $0x8] sm:$0x3] }
 0x931   :  { %v1060_v56 = vpop.f32.mrf.mxu1 }
 0x932   :  { %2853 = vtanh.f32 %v1106_v54  ;;  %v1107_v13 = vsub.f32 0.0, %v1106_v54 }
 0x933   :  { %v2649_v57 = vpop.f32.mrf.mxu1 }
 0x934   :  { %v1108_v15 = vmul.f32 1.442695, %v1107_v13 }
 0x935   :  { %v1192_v58 = vpop.f32.mrf.mxu1 }
 0x936   :  { %v1236_v3 = vadd.f32 %v1235_v8, %v1192_v58  ;;  %v3548_v8 = vsel %vm2450_vm4, 1, %v3102_v16  ;;  %v3571_v16 = vsel %vm1002_vm15, %v3484_v11, %v3481_v61  ;;  %v1418_v11 = vld [vmem:[#allocation9 + $0x6] sm:$0x3] }
 0x937   :  { %v2662_v4 = vpop.f32.mrf.mxu1 }
 0x938   :  { %v1241_v29 = vadd.f32 %v3270_v30, %v1236_v3  ;;  %v1285_v3 = vpack.c.bf16 %v1283_v60, %v1283_v60  ;;  %v1420_v4 = vpack.c.bf16 %v1418_v11, %v1418_v11 }
 0x939   :  { %v1195_v33 = vpop.f32.mrf.mxu1 }
 0x93a   :  { %2855 = vtanh.f32 %v1241_v29  ;;  %v1242_v24 = vsub.f32 0.0, %v1241_v29  ;;  %2681 = vmatmul.mubr.msk.bf16.vlgmr.msra.gmra.mxu0 %vm209_vm2, %v1285_v3 }
 0x93b   :  { %v2663_v12 = vpop.f32.mrf.mxu1  ;;  %2857 = vpow2.f32 %v1108_v15  ;;  %2693 = vmatpush3.bf16.msra.mxu0 %v3226_v9  ;;  %2694 = vmatprep.mubr.msk.bf16.mxu0 %vm3101_vm1, %v3100_v0 }
 0x93c   :  { %v1243_v31 = vmul.f32 1.442695, %v1242_v24  ;;  %2706 = vmatprep.subr.bf16.mxu0 %v3100_v0 }
 0x93e   :  { %2859 = vpow2.f32 %v1243_v31 }
 0x93f   :  { %v2854_v34 = vpop.eup %2853 }
 0x940   :  { %1116 = vrot.lane.b32.xlu1 %v2854_v34, %s3096_s25 }
 0x942   :  { %2695 = vmatmul.mubr.msk.bf16.vlgmr.msra.gmra.mxu0 %vm209_vm2, %v1420_v4 }
 0x943   :  { %2707 = vmatpush3.bf16.msra.mxu0 %v3210_v2  ;;  %2708 = vmatprep.mubr.msk.bf16.mxu0 %vm3101_vm1, %v3100_v0 }
 0x944   :  { %2720 = vmatprep.subr.bf16.mxu0 %v3100_v0 }
 0x947   :  { %v2856_v37 = vpop.eup %2855 }
 0x948   :  { %1251 = vrot.lane.b32.xlu0 %v2856_v37, %s3096_s25  ;;  %v2858_v46 = vpop.eup %2857 }
 0x949   :  { %v1110_v36 = vadd.f32 1.0, %v2858_v46 }
 0x94b   :  { %2861 = vrcp.f32 %v1110_v36  ;;  %v2860_v59 = vpop.eup %2859 }
 0x94c   :  { %v1245_v62 = vadd.f32 1.0, %v2860_v59 }
 0x94e   :  { %2863 = vrcp.f32 %v1245_v62 }
 0x958   :  { %v2862_v38 = vpop.eup %2861 }
 0x959   :  { %v1114_v41 = vmul.f32 %v2862_v38, %v3561_v23 }
 0x95b   :  { %v2864_v39 = vpop.eup %2863 }
 0x95c   :  { %v1249_v56 = vmul.f32 %v2864_v39, %v3571_v16 }
 0x9b2   :  { %v1117_v63 = vpop.permute.xlu1 %1116 }
 0x9b3   :  { %v1119_v51 = vmul.f32 %v2862_v38, %v1117_v63 }
 0x9b5   :  { %1121 = vrot.lane.b32.xlu1 %v1119_v51, %s3092_s16 }
 0x9b9   :  { %1135 = vperm.xlu1 %2798, %v3548_v8  }
 0x9ba   :  { %v1252_v42 = vpop.permute.xlu0 %1251 }
 0x9bb   :  { %v1254_v49 = vmul.f32 %v2864_v39, %v1252_v42 }
 0x9bd   :  { %1270 = vperm.xlu1 %2798, %v3553_v47   ;;  %1256 = vrot.lane.b32.xlu0 %v1254_v49, %s3092_s16 }
 0x9fa   :  { %v1370_v24 = vpop.f32.mrf.mxu0 }
 0x9fc   :  { %v2682_v31 = vpop.f32.mrf.mxu0 }
 0x9fe   :  { %v1373_v46 = vpop.f32.mrf.mxu0 }
 0xa00   :  { %v2683_v36 = vpop.f32.mrf.mxu0 }
 0xa27   :  { %v1122_v53 = vpop.permute.xlu1 %1121 }
 0xa28   :  { %v3564_v54 = vadd.f32 %v1122_v53, %v1114_v41 }
 0xa2a   :  { %2865 = vtanh.f32 %v3564_v54 }
 0xa2f   :  { %v1257_v57 = vpop.permute.xlu0 %1256 }
 0xa30   :  { %v3574_v58 = vadd.f32 %v1257_v57, %v1249_v56 }
 0xa32   :  { %2867 = vtanh.f32 %v3574_v58 }
 0xa34   :  { %v3589_v9 = vpop.permute.xlu1 %1135 }
 0xa35   :  { %vm1137_vm8 = vcmp.eq.s32.totalorder %v3589_v9, 1 }
 0xa37   :  { %v2866_v28 = vpop.eup %2865 }
 0xa38   :  { %1127 = vrot.lane.b32.xlu0 %v2866_v28, %s3096_s25  ;;  %v3603_v34 = vpop.permute.xlu1 %1270 }
 0xa39   :  { %vm1272_vm9 = vcmp.eq.s32.totalorder %v3603_v34, 1 }
 0xa3f   :  { %v2868_v61 = vpop.eup %2867 }
 0xa40   :  { %1262 = vrot.lane.b32.xlu0 %v2868_v61, %s3096_s25 }
 0xaaa   :  { %v1128_v29 = vpop.permute.xlu0 %1127 }
 0xaab   :  { %v3591_v33 = vmul.f32 %v2862_v38, %v1128_v29 }
 0xaad   :  { %v3598_v12 = vsel %vm1137_vm8, %v3591_v33, %v3508_v22 }
 0xaae   :  { %v1286_v2 = vpack.c.bf16 %v3598_v12, %v3598_v12 }
 0xab0   :  { %1288 = vrot.lane.b32.xlu1 %v1286_v2, %s3092_s16 }
 0xab2   :  { %v1263_v37 = vpop.permute.xlu0 %1262 }
 0xab3   :  { %v3605_v13 = vmul.f32 %v2864_v39, %v1263_v37 }
 0xab5   :  { %v3612_v15 = vsel %vm1272_vm9, %v3605_v13, %v3522_v35  ;;  %v1275_v48 = vsel %vm1272_vm9, %v3605_v13, 0.0 }
 0xab6   :  { %v1421_v22 = vpack.c.bf16 %v3612_v15, %v3612_v15 }
 0xab8   :  { %1423 = vrot.lane.b32.xlu0 %v1421_v22, %s3092_s16 }
 0xb22   :  { %v1289_v59 = vpop.permute.xlu1 %1288 }
 0xb23   :  { %2675 = vmatmul.mubr.msk.bf16.vlgmr.msra.gmra.mxu1 %vm159_vm3, %v1289_v59 }
 0xb24   :  { %2685 = vmatpush3.bf16.msra.mxu1 %v3218_v6  ;;  %2688 = vmatprep.mubr.msk.bf16.mxu1 %vm3101_vm1, %v3100_v0  ;;  %v1505_v6 = vpop.f32.mrf.mxu0 }
 0xb25   :  { %2686 = vmatprep.subr.bf16.mxu1 %v3100_v0 }
 0xb26   :  { %v2696_v62 = vpop.f32.mrf.mxu0 }
 0xb28   :  { %2687 = vmatpush3.bf16.msra.mxu1 %v3229_v10  ;;  %v1508_v38 = vpop.f32.mrf.mxu0 }
 0xb29   :  { %2698 = vmatprep.subr.bf16.mxu1 %v3100_v0 }
 0xb2a   :  { %v1424_v35 = vpop.permute.xlu0 %1423  ;;  %v2697_v10 = vpop.f32.mrf.mxu0 }
 0xb2b   :  { %2689 = vmatmul.mubr.msk.bf16.vlgmr.msra.gmra.mxu1 %vm159_vm3, %v1424_v35  ;;  %v3643_v35 = vsel %vm1137_vm8, %v3564_v54, %v3561_v23  ;;  %v1553_v54 = vld [vmem:[#allocation6 + $0xa] sm:$0x3] }
 0xb2c   :  { %2699 = vmatpush3.bf16.msra.mxu1 %v3205_v1  ;;  %2702 = vmatprep.mubr.msk.bf16.mxu1 %vm3101_vm1, %v3100_v0 }
 0xb2d   :  { %2700 = vmatprep.subr.bf16.mxu1 %v3100_v0 }
 0xb30   :  { %2701 = vmatpush3.bf16.msra.mxu1 %v3215_v5 }
 0xb31   :  { %2712 = vmatprep.subr.bf16.mxu1 %v3100_v0 }
 0xbe3   :  { %v1327_v63 = vpop.f32.mrf.mxu1 }
 0xbe4   :  { %v1371_v51 = vadd.f32 %v1370_v24, %v1327_v63 }
 0xbe5   :  { %v2676_v39 = vpop.f32.mrf.mxu1 }
 0xbe6   :  { %v1376_v42 = vadd.f32 %v3264_v19, %v1371_v51  ;;  %v1555_v51 = vpack.c.bf16 %v1553_v54, %v1553_v54  ;;  %v3661_v39 = vld [vmem:[#allocation12] sm:$0xff]  }
 0xbe7   :  { %v1330_v49 = vpop.f32.mrf.mxu1 }
 0xbe8   :  { %2869 = vtanh.f32 %v1376_v42  ;;  %v1377_v61 = vsub.f32 0.0, %v1376_v42  ;;  %2709 = vmatmul.mubr.msk.bf16.vlgmr.msra.gmra.mxu0 %vm209_vm2, %v1555_v51  ;;  %v3672_v49 = vld [vmem:[%s4016_s3] sm:$0xff]  }
 0xbe9   :  { %v2677_v1 = vpop.f32.mrf.mxu1  ;;  %2721 = vmatpush3.bf16.msra.mxu0 %v3661_v39  ;;  %2722 = vmatprep.mubr.msk.bf16.mxu0 %vm3101_vm1, %v3100_v0 }
 0xbea   :  { %v1378_v11 = vmul.f32 1.442695, %v1377_v61  ;;  %2734 = vmatprep.subr.bf16.mxu0 %v3100_v0 }
 0xbeb   :  { %v1462_v41 = vpop.f32.mrf.mxu1 }
 0xbec   :  { %v1506_v53 = vadd.f32 %v1505_v6, %v1462_v41 }
 0xbed   :  { %v2690_v56 = vpop.f32.mrf.mxu1 }
 0xbee   :  { %v1511_v57 = vadd.f32 %v3270_v30, %v1506_v53 }
 0xbef   :  { %v1465_v5 = vpop.f32.mrf.mxu1 }
 0xbf0   :  { %2871 = vtanh.f32 %v1511_v57  ;;  %v1512_v19 = vsub.f32 0.0, %v1511_v57 }
 0xbf1   :  { %v2691_v28 = vpop.f32.mrf.mxu1  ;;  %2873 = vpow2.f32 %v1378_v11 }
 0xbf2   :  { %v1513_v4 = vmul.f32 1.442695, %v1512_v19 }
 0xbf4   :  { %2875 = vpow2.f32 %v1513_v4 }
 0xbf5   :  { %v2870_v60 = vpop.eup %2869 }
 0xbf6   :  { %1386 = vrot.lane.b32.xlu1 %v2870_v60, %s3096_s25 }
 0xbfd   :  { %v2872_v3 = vpop.eup %2871 }
 0xbfe   :  { %1521 = vrot.lane.b32.xlu0 %v2872_v3, %s3096_s25  ;;  %v2874_v29 = vpop.eup %2873 }
 0xbff   :  { %v1380_v2 = vadd.f32 1.0, %v2874_v29 }
 0xc01   :  { %2877 = vrcp.f32 %v1380_v2  ;;  %v2876_v37 = vpop.eup %2875  ;;  %v3707_v2 = vld [vmem:[#allocation14 + $0x8] sm:$0xff]  }
 0xc02   :  { %v1515_v30 = vadd.f32 1.0, %v2876_v37 }
 0xc04   :  { %2879 = vrcp.f32 %v1515_v30  ;;  %v3718_v30 = vld [vmem:[#allocation11 + $0x8] sm:$0xff]  }
 0xc0e   :  { %v2878_v22 = vpop.eup %2877 }
 0xc0f   :  { %v1384_v6 = vmul.f32 %v2878_v22, %v3643_v35 }
 0xc11   :  { %v2880_v46 = vpop.eup %2879 }
 0xc68   :  { %v1387_v24 = vpop.permute.xlu1 %1386 }
 0xc69   :  { %v1389_v31 = vmul.f32 %v2878_v22, %v1387_v24 }
 0xc6b   :  { %1391 = vrot.lane.b32.xlu1 %v1389_v31, %s3092_s16 }
 0xc6f   :  { %1405 = vperm.xlu1 %2798, %v3553_v47  }
 0xc70   :  { %v1522_v36 = vpop.permute.xlu0 %1521 }
 0xc71   :  { %v1524_v59 = vmul.f32 %v2880_v46, %v1522_v36 }
 0xc73   :  { %1540 = vperm.xlu1 %2798, %v3548_v8   ;;  %1526 = vrot.lane.b32.xlu0 %v1524_v59, %s3092_s16  ;;  %v3653_v8 = vsel %vm1272_vm9, %v3574_v58, %v3571_v16  ;;  %v1688_v58 = vld [vmem:[#allocation9 + $0x4] sm:$0x3] }
 0xc74   :  { %v1519_v47 = vmul.f32 %v2880_v46, %v3653_v8  ;;  %v1690_v42 = vpack.c.bf16 %v1688_v58, %v1688_v58 }
 0xc76   :  { %2723 = vmatmul.mubr.msk.bf16.vlgmr.msra.gmra.mxu0 %vm209_vm2, %v1690_v42  ;;  %v3737_v42 = vld [vmem:[%s4021_s8] ss:$0 sm:$0xff] }
 0xc77   :  { %2735 = vmatpush3.bf16.msra.mxu0 %v3672_v49  ;;  %2736 = vmatprep.mubr.msk.bf16.mxu0 %vm3101_vm1, %v3100_v0 }
 0xc78   :  { %2748 = vmatprep.subr.bf16.mxu0 %v3100_v0 }
 0xca8   :  { %v1640_v61 = vpop.f32.mrf.mxu0 }
 0xcaa   :  { %v2710_v11 = vpop.f32.mrf.mxu0 }
 0xcac   :  { %v1643_v19 = vpop.f32.mrf.mxu0 }
 0xcae   :  { %v2711_v4 = vpop.f32.mrf.mxu0 }
 0xcdd   :  { %v1392_v62 = vpop.permute.xlu1 %1391 }
 0xcde   :  { %v3646_v38 = vadd.f32 %v1392_v62, %v1384_v6 }
 0xce0   :  { %2881 = vtanh.f32 %v3646_v38 }
 0xce5   :  { %v1527_v10 = vpop.permute.xlu0 %1526 }
 0xce6   :  { %v3656_v63 = vadd.f32 %v1527_v10, %v1519_v47  ;;  %v3731_v47 = vld [vmem:[%s4018_s5] ss:$0 sm:$0xff]  ;;  %s3104_s5 = smov [#allocation15]  }
 0xce7   :  { %s2384_s8 = sshll.u32 %s3104_s5, 4  ;;  %s2385_s8 = int_to_ptr.vmem [resolvable:$true] %s2384_s8 }
 0xce8   :  { %2883 = vtanh.f32 %v3656_v63  ;;  %p3046_p12 = scmp.lt.s32.totalorder %s2385_s8, %s2385_s8 }
 0xcea   :  { %v3678_v1 = vpop.permute.xlu1 %1405 }
 0xceb   :  { %vm1407_vm12 = vcmp.eq.s32.totalorder %v3678_v1, 1 }
 0xced   :  { %v2882_v23 = vpop.eup %2881 }
 0xcee   :  { %1397 = vrot.lane.b32.xlu0 %v2882_v23, %s3096_s25  ;;  %v3692_v5 = vpop.permute.xlu1 %1540 }
 0xcef   :  { %vm1542_vm13 = vcmp.eq.s32.totalorder %v3692_v5, 1 }
 0xcf5   :  { %v2884_v16 = vpop.eup %2883 }
 0xcf6   :  { %1532 = vrot.lane.b32.xlu0 %v2884_v16, %s3096_s25 }
 0xd36   :  { %v1775_v24 = vpop.f32.mrf.mxu0 }
 0xd38   :  { %v2724_v31 = vpop.f32.mrf.mxu0 }
 0xd60   :  { %v1398_v41 = vpop.permute.xlu0 %1397 }
 0xd61   :  { %v3680_v53 = vmul.f32 %v2878_v22, %v1398_v41  ;;  %v3724_v22 = vld [vmem:[#allocation11] sm:$0xff]  }
 0xd63   :  { %v3687_v56 = vsel %vm1407_vm12, %v3680_v53, %v3598_v12  ;;  %v1410_v21 = vsel %vm1407_vm12, %v3680_v53, 0.0 }
 0xd64   :  { %v1556_v57 = vpack.c.bf16 %v3687_v56, %v3687_v56 }
 0xd66   :  { %1558 = vrot.lane.b32.xlu1 %v1556_v57, %s3092_s16 }
 0xd68   :  { %v1533_v28 = vpop.permute.xlu0 %1532 }
 0xd69   :  { %v3694_v60 = vmul.f32 %v2880_v46, %v1533_v28  ;;  %v1778_v46 = vpop.f32.mrf.mxu0 }
 0xd6b   :  { %v3701_v3 = vsel %vm1542_vm13, %v3694_v60, %v3612_v15  ;;  %v3713_v15 = vld [vmem:[#allocation14] sm:$0xff]   ;;  %v2725_v36 = vpop.f32.mrf.mxu0  ;;  %v1545_v14 = vsel %vm1542_vm13, %v3694_v60, 0.0 }
 0xd6c   :  { %v1691_v12 = vpack.c.bf16 %v3701_v3, %v3701_v3 }
 0xd6e   :  { %1693 = vrot.lane.b32.xlu0 %v1691_v12, %s3092_s16 }
 0xdd8   :  { %v1559_v29 = vpop.permute.xlu1 %1558 }
 0xdd9   :  { %2703 = vmatmul.mubr.msk.bf16.vlgmr.msra.gmra.mxu1 %vm159_vm3, %v1559_v29 }
 0xdda   :  { %2713 = vmatpush3.bf16.msra.mxu1 %v3707_v2  ;;  %2716 = vmatprep.mubr.msk.bf16.mxu1 %vm3101_vm1, %v3100_v0 }
 0xddb   :  { %2714 = vmatprep.subr.bf16.mxu1 %v3100_v0 }
 0xdde   :  { %2715 = vmatpush3.bf16.msra.mxu1 %v3713_v15 }
 0xddf   :  { %2726 = vmatprep.subr.bf16.mxu1 %v3100_v0 }
 0xde0   :  { %v1694_v37 = vpop.permute.xlu0 %1693 }
 0xde1   :  { %2717 = vmatmul.mubr.msk.bf16.vlgmr.msra.gmra.mxu1 %vm159_vm3, %v1694_v37 }
 0xde2   :  { %2727 = vmatpush3.bf16.msra.mxu1 %v3718_v30  ;;  %2730 = vmatprep.mubr.msk.bf16.mxu1 %vm3101_vm1, %v3100_v0 }
 0xde3   :  { %2728 = vmatprep.subr.bf16.mxu1 %v3100_v0 }
 0xde6   :  { %2729 = vmatpush3.bf16.msra.mxu1 %v3724_v22 }
 0xde7   :  { %2740 = vmatprep.subr.bf16.mxu1 %v3100_v0 }
 0xe99   :  { %v1597_v59 = vpop.f32.mrf.mxu1 }
 0xe9a   :  { %v1641_v6 = vadd.f32 %v1640_v61, %v1597_v59 }
 0xe9b   :  { %v2704_v62 = vpop.f32.mrf.mxu1 }
 0xe9c   :  { %v1646_v10 = vadd.f32 %v3731_v47, %v1641_v6 }
 0xe9d   :  { %v1600_v23 = vpop.f32.mrf.mxu1 }
 0xe9e   :  { %2885 = vtanh.f32 %v1646_v10  ;;  %v1647_v11 = vsub.f32 0.0, %v1646_v10 }
 0xe9f   :  { %v2705_v54 = vpop.f32.mrf.mxu1 }
 0xea0   :  { %v1648_v19 = vmul.f32 1.442695, %v1647_v11  ;;  %v3750_v54 = vsel %vm1407_vm12, %v3646_v38, %v3643_v35  ;;  %v1823_v38 = vld [vmem:[#allocation6 + $0xc] sm:$0x3] }
 0xea1   :  { %v1732_v51 = vpop.f32.mrf.mxu1 }
 0xea2   :  { %v1776_v16 = vadd.f32 %v1775_v24, %v1732_v51 }
 0xea3   :  { %v2718_v58 = vpop.f32.mrf.mxu1 }
 0xea4   :  { %v1781_v41 = vadd.f32 %v3737_v42, %v1776_v16 }
 0xea5   :  { %v1735_v57 = vpop.f32.mrf.mxu1 }
 0xea6   :  { %2887 = vtanh.f32 %v1781_v41  ;;  %v1782_v4 = vsub.f32 0.0, %v1781_v41 }
 0xea7   :  { %v2719_v28 = vpop.f32.mrf.mxu1  ;;  %2889 = vpow2.f32 %v1648_v19 }
 0xea8   :  { %v1783_v29 = vmul.f32 1.442695, %v1782_v4  ;;  %v1825_v28 = vpack.c.bf16 %v1823_v38, %v1823_v38 }
 0xeaa   :  { %2891 = vpow2.f32 %v1783_v29  ;;  %2737 = vmatmul.mubr.msk.bf16.vlgmr.msra.gmra.mxu0 %vm209_vm2, %v1825_v28 }
 0xeab   :  { %v2886_v12 = vpop.eup %2885  ;;  %2749 = vmatpush3.bf16.msra.mxu0 %v3661_v39  ;;  %2750 = vmatprep.mubr.msk.bf16.mxu0 %vm3101_vm1, %v3100_v0 }
 0xeac   :  { %1656 = vrot.lane.b32.xlu1 %v2886_v12, %s3096_s25  ;;  %2762 = vmatprep.subr.bf16.mxu0 %v3100_v0 }
 0xeb3   :  { %v2888_v61 = vpop.eup %2887 }
 0xeb4   :  { %1791 = vrot.lane.b32.xlu0 %v2888_v61, %s3096_s25  ;;  %v2890_v37 = vpop.eup %2889 }
 0xeb5   :  { %v1650_v24 = vadd.f32 1.0, %v2890_v37 }
 0xeb7   :  { %2893 = vrcp.f32 %v1650_v24  ;;  %v2892_v31 = vpop.eup %2891 }
 0xeb8   :  { %v1785_v46 = vadd.f32 1.0, %v2892_v31 }
 0xeba   :  { %2895 = vrcp.f32 %v1785_v46 }
 0xec4   :  { %v2894_v36 = vpop.eup %2893 }
 0xec5   :  { %v1654_v51 = vmul.f32 %v2894_v36, %v3750_v54 }
 0xec7   :  { %v2896_v62 = vpop.eup %2895 }
 0xf1e   :  { %v1657_v59 = vpop.permute.xlu1 %1656 }
 0xf1f   :  { %v1659_v6 = vmul.f32 %v2894_v36, %v1657_v59 }
 0xf21   :  { %1661 = vrot.lane.b32.xlu1 %v1659_v6, %s3092_s16 }
 0xf25   :  { %1675 = vperm.xlu1 %2798, %v3463_v55  }
 0xf26   :  { %v1792_v10 = vpop.permute.xlu0 %1791 }
 0xf27   :  { %v1794_v23 = vmul.f32 %v2896_v62, %v1792_v10 }
 0xf29   :  { %1810 = vperm.xlu1 %2798, %v3458_v52   ;;  %1796 = vrot.lane.b32.xlu0 %v1794_v23, %s3092_s16  ;;  %v3760_v52 = vsel %vm1542_vm13, %v3656_v63, %v3653_v8  ;;  %v1958_v63 = vld [vmem:[#allocation9 + $0x2] sm:$0x3] }
 0xf2a   :  { %v1789_v55 = vmul.f32 %v2896_v62, %v3760_v52  ;;  %v1960_v12 = vpack.c.bf16 %v1958_v63, %v1958_v63 }
 0xf2c   :  { %2751 = vmatmul.mubr.msk.bf16.vlgmr.msra.gmra.mxu0 %vm209_vm2, %v1960_v12 }
 0xf2d   :  { %2763 = vmatpush3.bf16.msra.mxu0 %v3672_v49  ;;  %2764 = vmatprep.mubr.msk.bf16.mxu0 %vm3101_vm1, %v3100_v0 }
 0xf2e   :  { %2776 = vmatprep.subr.bf16.mxu0 %v3100_v0 }
 0xf6a   :  { %v1910_v46 = vpop.f32.mrf.mxu0 }
 0xf93   :  { %v1662_v16 = vpop.permute.xlu1 %1661 }
 0xf94   :  { %v3753_v58 = vadd.f32 %v1662_v16, %v1654_v51 }
 0xf96   :  { %2897 = vtanh.f32 %v3753_v58 }
 0xf9b   :  { %v1797_v41 = vpop.permute.xlu0 %1796 }
 0xf9c   :  { %v3763_v57 = vadd.f32 %v1797_v41, %v1789_v55 }
 0xf9e   :  { %2899 = vtanh.f32 %v3763_v57 }
 0xfa0   :  { %v3778_v61 = vpop.permute.xlu1 %1675 }
 0xfa1   :  { %vm1677_vm4 = vcmp.eq.s32.totalorder %v3778_v61, 1 }
 0xfa3   :  { %v2898_v35 = vpop.eup %2897 }
 0xfa4   :  { %1667 = vrot.lane.b32.xlu0 %v2898_v35, %s3096_s25  ;;  %v3792_v29 = vpop.permute.xlu1 %1810 }
 0xfa5   :  { %vm1812_vm5 = vcmp.eq.s32.totalorder %v3792_v29, 1 }
 0xfab   :  { %v2900_v8 = vpop.eup %2899 }
 0xfac   :  { %1802 = vrot.lane.b32.xlu0 %v2900_v8, %s3096_s25 }
0x1016   :  { %v1668_v11 = vpop.permute.xlu0 %1667 }
0x1017   :  { %v3780_v19 = vmul.f32 %v2894_v36, %v1668_v11  ;;  %v2738_v36 = vpop.f32.mrf.mxu0 }
0x1019   :  { %v3787_v4 = vsel %vm1677_vm4, %v3780_v19, %v3687_v56  ;;  %v1913_v59 = vpop.f32.mrf.mxu0 }
0x101a   :  { %v1826_v49 = vpack.c.bf16 %v3787_v4, %v3787_v4 }
0x101b   :  { %v2739_v6 = vpop.f32.mrf.mxu0 }
0x101c   :  { %1828 = vrot.lane.b32.xlu1 %v1826_v49, %s3092_s16 }
0x101e   :  { %v1803_v37 = vpop.permute.xlu0 %1802 }
0x101f   :  { %v3794_v24 = vmul.f32 %v2896_v62, %v1803_v37  ;;  %v2045_v62 = vpop.f32.mrf.mxu0 }
0x1021   :  { %v3801_v31 = vsel %vm1812_vm5, %v3794_v24, %v3701_v3  ;;  %v2752_v23 = vpop.f32.mrf.mxu0 }
0x1022   :  { %v1961_v56 = vpack.c.bf16 %v3801_v31, %v3801_v31 }
0x1023   :  { %v2048_v51 = vpop.f32.mrf.mxu0 }
0x1024   :  { %1963 = vrot.lane.b32.xlu0 %v1961_v56, %s3092_s16 }
0x1025   :  { %v2753_v16 = vpop.f32.mrf.mxu0 }
0x108e   :  { %v1829_v10 = vpop.permute.xlu1 %1828 }
0x108f   :  { %2731 = vmatmul.mubr.msk.bf16.vlgmr.msra.gmra.mxu1 %vm159_vm3, %v1829_v10 }
0x1090   :  { %2741 = vmatpush3.bf16.msra.mxu1 %v3707_v2  ;;  %2744 = vmatprep.mubr.msk.bf16.mxu1 %vm3101_vm1, %v3100_v0 }
0x1091   :  { %2742 = vmatprep.subr.bf16.mxu1 %v3100_v0 }
0x1094   :  { %2743 = vmatpush3.bf16.msra.mxu1 %v3713_v15 }
0x1095   :  { %2754 = vmatprep.subr.bf16.mxu1 %v3100_v0 }
0x1096   :  { %v1964_v3 = vpop.permute.xlu0 %1963 }
0x1097   :  { %2745 = vmatmul.mubr.msk.bf16.vlgmr.msra.gmra.mxu1 %vm159_vm3, %v1964_v3 }
0x1098   :  { %2755 = vmatpush3.bf16.msra.mxu1 %v3718_v30  ;;  %2758 = vmatprep.mubr.msk.bf16.mxu1 %vm3101_vm1, %v3100_v0 }
0x1099   :  { %2756 = vmatprep.subr.bf16.mxu1 %v3100_v0 }
0x109c   :  { %2757 = vmatpush3.bf16.msra.mxu1 %v3724_v22 }
0x109d   :  { %2768 = vmatprep.subr.bf16.mxu1 %v3100_v0 }
0x114f   :  { %v1867_v55 = vpop.f32.mrf.mxu1 }
0x1150   :  { %v1911_v41 = vadd.f32 %v1910_v46, %v1867_v55 }
0x1151   :  { %v2732_v35 = vpop.f32.mrf.mxu1 }
0x1152   :  { %v1916_v38 = vadd.f32 %v3731_v47, %v1911_v41 }
0x1153   :  { %v1870_v28 = vpop.f32.mrf.mxu1 }
0x1154   :  { %2901 = vtanh.f32 %v1916_v38  ;;  %v1917_v46 = vsub.f32 0.0, %v1916_v38  ;;  %v3832_v28 = vsel %vm1677_vm4, %v3753_v58, %v3750_v54  ;;  %v2093_v58 = vld [vmem:[#allocation6 + $0xe] sm:$0x3] }
0x1155   :  { %v2733_v30 = vpop.f32.mrf.mxu1 }
0x1156   :  { %v1918_v36 = vmul.f32 1.442695, %v1917_v46 }
0x1157   :  { %v2002_v8 = vpop.f32.mrf.mxu1 }
0x1158   :  { %v2046_v63 = vadd.f32 %v2045_v62, %v2002_v8 }
0x1159   :  { %v2746_v12 = vpop.f32.mrf.mxu1 }
0x115a   :  { %v2051_v11 = vadd.f32 %v3737_v42, %v2046_v63 }
0x115b   :  { %v2005_v22 = vpop.f32.mrf.mxu1 }
0x115c   :  { %2903 = vtanh.f32 %v2051_v11  ;;  %v2052_v59 = vsub.f32 0.0, %v2051_v11  ;;  %v2095_v22 = vpack.c.bf16 %v2093_v58, %v2093_v58 }
0x115d   :  { %v2747_v49 = vpop.f32.mrf.mxu1  ;;  %2905 = vpow2.f32 %v1918_v36 }
0x115e   :  { %v2053_v6 = vmul.f32 1.442695, %v2052_v59  ;;  %2765 = vmatmul.mubr.msk.bf16.vlgmr.msra.gmra.mxu0 %vm209_vm2, %v2095_v22 }
0x115f   :  { %2777 = vmatpush3.bf16.msra.mxu0 %v3661_v39  ;;  %2778 = vmatprep.mubr.msk.bf16.mxu0 %vm3101_vm1, %v3100_v0 }
0x1160   :  { %2907 = vpow2.f32 %v2053_v6 }
0x1161   :  { %v2902_v37 = vpop.eup %2901 }
0x1162   :  { %1926 = vrot.lane.b32.xlu1 %v2902_v37, %s3096_s25 }
0x1169   :  { %v2904_v56 = vpop.eup %2903 }
0x116a   :  { %2061 = vrot.lane.b32.xlu0 %v2904_v56, %s3096_s25  ;;  %v2906_v10 = vpop.eup %2905 }
0x116b   :  { %v1920_v3 = vadd.f32 1.0, %v2906_v10 }
0x116d   :  { %2909 = vrcp.f32 %v1920_v3  ;;  %v2908_v62 = vpop.eup %2907 }
0x116e   :  { %v2055_v23 = vadd.f32 1.0, %v2908_v62 }
0x1170   :  { %2911 = vrcp.f32 %v2055_v23 }
0x117a   :  { %v2910_v51 = vpop.eup %2909 }
0x117b   :  { %v1924_v30 = vmul.f32 %v2910_v51, %v3832_v28 }
0x117d   :  { %v2912_v41 = vpop.eup %2911 }
0x11d4   :  { %v1927_v16 = vpop.permute.xlu1 %1926 }
0x11d5   :  { %v1929_v55 = vmul.f32 %v2910_v51, %v1927_v16 }
0x11d7   :  { %1931 = vrot.lane.b32.xlu1 %v1929_v55, %s3092_s16 }
0x11db   :  { %1945 = vperm.xlu1 %2798, %v3373_v25  }
0x11dc   :  { %v2062_v35 = vpop.permute.xlu0 %2061 }
0x11dd   :  { %v2064_v38 = vmul.f32 %v2912_v41, %v2062_v35 }
0x11df   :  { %2080 = vperm.xlu1 %2798, %v3368_v18   ;;  %2066 = vrot.lane.b32.xlu0 %v2064_v38, %s3092_s16  ;;  %v3842_v18 = vsel %vm1812_vm5, %v3763_v57, %v3760_v52  ;;  %v2227_v57 = vld [vmem:[#allocation9] sm:$0x3] }
0x11e0   :  { %v2059_v25 = vmul.f32 %v2912_v41, %v3842_v18  ;;  %v2228_v49 = vpack.c.bf16 %v2227_v57, %v2227_v57 }
0x11e2   :  { %2779 = vmatmul.mubr.msk.bf16.vlgmr.msra.gmra.mxu0 %vm209_vm2, %v2228_v49 }
0x121e   :  { %v2180_v62 = vpop.f32.mrf.mxu0 }
0x1220   :  { %v2766_v23 = vpop.f32.mrf.mxu0 }
0x1249   :  { %v1932_v8 = vpop.permute.xlu1 %1931 }
0x124a   :  { %v3835_v63 = vadd.f32 %v1932_v8, %v1924_v30 }
0x124c   :  { %2913 = vtanh.f32 %v3835_v63 }
0x1251   :  { %v2067_v12 = vpop.permute.xlu0 %2066 }
0x1252   :  { %v3845_v11 = vadd.f32 %v2067_v12, %v2059_v25 }
0x1254   :  { %2915 = vtanh.f32 %v3845_v11 }
0x1256   :  { %v3855_v37 = vpop.permute.xlu1 %1945 }
0x1257   :  { %vm1947_vm0 = vcmp.eq.s32.totalorder %v3855_v37, 1 }
0x1259   :  { %v2914_v54 = vpop.eup %2913 }
0x125a   :  { %1937 = vrot.lane.b32.xlu0 %v2914_v54, %s3096_s25  ;;  %v3869_v59 = vpop.permute.xlu1 %2080 }
0x125b   :  { %vm2082_vm2 = vcmp.eq.s32.totalorder %v3869_v59, 1 }
0x1261   :  { %v2916_v52 = vpop.eup %2915 }
0x1262   :  { %2072 = vrot.lane.b32.xlu0 %v2916_v52, %s3096_s25 }
0x12cc   :  { %v1938_v56 = vpop.permute.xlu0 %1937 }
0x12cd   :  { %v3857_v46 = vmul.f32 %v2910_v51, %v1938_v56  ;;  %v2183_v51 = vpop.f32.mrf.mxu0 }
0x12cf   :  { %v3864_v39 = vsel %vm1947_vm0, %v3857_v46, %v3787_v4  ;;  %v2767_v16 = vpop.f32.mrf.mxu0  ;;  %v1950_v50 = vsel %vm1947_vm0, %v3857_v46, 0.0 }
0x12d0   :  { %v2096_v36 = vpack.c.bf16 %v3864_v39, %v3864_v39 }
0x12d2   :  { %2098 = vrot.lane.b32.xlu1 %v2096_v36, %s3092_s16 }
0x12d4   :  { %v2073_v6 = vpop.permute.xlu0 %2072 }
0x12d5   :  { %v3871_v10 = vmul.f32 %v2912_v41, %v2073_v6  ;;  %v2313_v41 = vpop.f32.mrf.mxu0 }
0x12d7   :  { %v3878_v3 = vsel %vm2082_vm2, %v3871_v10, %v3801_v31  ;;  %v2780_v35 = vpop.f32.mrf.mxu0  ;;  %v2085_v32 = vsel %vm2082_vm2, %v3871_v10, 0.0 }
0x12d8   :  { %v2229_v4 = vpack.c.bf16 %v3878_v3, %v3878_v3 }
0x12d9   :  { %v2316_v38 = vpop.f32.mrf.mxu0 }
0x12da   :  { %2231 = vrot.lane.b32.xlu0 %v2229_v4, %s3092_s16 }
0x12db   :  { %v2781_v30 = vpop.f32.mrf.mxu0 }
0x1344   :  { %v2099_v55 = vpop.permute.xlu1 %2098 }
0x1345   :  { %2759 = vmatmul.mubr.msk.bf16.vlgmr.msra.gmra.mxu1 %vm159_vm3, %v2099_v55 }
0x1346   :  { %2769 = vmatpush3.bf16.msra.mxu1 %v3707_v2  ;;  %2772 = vmatprep.mubr.msk.bf16.mxu1 %vm3101_vm1, %v3100_v0  ;;  %vm4025_vm1 = vcmask 254976  }
0x1347   :  { %2770 = vmatprep.subr.bf16.mxu1 %v3100_v0  ;;  %vm4027_vm7 = vmmov %vm4025_vm1 }
0x1348   :  { %vm4029_vm11 = vmmov %vm4025_vm1 }
0x1349   :  { %vm4031_vm15 = vmmov %vm4025_vm1 }
0x134a   :  { %2771 = vmatpush3.bf16.msra.mxu1 %v3713_v15  ;;  %vm4033_vm9 = vmmov %vm4025_vm1 }
0x134b   :  { %vm4034_vm12 = vmmov %vm4025_vm1 }
0x134c   :  { %v2232_v31 = vpop.permute.xlu0 %2231  ;;  %vm4035_vm13 = vmmov %vm4025_vm1 }
0x134d   :  { %2773 = vmatmul.mubr.msk.bf16.vlgmr.msra.gmra.mxu1 %vm159_vm3, %v2232_v31  ;;  %vm4026_vm3 = vmmov %vm4025_vm1 }
0x1405   :  { %v2137_v8 = vpop.f32.mrf.mxu1 }
0x1406   :  { %v2181_v25 = vadd.f32 %v2180_v62, %v2137_v8  ;;  %v1949_v8 = vsel %vm1947_vm0, %v3835_v63, %v3832_v28  ;;  %v301_v28 = vsel %vm294_vm6, %v3323_v20, 0.0  ;;  %v1140_v20 = vsel %vm1137_vm8, %v3591_v33, 0.0  ;;  %vm4032_vm8 = vmmov %vm4025_vm1 }
0x1407   :  { %v2760_v12 = vpop.f32.mrf.mxu1 }
0x1408   :  { %v2186_v54 = vadd.f32 %v3731_v47, %v2181_v25 }
0x1409   :  { %v2140_v2 = vpop.f32.mrf.mxu1 }
0x140a   :  { %2917 = vtanh.f32 %v2186_v54  ;;  %v2187_v6 = vsub.f32 0.0, %v2186_v54 }
0x140b   :  { %v2761_v58 = vpop.f32.mrf.mxu1 }
0x140c   :  { %v2188_v4 = vmul.f32 1.442695, %v2187_v6 }
0x140d   :  { %v2270_v22 = vpop.f32.mrf.mxu1 }
0x140e   :  { %v2314_v52 = vadd.f32 %v2313_v41, %v2270_v22 }
0x140f   :  { %v2774_v0 = vpop.f32.mrf.mxu1 }
0x1410   :  { %v2319_v15 = vadd.f32 %v3737_v42, %v2314_v52 }
0x1411   :  { %v2273_v57 = vpop.f32.mrf.mxu1 }
0x1412   :  { %2919 = vtanh.f32 %v2319_v15  ;;  %v2320_v47 = vsub.f32 0.0, %v2319_v15 }
0x1413   :  { %v2775_v49 = vpop.f32.mrf.mxu1  ;;  %2921 = vpow2.f32 %v2188_v4 }
0x1414   :  { %v2321_v62 = vmul.f32 1.442695, %v2320_v47 }
0x1416   :  { %2923 = vpow2.f32 %v2321_v62 }
0x1417   :  { %v2918_v56 = vpop.eup %2917 }
0x1418   :  { %2196 = vrot.lane.b32.xlu1 %v2918_v56, %s3096_s25 }
0x141f   :  { %v2920_v36 = vpop.eup %2919 }
0x1420   :  { %2329 = vrot.lane.b32.xlu0 %v2920_v36, %s3096_s25  ;;  %v2922_v23 = vpop.eup %2921 }
0x1421   :  { %v2190_v51 = vadd.f32 1.0, %v2922_v23 }
0x1423   :  { %2925 = vrcp.f32 %v2190_v51  ;;  %v2924_v16 = vpop.eup %2923 }
0x1424   :  { %v2323_v42 = vadd.f32 1.0, %v2924_v16 }
0x1426   :  { %2927 = vrcp.f32 %v2323_v42 }
0x1430   :  { %v2926_v55 = vpop.eup %2925 }
0x1431   :  { %v2194_v25 = vmul.f32 %v2926_v55, %v1949_v8 }
0x1433   :  { %v3896_v35 = vpop.eup %2927 }
0x148a   :  { %v2197_v31 = vpop.permute.xlu1 %2196 }
0x148b   :  { %v2199_v41 = vmul.f32 %v2926_v55, %v2197_v31 }
0x148d   :  { %2201 = vrot.lane.b32.xlu1 %v2199_v41, %s3092_s16 }
0x1491   :  { %2215 = vperm.xlu1 %2798, %v3288_v44   ;;  %v3909_v44 = vsel %vm2082_vm2, %v3845_v11, %v3842_v18  ;;  %v600_v18 = vsel %vm597_vm10, %v3411_v45, 0.0  ;;  %v870_v11 = vsel %vm867_vm14, %v3501_v17, 0.0  ;;  %v1680_v45 = vsel %vm1677_vm4, %v3780_v19, 0.0  ;;  %vm4028_vm10 = vmmov %vm4025_vm1 }
0x1492   :  { %v2330_v38 = vpop.permute.xlu0 %2329  ;;  %v2327_v2 = vmul.f32 %v3896_v35, %v3909_v44  ;;  %v1815_v17 = vsel %vm1812_vm5, %v3794_v24, 0.0  ;;  %vm4030_vm14 = vmmov %vm4025_vm1 }
0x1493   :  { %v2332_v30 = vmul.f32 %v3896_v35, %v2330_v38  ;;  %vm4036_vm4 = vmmov %vm4025_vm1 }
0x1494   :  { %vm4037_vm5 = vmmov %vm4025_vm1 }
0x1495   :  { %2334 = vrot.lane.b32.xlu0 %v2332_v30, %s3092_s16  ;;  %vm4038_vm2 = vmmov %vm4025_vm1 }
0x1499   :  { %2348 = vperm.xlu0 %2797, %v3283_v43  }
0x14ff   :  { %v2202_v12 = vpop.permute.xlu1 %2201 }
0x1500   :  { %v2204_v54 = vadd.f32 %v2202_v12, %v2194_v25 }
0x1502   :  { %2929 = vtanh.f32 %v2204_v54 }
0x1507   :  { %v2335_v58 = vpop.permute.xlu0 %2334 }
0x1508   :  { %v2337_v43 = vadd.f32 %v2335_v58, %v2327_v2 }
0x150a   :  { %2931 = vtanh.f32 %v2337_v43 }
0x150c   :  { %v2216_v26 = vpop.permute.xlu1 %2215 }
0x150d   :  { %vm2217_vm0 = vcmp.eq.s32.totalorder %v2216_v26, 1 }
0x150e   :  { %v2219_v9 = vsel %vm2217_vm0, %v2204_v54, %v1949_v8 }
0x150f   :  { %v2930_v22 = vpop.eup %2929 }
0x1510   :  { %2207 = vrot.lane.b32.xlu1 %v2930_v22, %s3096_s25 }
0x1514   :  { %303 = vrot.lane.b32.xlu1 %v301_v28, %s3092_s16  ;;  %v2349_v1 = vpop.permute.xlu0 %2348 }
0x1515   :  { %vm2350_vm6 = vcmp.eq.s32.totalorder %v2349_v1, 1 }
0x1517   :  { %v2932_v63 = vpop.eup %2931 }
0x1518   :  { %602 = vrot.lane.b32.xlu1 %v600_v18, %s3092_s16  ;;  %2340 = vrot.lane.b32.xlu0 %v2932_v63, %s3096_s25  ;;  %s3041_s25 = scalar_lea.vmem %s2385_s8, 256 }
0x1519   :  { %p3042_p11 = scmp.ne.s32.totalorder %s2385_s8, %s3041_s25  ;;  %p3047_p13 = scmp.lt.s32.totalorder %s3041_s25, %s3041_s25 }
0x151b   :  { %p3048_p0 = por %p3047_p13, %p3046_p12 }
0x151c   :  { %872 = vrot.lane.b32.xlu1 %v870_v11, %s3092_s16  ;;  %467 = vrot.lane.b32.xlu0 %v465_v7, %s3092_s16 }
0x151d   :  { %p3049_p1 = pnand %p3048_p0, %p3042_p11 }
0x1520   :  { %1142 = vrot.lane.b32.xlu1 %v1140_v20, %s3092_s16  ;;  %737 = vrot.lane.b32.xlu0 %v735_v40, %s3092_s16 }
0x1524   :  { %1412 = vrot.lane.b32.xlu1 %v1410_v21, %s3092_s16  ;;  %1007 = vrot.lane.b32.xlu0 %v1005_v27, %s3092_s16 }
0x1528   :  { %1682 = vrot.lane.b32.xlu1 %v1680_v45, %s3092_s16  ;;  %1277 = vrot.lane.b32.xlu0 %v1275_v48, %s3092_s16 }
0x152c   :  { %1952 = vrot.lane.b32.xlu1 %v1950_v50, %s3092_s16  ;;  %1547 = vrot.lane.b32.xlu0 %v1545_v14, %s3092_s16 }
0x1530   :  { %1817 = vrot.lane.b32.xlu0 %v1815_v17, %s3092_s16 }
0x1534   :  { %2087 = vrot.lane.b32.xlu0 %v2085_v32, %s3092_s16 }
0x1538   :  { %2365 = vrot.lane.b32.xlu0 %v2219_v9, %s3103_s0 }
0x1582   :  { %v2208_v33 = vpop.permute.xlu1 %2207 }
0x1583   :  { %v2210_v34 = vmul.f32 %v2926_v55, %v2208_v33 }
0x1585   :  { %v2220_v13 = vsel %vm2217_vm0, %v2210_v34, 0.0  ;;  %v2218_v5 = vsel %vm2217_vm0, %v2210_v34, %v3864_v39  ;;  %v2352_v39 = vsel %vm2350_vm6, %v2337_v43, %v3909_v44  ;;  %vm4039_vm0 = vmmov %vm4025_vm1 }
0x1586   :  { %2222 = vrot.lane.b32.xlu1 %v2220_v13, %s3092_s16  ;;  %v304_v53 = vpop.permute.xlu1 %303 }
0x1587   :  { %307 = vst.msk [vmem:[#allocation15] sm:$0x3] %vm4025_vm1, %v304_v53  ;;  %vm4040_vm1 = vmmov %vm4039_vm0 }
0x158a   :  { %2360 = vrot.lane.b32.xlu1 %v2218_v5, %s3092_s16  ;;  %v603_v60 = vpop.permute.xlu1 %602  ;;  %v2341_v61 = vpop.permute.xlu0 %2340 }
0x158b   :  { %606 = vst.msk [vmem:[#allocation15 + $0x2] sm:$0x3] %vm4026_vm3, %v603_v60  ;;  %v2343_v19 = vmul.f32 %v3896_v35, %v2341_v61 }
0x158d   :  { %v2353_v29 = vsel %vm2350_vm6, %v2343_v19, 0.0  ;;  %v2351_v24 = vsel %vm2350_vm6, %v2343_v19, %v3878_v3 }
0x158e   :  { %v873_v37 = vpop.permute.xlu1 %872  ;;  %2355 = vrot.lane.b32.xlu0 %v2353_v29, %s3092_s16  ;;  %2370 = vrot.lane.b32.xlu1 %v2351_v24, %s3092_s16  ;;  %v468_v46 = vpop.permute.xlu0 %467 }
0x158f   :  { %876 = vst.msk [vmem:[#allocation15 + $0x4] sm:$0x3] %vm4027_vm7, %v873_v37 }
0x1590   :  { %471 = vst.msk [vmem:[#allocation16 + $0xe] sm:$0x3] %vm4028_vm10, %v468_v46 }
0x1592   :  { %v1143_v59 = vpop.permute.xlu1 %1142  ;;  %2375 = vrot.lane.b32.xlu0 %v2352_v39, %s3103_s0  ;;  %v738_v10 = vpop.permute.xlu0 %737 }
0x1593   :  { %1146 = vst.msk [vmem:[#allocation15 + $0x6] sm:$0x3] %vm4029_vm11, %v1143_v59 }
0x1594   :  { %741 = vst.msk [vmem:[#allocation16 + $0xc] sm:$0x3] %vm4030_vm14, %v738_v10 }
0x1596   :  { %v1413_v3 = vpop.permute.xlu1 %1412  ;;  %v1008_v52 = vpop.permute.xlu0 %1007 }
0x1597   :  { %1416 = vst.msk [vmem:[#allocation15 + $0x8] sm:$0x3] %vm4031_vm15, %v1413_v3 }
0x1598   :  { %1011 = vst.msk [vmem:[#allocation16 + $0xa] sm:$0x3] %vm4032_vm8, %v1008_v52 }
0x159a   :  { %v1683_v0 = vpop.permute.xlu1 %1682  ;;  %v1278_v15 = vpop.permute.xlu0 %1277 }
0x159b   :  { %1686 = vst.msk [vmem:[#allocation15 + $0xa] sm:$0x3] %vm4033_vm9, %v1683_v0 }
0x159c   :  { %1281 = vst.msk [vmem:[#allocation16 + $0x8] sm:$0x3] %vm4034_vm12, %v1278_v15 }
0x159e   :  { %v1953_v57 = vpop.permute.xlu1 %1952  ;;  %v1548_v49 = vpop.permute.xlu0 %1547 }
0x159f   :  { %1956 = vst.msk [vmem:[#allocation15 + $0xc] sm:$0x3] %vm4035_vm13, %v1953_v57 }
0x15a0   :  { %1551 = vst.msk [vmem:[#allocation16 + $0x6] sm:$0x3] %vm4036_vm4, %v1548_v49 }
0x15a2   :  { %v1818_v56 = vpop.permute.xlu0 %1817 }
0x15a3   :  { %1821 = vst.msk [vmem:[#allocation16 + $0x4] sm:$0x3] %vm4037_vm5, %v1818_v56 }
0x15a6   :  { %v2088_v36 = vpop.permute.xlu0 %2087 }
0x15a7   :  { %2091 = vst.msk [vmem:[#allocation16 + $0x2] sm:$0x3] %vm4038_vm2, %v2088_v36 }
0x15aa   :  { %v2366_v6 = vpop.permute.xlu0 %2365 }
0x15ab   :  { %2368 = vst.msk [vmem:[#allocation3] sm:$0x3] %vm4039_vm0, %v2366_v6 }
0x15f8   :  { %v2223_v4 = vpop.permute.xlu1 %2222 }
0x15f9   :  { %2226 = vst.msk [vmem:[#allocation15 + $0xe] sm:$0x3] %vm4040_vm1, %v2223_v4 }
0x15fa   :  { %3052 = shalt.err (!%p3049_p1)
}
0x15fb   :  { %2390 = dma.vmem_to_hbm [thread:$0]  %s2385_s8, 256, %s4022_s9, [#allocation8], %s3092_s16, %s3092_s16, %s3093_s17   ;;  %vm4041_vm3 = vmmov %vm4039_vm0 }
0x15fc   :  { %v2361_v47 = vpop.permute.xlu1 %2360  ;;  %s3105_s6 = smov [#allocation16]   ;;  %vm4042_vm6 = vmmov %vm4039_vm0 }
0x15fd   :  { %s2400_s14 = sshll.u32 %s3105_s6, 4  ;;  %2363 = vst.msk [vmem:[#allocation2] sm:$0x3] %vm4041_vm3, %v2361_v47  ;;  %vm4043_vm7 = vmmov %vm4039_vm0  ;;  %s2401_s14 = int_to_ptr.vmem [resolvable:$true] %s2400_s14 }
0x15fe   :  { %s3061_s15 = scalar_lea.vmem %s2401_s14, 256  ;;  %p3066_p3 = scmp.lt.s32.totalorder %s2401_s14, %s2401_s14 }
0x15ff   :  { %p3062_p2 = scmp.ne.s32.totalorder %s2401_s14, %s3061_s15  ;;  %p3067_p4 = scmp.lt.s32.totalorder %s3061_s15, %s3061_s15 }
0x1600   :  { %v2371_v62 = vpop.permute.xlu1 %2370  ;;  %v2356_v23 = vpop.permute.xlu0 %2355 }
0x1601   :  { %2373 = vst.msk [vmem:[#allocation4] sm:$0x3] %vm4042_vm6, %v2371_v62  ;;  %p3068_p5 = por %p3067_p4, %p3066_p3 }
0x1602   :  { %2358 = vst.msk [vmem:[#allocation16] sm:$0x3] %vm4043_vm7, %v2356_v23 }
0x1603   :  { %p3069_p6 = pnand %p3068_p5, %p3062_p2 }
0x1605   :  { %3072 = shalt.err (!%p3069_p6)
}
0x1606   :  { %2406 = dma.vmem_to_hbm [thread:$0]  %s2401_s14, 256, %s4023_s10, [#allocation17], %s3092_s16, %s3092_s16, %s3093_s17   ;;  %v2376_v51 = vpop.permute.xlu0 %2375  ;;  %vm4044_vm10 = vmmov %vm4039_vm0 }
0x1607   :  { %2378 = vst.msk [vmem:[#allocation5] sm:$0x3] %vm4044_vm10, %v2376_v51 }
0x1608   :  { %3087 = dma.done.wait [#allocation8], 256  }
0x1609   :  { %3088 = vsyncadd [#allocation8], 4294967040 }
0x160a   :  { %3089 = dma.done.wait [#allocation17], 256  }
0x160b   :  { %3090 = vsyncadd [#allocation17], 4294967040 }
0x160c   :  { %2413 = vsyncpa [#allocation7], 1 }
0x160d   :  { %2414 = vsyncpa [#allocation10], 1 }
0x160e   :  { %2415 = vsyncpa [#allocation13], 1 }
0x160f   :  { %2416 = vsyncpa [#allocation8], 1 }
0x1610   :  { %2417 = vsyncpa [#allocation17], 1 }

</bundles_post_ra>
